<compile_context>
chip_gen: v5e
topology: v5e:2x2
jax: 0.10.0
libtpu: 0.0.40
codegen_flags: <defaults>
</compile_context>

<pallas_src>
import math
import functools

import jax
import jax.numpy as jnp
from jax.experimental import pallas as pl
from jax.experimental.pallas import tpu as pltpu


PER_LAYER_REFS = 12  # in_proj_w, in_proj_b, out_proj_w, out_proj_b, ln1_g, ln1_b,
                     # lin1_w, lin1_b, lin2_w, lin2_b, ln2_g, ln2_b


# ------------------------------ fused kernel -------------------------------- #

def _layernorm(y, g, b, eps=1e-5):
    mean = jnp.mean(y, axis=-1, keepdims=True)
    var = jnp.mean(jnp.square(y - mean), axis=-1, keepdims=True)
    return (y - mean) * jax.lax.rsqrt(var + eps) * g + b


def _fused_forward_kernel(*refs, B, S, H, num_layers):
    # refs = [src, pe, proj_w, proj_b]
    #        + num_layers * PER_LAYER_REFS weight refs
    #        + [head_w, head_b]
    #        + [out_ref]                 (pallas output)
    #        + [attn_sc]                 (VMEM scratch)
    n_in = 4 + num_layers * PER_LAYER_REFS + 2
    in_refs = refs[:n_in]
    out_ref = refs[n_in]
    attn_sc = refs[n_in + 1]

    src_ref, pe_ref, proj_w_ref, proj_b_ref = in_refs[0:4]
    layer_refs = [
        in_refs[4 + l * PER_LAYER_REFS: 4 + (l + 1) * PER_LAYER_REFS]
        for l in range(num_layers)
    ]
    head_w_ref, head_b_ref = in_refs[-2], in_refs[-1]

    E = proj_w_ref.shape[1]
    Dh = E // H
    scale = 1.0 / math.sqrt(Dh)

    # ---- input projection + positional encoding (stays in VMEM/vregs) ----
    x = jnp.dot(src_ref[...], proj_w_ref[...],
                preferred_element_type=jnp.float32) + proj_b_ref[...]
    x = x + pe_ref[...]                                   # [B*S, E]

    # causal mask built in-kernel (no [S, S] HBM input)
    row = jax.lax.broadcasted_iota(jnp.int32, (S, S), 0)
    col = jax.lax.broadcasted_iota(jnp.int32, (S, S), 1)
    causal = col <= row                                   # keep on/below diagonal

    for lp in layer_refs:
        (in_w, in_b, out_w, out_b, ln1_g, ln1_b,
         lin1_w, lin1_b, lin2_w, lin2_b, ln2_g, ln2_b) = lp

        # --- multi-head self-attention ---
        qkv = jnp.dot(x, in_w[...], preferred_element_type=jnp.float32) + in_b[...]
        q = qkv[:, 0:E]
        k = qkv[:, E:2 * E]
        v = qkv[:, 2 * E:3 * E]

        for b in range(B):
            r0, r1 = b * S, (b + 1) * S
            for h in range(H):
                c0, c1 = h * Dh, (h + 1) * Dh
                qh = q[r0:r1, c0:c1]                       # [S, Dh]
                kh = k[r0:r1, c0:c1]
                vh = v[r0:r1, c0:c1]
                s = jax.lax.dot_general(
                    qh, kh, (((1,), (1,)), ((), ())),
                    preferred_element_type=jnp.float32) * scale      # [S, S]
                s = jnp.where(causal, s, -jnp.inf)
                s = s - jnp.max(s, axis=-1, keepdims=True)
                p = jnp.exp(s)
                p = p * pl.reciprocal(jnp.sum(p, axis=-1, keepdims=True), approx=True)
                attn_sc[r0:r1, c0:c1] = jnp.dot(
                    p, vh, preferred_element_type=jnp.float32)

        attn = jnp.dot(attn_sc[...], out_w[...],
                       preferred_element_type=jnp.float32) + out_b[...]
        x = _layernorm(x + attn, ln1_g[...], ln1_b[...])   # post-norm 1

        # --- feed forward; the [B*S, F] intermediate never leaves VMEM ---
        ff = jnp.maximum(
            jnp.dot(x, lin1_w[...], preferred_element_type=jnp.float32) + lin1_b[...],
            0.0)
        ff = jnp.dot(ff, lin2_w[...], preferred_element_type=jnp.float32) + lin2_b[...]
        x = _layernorm(x + ff, ln2_g[...], ln2_b[...])     # post-norm 2

    # --- fused decoder + classifier head (last-token slice done in wrapper) ---
    out_ref[...] = jnp.dot(x, head_w_ref[...],
                           preferred_element_type=jnp.float32) + head_b_ref[...]


# ------------------------------ host wrappers -------------------------------- #

def positional_encoding(seq_len, d_model):
    pos = jnp.arange(seq_len, dtype=jnp.float32)[:, None]
    div = jnp.exp(jnp.arange(0, d_model, 2, dtype=jnp.float32) *
                  (-math.log(10000.0) / d_model))
    pe = jnp.zeros((seq_len, d_model), jnp.float32)
    pe = pe.at[:, 0::2].set(jnp.sin(pos * div))
    pe = pe.at[:, 1::2].set(jnp.cos(pos * div))
    return pe


def prepare_weights(params):
    """One-time conversion from PyTorch nn.Linear layout ([out, in]) to kernel
    layout ([in, out]); biases become [1, out]; decoder+classifier fused."""
    f32 = lambda a: jnp.asarray(a, jnp.float32)
    flat = [f32(params["proj_w"]).T, f32(params["proj_b"]).reshape(1, -1)]
    for lp in params["layers"]:
        flat += [
            f32(lp["in_proj_w"]).T, f32(lp["in_proj_b"]).reshape(1, -1),
            f32(lp["out_proj_w"]).T, f32(lp["out_proj_b"]).reshape(1, -1),
            f32(lp["ln1_g"]).reshape(1, -1), f32(lp["ln1_b"]).reshape(1, -1),
            f32(lp["lin1_w"]).T, f32(lp["lin1_b"]).reshape(1, -1),
            f32(lp["lin2_w"]).T, f32(lp["lin2_b"]).reshape(1, -1),
            f32(lp["ln2_g"]).reshape(1, -1), f32(lp["ln2_b"]).reshape(1, -1),
        ]
    head_w = jnp.concatenate([f32(params["dec_w"]), f32(params["cls_w"])], axis=0).T
    head_b = jnp.concatenate(
        [f32(params["dec_b"]), f32(params["cls_b"])]).reshape(1, -1)
    flat += [head_w, head_b]
    return flat


def generator_transformer_forward(src, weights_flat, *, num_heads, num_layers,
                                  output_len):
    """src: [B, S, input_dim] -> (gen [B, output_len], cls [B, 3])"""
    B, S, in_dim = src.shape
    E = weights_flat[0].shape[1]
    OD = weights_flat[-1].shape[1]            # output_len + 3

    src2 = jnp.asarray(src, jnp.float32).reshape(B * S, in_dim)
    pe_tiled = jnp.tile(positional_encoding(S, E), (B, 1))   # [B*S, E]

    inputs = [src2, pe_tiled] + list(weights_flat)

    kernel = functools.partial(_fused_forward_kernel, B=B, S=S, H=num_heads,
                               num_layers=num_layers)

    in_specs = [pl.BlockSpec(a.shape, lambda i: (0, 0)) for a in inputs]

    out = pl.pallas_call(
        kernel,
        out_shape=jax.ShapeDtypeStruct((B * S, OD), jnp.float32),
        grid=(1,),
        in_specs=in_specs,
        out_specs=pl.BlockSpec((B * S, OD), lambda i: (0, 0)),
        scratch_shapes=[pltpu.VMEM((B * S, E), jnp.float32)],
        compiler_params=pltpu.CompilerParams(dimension_semantics=("arbitrary",)),
    )(*inputs)

    last = out.reshape(B, S, OD)[:, -1, :]     # last time step
    return last[:, :output_len], last[:, output_len:]


# ----------------------------- pure-JAX reference --------------------------- #

def _ln_ref(y, g, b, eps=1e-5):
    mean = jnp.mean(y, axis=-1, keepdims=True)
    var = jnp.mean(jnp.square(y - mean), axis=-1, keepdims=True)
    return (y - mean) * jax.lax.rsqrt(var + eps) * g + b


def reference_forward(src, params, num_heads):
    B, S, _ = src.shape
    E = params["proj_w"].shape[0]
    H, Dh = num_heads, E // num_heads
    x = src @ params["proj_w"].T + params["proj_b"]
    x = x + positional_encoding(S, E)[None]
    mask = jnp.where(jnp.arange(S)[None, :] > jnp.arange(S)[:, None], -jnp.inf, 0.0)
    for lp in params["layers"]:
        qkv = x @ lp["in_proj_w"].T + lp["in_proj_b"]
        q, k, v = qkv[..., :E], qkv[..., E:2 * E], qkv[..., 2 * E:]
        q = q.reshape(B, S, H, Dh).transpose(0, 2, 1, 3)
        k = k.reshape(B, S, H, Dh).transpose(0, 2, 1, 3)
        v = v.reshape(B, S, H, Dh).transpose(0, 2, 1, 3)
        s = jnp.einsum('bhqd,bhkd->bhqk', q, k) / math.sqrt(Dh) + mask
        p = jax.nn.softmax(s, axis=-1)
        a = jnp.einsum('bhqk,bhkd->bhqd', p, v).transpose(0, 2, 1, 3).reshape(B, S, E)
        a = a @ lp["out_proj_w"].T + lp["out_proj_b"]
        x = _ln_ref(x + a, lp["ln1_g"], lp["ln1_b"])
        f = jax.nn.relu(x @ lp["lin1_w"].T + lp["lin1_b"]) @ lp["lin2_w"].T + lp["lin2_b"]
        x = _ln_ref(x + f, lp["ln2_g"], lp["ln2_b"])
    last = x[:, -1, :]
    return last @ params["dec_w"].T + params["dec_b"], \
           last @ params["cls_w"].T + params["cls_b"]


# ------------------------------ parameter init ------------------------------- #

def init_params(key, input_dim, feature_size, num_layers, dim_feedforward, output_len):
    E, F = feature_size, dim_feedforward
    keys = jax.random.split(key, 4 + num_layers)
    scale = 0.02

    def layer_params(k):
        ks = jax.random.split(k, 4)
        return dict(
            in_proj_w=jax.random.normal(ks[0], (3 * E, E), jnp.float32) * scale,
            in_proj_b=jnp.zeros((3 * E,), jnp.float32),
            out_proj_w=jax.random.normal(ks[1], (E, E), jnp.float32) * scale,
            out_proj_b=jnp.zeros((E,), jnp.float32),
            lin1_w=jax.random.normal(ks[2], (F, E), jnp.float32) * scale,
            lin1_b=jnp.zeros((F,), jnp.float32),
            lin2_w=jax.random.normal(ks[3], (E, F), jnp.float32) * scale,
            lin2_b=jnp.zeros((E,), jnp.float32),
            ln1_g=jnp.ones((E,), jnp.float32), ln1_b=jnp.zeros((E,), jnp.float32),
            ln2_g=jnp.ones((E,), jnp.float32), ln2_b=jnp.zeros((E,), jnp.float32),
        )

    return dict(
        proj_w=jax.random.normal(keys[0], (E, input_dim), jnp.float32) * scale,
        proj_b=jnp.zeros((E,), jnp.float32),
        layers=[layer_params(keys[4 + i]) for i in range(num_layers)],
        # _init_weights(): decoder weight ~ U(-0.1, 0.1), bias zero
        dec_w=jax.random.uniform(keys[1], (output_len, E), jnp.float32, -0.1, 0.1),
        dec_b=jnp.zeros((output_len,), jnp.float32),
        cls_w=jax.random.normal(keys[2], (3, E), jnp.float32) * scale,
        cls_b=jnp.zeros((3,), jnp.float32),
    )


# ----------------------------------- main ------------------------------------ #

if __name__ == "__main__":
    key = jax.random.PRNGKey(0)
    k_par, k_src = jax.random.split(key)

    # small shapes consistent with the module
    B, S, input_dim = 2, 8, 16
    feature_size, num_heads, num_layers = 32, 4, 2
    dim_feedforward = 2048          # nn.TransformerEncoderLayer default
    output_len = 1

    params = init_params(k_par, input_dim, feature_size, num_layers,
                         dim_feedforward, output_len)
    weights_flat = prepare_weights(params)      # one-time layout conversion
    src = jax.random.normal(k_src, (B, S, input_dim), dtype=jnp.float32)

    fwd = jax.jit(functools.partial(generator_transformer_forward,
                                    num_heads=num_heads, num_layers=num_layers,
                                    output_len=output_len))
    gen, cls = fwd(src, weights_flat)
    jax.block_until_ready((gen, cls))

    assert gen.shape == (B, output_len) and cls.shape == (B, 3)

    # numerical check against a pure-JAX reference of the same module
    gen_ref, cls_ref = reference_forward(src, params, num_heads)
    assert jnp.allclose(gen, gen_ref, atol=2e-2, rtol=2e-2)
    assert jnp.allclose(cls, cls_ref, atol=2e-2, rtol=2e-2)

    print("KERNEL_OK")
</pallas_src>

<mosaic_0001>
module attributes {stable_mosaic.version = 11 : i64} {
  func.func @_fused_forward_kernel(%arg0: i32, %arg1: memref<16x16xf32, #tpu.memory_space<vmem>>, %arg2: memref<16x32xf32, #tpu.memory_space<vmem>>, %arg3: memref<16x32xf32, #tpu.memory_space<vmem>>, %arg4: memref<1x32xf32, #tpu.memory_space<vmem>>, %arg5: memref<32x96xf32, #tpu.memory_space<vmem>>, %arg6: memref<1x96xf32, #tpu.memory_space<vmem>>, %arg7: memref<32x32xf32, #tpu.memory_space<vmem>>, %arg8: memref<1x32xf32, #tpu.memory_space<vmem>>, %arg9: memref<1x32xf32, #tpu.memory_space<vmem>>, %arg10: memref<1x32xf32, #tpu.memory_space<vmem>>, %arg11: memref<32x2048xf32, #tpu.memory_space<vmem>>, %arg12: memref<1x2048xf32, #tpu.memory_space<vmem>>, %arg13: memref<2048x32xf32, #tpu.memory_space<vmem>>, %arg14: memref<1x32xf32, #tpu.memory_space<vmem>>, %arg15: memref<1x32xf32, #tpu.memory_space<vmem>>, %arg16: memref<1x32xf32, #tpu.memory_space<vmem>>, %arg17: memref<32x96xf32, #tpu.memory_space<vmem>>, %arg18: memref<1x96xf32, #tpu.memory_space<vmem>>, %arg19: memref<32x32xf32, #tpu.memory_space<vmem>>, %arg20: memref<1x32xf32, #tpu.memory_space<vmem>>, %arg21: memref<1x32xf32, #tpu.memory_space<vmem>>, %arg22: memref<1x32xf32, #tpu.memory_space<vmem>>, %arg23: memref<32x2048xf32, #tpu.memory_space<vmem>>, %arg24: memref<1x2048xf32, #tpu.memory_space<vmem>>, %arg25: memref<2048x32xf32, #tpu.memory_space<vmem>>, %arg26: memref<1x32xf32, #tpu.memory_space<vmem>>, %arg27: memref<1x32xf32, #tpu.memory_space<vmem>>, %arg28: memref<1x32xf32, #tpu.memory_space<vmem>>, %arg29: memref<32x4xf32, #tpu.memory_space<vmem>>, %arg30: memref<1x4xf32, #tpu.memory_space<vmem>>, %arg31: memref<16x4xf32, #tpu.memory_space<vmem>>, %arg32: memref<16x32xf32, #tpu.memory_space<vmem>>) attributes {dimension_semantics = [#tpu.dimension_semantics<arbitrary>], iteration_bounds = array<i64: 1>, scalar_prefetch = 0 : i64, scratch_operands = 1 : i64, tpu.core_type = #tpu.core_type<tc>, window_params = [{pipeline_mode = #tpu.pipeline_mode<synchronous>, transform_indices = @transform_0, window_bounds = array<i64: 16, 16>}, {pipeline_mode = #tpu.pipeline_mode<synchronous>, transform_indices = @transform_1, window_bounds = array<i64: 16, 32>}, {pipeline_mode = #tpu.pipeline_mode<synchronous>, transform_indices = @transform_2, window_bounds = array<i64: 16, 32>}, {pipeline_mode = #tpu.pipeline_mode<synchronous>, transform_indices = @transform_3, window_bounds = array<i64: 1, 32>}, {pipeline_mode = #tpu.pipeline_mode<synchronous>, transform_indices = @transform_4, window_bounds = array<i64: 32, 96>}, {pipeline_mode = #tpu.pipeline_mode<synchronous>, transform_indices = @transform_5, window_bounds = array<i64: 1, 96>}, {pipeline_mode = #tpu.pipeline_mode<synchronous>, transform_indices = @transform_6, window_bounds = array<i64: 32, 32>}, {pipeline_mode = #tpu.pipeline_mode<synchronous>, transform_indices = @transform_7, window_bounds = array<i64: 1, 32>}, {pipeline_mode = #tpu.pipeline_mode<synchronous>, transform_indices = @transform_8, window_bounds = array<i64: 1, 32>}, {pipeline_mode = #tpu.pipeline_mode<synchronous>, transform_indices = @transform_9, window_bounds = array<i64: 1, 32>}, {pipeline_mode = #tpu.pipeline_mode<synchronous>, transform_indices = @transform_10, window_bounds = array<i64: 32, 2048>}, {pipeline_mode = #tpu.pipeline_mode<synchronous>, transform_indices = @transform_11, window_bounds = array<i64: 1, 2048>}, {pipeline_mode = #tpu.pipeline_mode<synchronous>, transform_indices = @transform_12, window_bounds = array<i64: 2048, 32>}, {pipeline_mode = #tpu.pipeline_mode<synchronous>, transform_indices = @transform_13, window_bounds = array<i64: 1, 32>}, {pipeline_mode = #tpu.pipeline_mode<synchronous>, transform_indices = @transform_14, window_bounds = array<i64: 1, 32>}, {pipeline_mode = #tpu.pipeline_mode<synchronous>, transform_indices = @transform_15, window_bounds = array<i64: 1, 32>}, {pipeline_mode = #tpu.pipeline_mode<synchronous>, transform_indices = @transform_16, window_bounds = array<i64: 32, 96>}, {pipeline_mode = #tpu.pipeline_mode<synchronous>, transform_indices = @transform_17, window_bounds = array<i64: 1, 96>}, {pipeline_mode = #tpu.pipeline_mode<synchronous>, transform_indices = @transform_18, window_bounds = array<i64: 32, 32>}, {pipeline_mode = #tpu.pipeline_mode<synchronous>, transform_indices = @transform_19, window_bounds = array<i64: 1, 32>}, {pipeline_mode = #tpu.pipeline_mode<synchronous>, transform_indices = @transform_20, window_bounds = array<i64: 1, 32>}, {pipeline_mode = #tpu.pipeline_mode<synchronous>, transform_indices = @transform_21, window_bounds = array<i64: 1, 32>}, {pipeline_mode = #tpu.pipeline_mode<synchronous>, transform_indices = @transform_22, window_bounds = array<i64: 32, 2048>}, {pipeline_mode = #tpu.pipeline_mode<synchronous>, transform_indices = @transform_23, window_bounds = array<i64: 1, 2048>}, {pipeline_mode = #tpu.pipeline_mode<synchronous>, transform_indices = @transform_24, window_bounds = array<i64: 2048, 32>}, {pipeline_mode = #tpu.pipeline_mode<synchronous>, transform_indices = @transform_25, window_bounds = array<i64: 1, 32>}, {pipeline_mode = #tpu.pipeline_mode<synchronous>, transform_indices = @transform_26, window_bounds = array<i64: 1, 32>}, {pipeline_mode = #tpu.pipeline_mode<synchronous>, transform_indices = @transform_27, window_bounds = array<i64: 1, 32>}, {pipeline_mode = #tpu.pipeline_mode<synchronous>, transform_indices = @transform_28, window_bounds = array<i64: 32, 4>}, {pipeline_mode = #tpu.pipeline_mode<synchronous>, transform_indices = @transform_29, window_bounds = array<i64: 1, 4>}, {pipeline_mode = #tpu.pipeline_mode<synchronous>, transform_indices = @transform_30, window_bounds = array<i64: 16, 4>}]} {
    %c0 = arith.constant 0 : index
    %c0_0 = arith.constant 0 : index
    %0 = vector.load %arg1[%c0, %c0_0] : memref<16x16xf32, #tpu.memory_space<vmem>>, vector<16x16xf32>
    %c0_1 = arith.constant 0 : index
    %c0_2 = arith.constant 0 : index
    %1 = vector.load %arg3[%c0_1, %c0_2] : memref<16x32xf32, #tpu.memory_space<vmem>>, vector<16x32xf32>
    %cst = arith.constant dense<0.000000e+00> : vector<16x32xf32>
    %2 = tpu.matmul %0, %1, %cst {dimension_numbers = #tpu.dot_dimension_numbers<[1], [0], [0], [1], [0, 0, 1, 1], [], []>} : vector<16x16xf32>, vector<16x32xf32>, vector<16x32xf32> -> vector<16x32xf32>
    %c0_3 = arith.constant 0 : index
    %c0_4 = arith.constant 0 : index
    %3 = vector.load %arg4[%c0_3, %c0_4] : memref<1x32xf32, #tpu.memory_space<vmem>>, vector<1x32xf32>
    %4 = vector.broadcast %3 : vector<1x32xf32> to vector<16x32xf32>
    %5 = arith.addf %2, %4 : vector<16x32xf32>
    %c0_5 = arith.constant 0 : index
    %c0_6 = arith.constant 0 : index
    %6 = vector.load %arg2[%c0_5, %c0_6] : memref<16x32xf32, #tpu.memory_space<vmem>>, vector<16x32xf32>
    %7 = arith.addf %5, %6 : vector<16x32xf32>
    %8 = tpu.iota {dimensions = array<i32: 0>} : vector<8x8xi32>
    %9 = tpu.iota {dimensions = array<i32: 1>} : vector<8x8xi32>
    %10 = arith.cmpi sle, %9, %8 : vector<8x8xi32>
    %c0_7 = arith.constant 0 : index
    %c0_8 = arith.constant 0 : index
    %11 = vector.load %arg5[%c0_7, %c0_8] : memref<32x96xf32, #tpu.memory_space<vmem>>, vector<32x96xf32>
    %cst_9 = arith.constant dense<0.000000e+00> : vector<16x96xf32>
    %12 = tpu.matmul %7, %11, %cst_9 {dimension_numbers = #tpu.dot_dimension_numbers<[1], [0], [0], [1], [0, 0, 1, 1], [], []>} : vector<16x32xf32>, vector<32x96xf32>, vector<16x96xf32> -> vector<16x96xf32>
    %c0_10 = arith.constant 0 : index
    %c0_11 = arith.constant 0 : index
    %13 = vector.load %arg6[%c0_10, %c0_11] : memref<1x96xf32, #tpu.memory_space<vmem>>, vector<1x96xf32>
    %14 = vector.broadcast %13 : vector<1x96xf32> to vector<16x96xf32>
    %15 = arith.addf %12, %14 : vector<16x96xf32>
    %16 = vector.extract_strided_slice %15 {offsets = [0, 0], sizes = [16, 32], strides = [1, 1]} : vector<16x96xf32> to vector<16x32xf32>
    %17 = vector.extract_strided_slice %15 {offsets = [0, 32], sizes = [16, 32], strides = [1, 1]} : vector<16x96xf32> to vector<16x32xf32>
    %18 = vector.extract_strided_slice %15 {offsets = [0, 64], sizes = [16, 32], strides = [1, 1]} : vector<16x96xf32> to vector<16x32xf32>
    %19 = vector.extract_strided_slice %16 {offsets = [0, 0], sizes = [8, 8], strides = [1, 1]} : vector<16x32xf32> to vector<8x8xf32>
    %20 = vector.extract_strided_slice %17 {offsets = [0, 0], sizes = [8, 8], strides = [1, 1]} : vector<16x32xf32> to vector<8x8xf32>
    %21 = vector.extract_strided_slice %18 {offsets = [0, 0], sizes = [8, 8], strides = [1, 1]} : vector<16x32xf32> to vector<8x8xf32>
    %cst_12 = arith.constant dense<0.000000e+00> : vector<8x8xf32>
    %22 = tpu.matmul %19, %20, %cst_12 {dimension_numbers = #tpu.dot_dimension_numbers<[1], [1], [0], [0], [0, 0, 1, 0], [], []>} : vector<8x8xf32>, vector<8x8xf32>, vector<8x8xf32> -> vector<8x8xf32>
    %cst_13 = arith.constant 0.353553385 : f32
    %23 = vector.broadcast %cst_13 : f32 to vector<8x8xf32>
    %24 = arith.mulf %22, %23 : vector<8x8xf32>
    %cst_14 = arith.constant 0xFF800000 : f32
    %25 = vector.broadcast %cst_14 : f32 to vector<8x8xf32>
    %26 = arith.select %10, %24, %25 : vector<8x8xi1>, vector<8x8xf32>
    %cst_15 = arith.constant dense<0xFF800000> : vector<8xf32>
    %27 = vector.multi_reduction <maximumf>, %26, %cst_15 [1] : vector<8x8xf32> to vector<8xf32>
    %28 = vector.shape_cast %27 : vector<8xf32> to vector<8x1xf32>
    %29 = vector.broadcast %28 : vector<8x1xf32> to vector<8x8xf32>
    %30 = arith.subf %26, %29 : vector<8x8xf32>
    %31 = math.exp %30 : vector<8x8xf32>
    %cst_16 = arith.constant dense<0.000000e+00> : vector<8xf32>
    %32 = vector.multi_reduction <add>, %31, %cst_16 [1] : vector<8x8xf32> to vector<8xf32>
    %33 = vector.shape_cast %32 : vector<8xf32> to vector<8x1xf32>
    %34 = tpu.reciprocal %33 {approx = true} : vector<8x1xf32> -> vector<8x1xf32>
    %35 = vector.broadcast %34 : vector<8x1xf32> to vector<8x8xf32>
    %36 = arith.mulf %31, %35 : vector<8x8xf32>
    %cst_17 = arith.constant dense<0.000000e+00> : vector<8x8xf32>
    %37 = tpu.matmul %36, %21, %cst_17 {dimension_numbers = #tpu.dot_dimension_numbers<[1], [0], [0], [1], [0, 0, 1, 1], [], []>} : vector<8x8xf32>, vector<8x8xf32>, vector<8x8xf32> -> vector<8x8xf32>
    %c0_18 = arith.constant 0 : index
    %c0_19 = arith.constant 0 : index
    %38 = vector.load %arg32[%c0_18, %c0_19] : memref<16x32xf32, #tpu.memory_space<vmem>>, vector<8x8xf32>
    tpu.vector_store %arg32[%c0_18, %c0_19], %37 {strides = array<i32>} : memref<16x32xf32, #tpu.memory_space<vmem>>, vector<8x8xf32>,
    %39 = vector.extract_strided_slice %16 {offsets = [0, 8], sizes = [8, 8], strides = [1, 1]} : vector<16x32xf32> to vector<8x8xf32>
    %40 = vector.extract_strided_slice %17 {offsets = [0, 8], sizes = [8, 8], strides = [1, 1]} : vector<16x32xf32> to vector<8x8xf32>
    %41 = vector.extract_strided_slice %18 {offsets = [0, 8], sizes = [8, 8], strides = [1, 1]} : vector<16x32xf32> to vector<8x8xf32>
    %cst_20 = arith.constant dense<0.000000e+00> : vector<8x8xf32>
    %42 = tpu.matmul %39, %40, %cst_20 {dimension_numbers = #tpu.dot_dimension_numbers<[1], [1], [0], [0], [0, 0, 1, 0], [], []>} : vector<8x8xf32>, vector<8x8xf32>, vector<8x8xf32> -> vector<8x8xf32>
    %cst_21 = arith.constant 0.353553385 : f32
    %43 = vector.broadcast %cst_21 : f32 to vector<8x8xf32>
    %44 = arith.mulf %42, %43 : vector<8x8xf32>
    %cst_22 = arith.constant 0xFF800000 : f32
    %45 = vector.broadcast %cst_22 : f32 to vector<8x8xf32>
    %46 = arith.select %10, %44, %45 : vector<8x8xi1>, vector<8x8xf32>
    %cst_23 = arith.constant dense<0xFF800000> : vector<8xf32>
    %47 = vector.multi_reduction <maximumf>, %46, %cst_23 [1] : vector<8x8xf32> to vector<8xf32>
    %48 = vector.shape_cast %47 : vector<8xf32> to vector<8x1xf32>
    %49 = vector.broadcast %48 : vector<8x1xf32> to vector<8x8xf32>
    %50 = arith.subf %46, %49 : vector<8x8xf32>
    %51 = math.exp %50 : vector<8x8xf32>
    %cst_24 = arith.constant dense<0.000000e+00> : vector<8xf32>
    %52 = vector.multi_reduction <add>, %51, %cst_24 [1] : vector<8x8xf32> to vector<8xf32>
    %53 = vector.shape_cast %52 : vector<8xf32> to vector<8x1xf32>
    %54 = tpu.reciprocal %53 {approx = true} : vector<8x1xf32> -> vector<8x1xf32>
    %55 = vector.broadcast %54 : vector<8x1xf32> to vector<8x8xf32>
    %56 = arith.mulf %51, %55 : vector<8x8xf32>
    %cst_25 = arith.constant dense<0.000000e+00> : vector<8x8xf32>
    %57 = tpu.matmul %56, %41, %cst_25 {dimension_numbers = #tpu.dot_dimension_numbers<[1], [0], [0], [1], [0, 0, 1, 1], [], []>} : vector<8x8xf32>, vector<8x8xf32>, vector<8x8xf32> -> vector<8x8xf32>
    %c0_26 = arith.constant 0 : index
    %c8 = arith.constant 8 : index
    %58 = vector.load %arg32[%c0_26, %c8] : memref<16x32xf32, #tpu.memory_space<vmem>>, vector<8x8xf32>
    tpu.vector_store %arg32[%c0_26, %c8], %57 {strides = array<i32>} : memref<16x32xf32, #tpu.memory_space<vmem>>, vector<8x8xf32>,
    %59 = vector.extract_strided_slice %16 {offsets = [0, 16], sizes = [8, 8], strides = [1, 1]} : vector<16x32xf32> to vector<8x8xf32>
    %60 = vector.extract_strided_slice %17 {offsets = [0, 16], sizes = [8, 8], strides = [1, 1]} : vector<16x32xf32> to vector<8x8xf32>
    %61 = vector.extract_strided_slice %18 {offsets = [0, 16], sizes = [8, 8], strides = [1, 1]} : vector<16x32xf32> to vector<8x8xf32>
    %cst_27 = arith.constant dense<0.000000e+00> : vector<8x8xf32>
    %62 = tpu.matmul %59, %60, %cst_27 {dimension_numbers = #tpu.dot_dimension_numbers<[1], [1], [0], [0], [0, 0, 1, 0], [], []>} : vector<8x8xf32>, vector<8x8xf32>, vector<8x8xf32> -> vector<8x8xf32>
    %cst_28 = arith.constant 0.353553385 : f32
    %63 = vector.broadcast %cst_28 : f32 to vector<8x8xf32>
    %64 = arith.mulf %62, %63 : vector<8x8xf32>
    %cst_29 = arith.constant 0xFF800000 : f32
    %65 = vector.broadcast %cst_29 : f32 to vector<8x8xf32>
    %66 = arith.select %10, %64, %65 : vector<8x8xi1>, vector<8x8xf32>
    %cst_30 = arith.constant dense<0xFF800000> : vector<8xf32>
    %67 = vector.multi_reduction <maximumf>, %66, %cst_30 [1] : vector<8x8xf32> to vector<8xf32>
    %68 = vector.shape_cast %67 : vector<8xf32> to vector<8x1xf32>
    %69 = vector.broadcast %68 : vector<8x1xf32> to vector<8x8xf32>
    %70 = arith.subf %66, %69 : vector<8x8xf32>
    %71 = math.exp %70 : vector<8x8xf32>
    %cst_31 = arith.constant dense<0.000000e+00> : vector<8xf32>
    %72 = vector.multi_reduction <add>, %71, %cst_31 [1] : vector<8x8xf32> to vector<8xf32>
    %73 = vector.shape_cast %72 : vector<8xf32> to vector<8x1xf32>
    %74 = tpu.reciprocal %73 {approx = true} : vector<8x1xf32> -> vector<8x1xf32>
    %75 = vector.broadcast %74 : vector<8x1xf32> to vector<8x8xf32>
    %76 = arith.mulf %71, %75 : vector<8x8xf32>
    %cst_32 = arith.constant dense<0.000000e+00> : vector<8x8xf32>
    %77 = tpu.matmul %76, %61, %cst_32 {dimension_numbers = #tpu.dot_dimension_numbers<[1], [0], [0], [1], [0, 0, 1, 1], [], []>} : vector<8x8xf32>, vector<8x8xf32>, vector<8x8xf32> -> vector<8x8xf32>
    %c0_33 = arith.constant 0 : index
    %c16 = arith.constant 16 : index
    %78 = vector.load %arg32[%c0_33, %c16] : memref<16x32xf32, #tpu.memory_space<vmem>>, vector<8x8xf32>
    tpu.vector_store %arg32[%c0_33, %c16], %77 {strides = array<i32>} : memref<16x32xf32, #tpu.memory_space<vmem>>, vector<8x8xf32>,
    %79 = vector.extract_strided_slice %16 {offsets = [0, 24], sizes = [8, 8], strides = [1, 1]} : vector<16x32xf32> to vector<8x8xf32>
    %80 = vector.extract_strided_slice %17 {offsets = [0, 24], sizes = [8, 8], strides = [1, 1]} : vector<16x32xf32> to vector<8x8xf32>
    %81 = vector.extract_strided_slice %18 {offsets = [0, 24], sizes = [8, 8], strides = [1, 1]} : vector<16x32xf32> to vector<8x8xf32>
    %cst_34 = arith.constant dense<0.000000e+00> : vector<8x8xf32>
    %82 = tpu.matmul %79, %80, %cst_34 {dimension_numbers = #tpu.dot_dimension_numbers<[1], [1], [0], [0], [0, 0, 1, 0], [], []>} : vector<8x8xf32>, vector<8x8xf32>, vector<8x8xf32> -> vector<8x8xf32>
    %cst_35 = arith.constant 0.353553385 : f32
    %83 = vector.broadcast %cst_35 : f32 to vector<8x8xf32>
    %84 = arith.mulf %82, %83 : vector<8x8xf32>
    %cst_36 = arith.constant 0xFF800000 : f32
    %85 = vector.broadcast %cst_36 : f32 to vector<8x8xf32>
    %86 = arith.select %10, %84, %85 : vector<8x8xi1>, vector<8x8xf32>
    %cst_37 = arith.constant dense<0xFF800000> : vector<8xf32>
    %87 = vector.multi_reduction <maximumf>, %86, %cst_37 [1] : vector<8x8xf32> to vector<8xf32>
    %88 = vector.shape_cast %87 : vector<8xf32> to vector<8x1xf32>
    %89 = vector.broadcast %88 : vector<8x1xf32> to vector<8x8xf32>
    %90 = arith.subf %86, %89 : vector<8x8xf32>
    %91 = math.exp %90 : vector<8x8xf32>
    %cst_38 = arith.constant dense<0.000000e+00> : vector<8xf32>
    %92 = vector.multi_reduction <add>, %91, %cst_38 [1] : vector<8x8xf32> to vector<8xf32>
    %93 = vector.shape_cast %92 : vector<8xf32> to vector<8x1xf32>
    %94 = tpu.reciprocal %93 {approx = true} : vector<8x1xf32> -> vector<8x1xf32>
    %95 = vector.broadcast %94 : vector<8x1xf32> to vector<8x8xf32>
    %96 = arith.mulf %91, %95 : vector<8x8xf32>
    %cst_39 = arith.constant dense<0.000000e+00> : vector<8x8xf32>
    %97 = tpu.matmul %96, %81, %cst_39 {dimension_numbers = #tpu.dot_dimension_numbers<[1], [0], [0], [1], [0, 0, 1, 1], [], []>} : vector<8x8xf32>, vector<8x8xf32>, vector<8x8xf32> -> vector<8x8xf32>
    %c0_40 = arith.constant 0 : index
    %c24 = arith.constant 24 : index
    %98 = vector.load %arg32[%c0_40, %c24] : memref<16x32xf32, #tpu.memory_space<vmem>>, vector<8x8xf32>
    tpu.vector_store %arg32[%c0_40, %c24], %97 {strides = array<i32>} : memref<16x32xf32, #tpu.memory_space<vmem>>, vector<8x8xf32>,
    %99 = vector.extract_strided_slice %16 {offsets = [8, 0], sizes = [8, 8], strides = [1, 1]} : vector<16x32xf32> to vector<8x8xf32>
    %100 = vector.extract_strided_slice %17 {offsets = [8, 0], sizes = [8, 8], strides = [1, 1]} : vector<16x32xf32> to vector<8x8xf32>
    %101 = vector.extract_strided_slice %18 {offsets = [8, 0], sizes = [8, 8], strides = [1, 1]} : vector<16x32xf32> to vector<8x8xf32>
    %cst_41 = arith.constant dense<0.000000e+00> : vector<8x8xf32>
    %102 = tpu.matmul %99, %100, %cst_41 {dimension_numbers = #tpu.dot_dimension_numbers<[1], [1], [0], [0], [0, 0, 1, 0], [], []>} : vector<8x8xf32>, vector<8x8xf32>, vector<8x8xf32> -> vector<8x8xf32>
    %cst_42 = arith.constant 0.353553385 : f32
    %103 = vector.broadcast %cst_42 : f32 to vector<8x8xf32>
    %104 = arith.mulf %102, %103 : vector<8x8xf32>
    %cst_43 = arith.constant 0xFF800000 : f32
    %105 = vector.broadcast %cst_43 : f32 to vector<8x8xf32>
    %106 = arith.select %10, %104, %105 : vector<8x8xi1>, vector<8x8xf32>
    %cst_44 = arith.constant dense<0xFF800000> : vector<8xf32>
    %107 = vector.multi_reduction <maximumf>, %106, %cst_44 [1] : vector<8x8xf32> to vector<8xf32>
    %108 = vector.shape_cast %107 : vector<8xf32> to vector<8x1xf32>
    %109 = vector.broadcast %108 : vector<8x1xf32> to vector<8x8xf32>
    %110 = arith.subf %106, %109 : vector<8x8xf32>
    %111 = math.exp %110 : vector<8x8xf32>
    %cst_45 = arith.constant dense<0.000000e+00> : vector<8xf32>
    %112 = vector.multi_reduction <add>, %111, %cst_45 [1] : vector<8x8xf32> to vector<8xf32>
    %113 = vector.shape_cast %112 : vector<8xf32> to vector<8x1xf32>
    %114 = tpu.reciprocal %113 {approx = true} : vector<8x1xf32> -> vector<8x1xf32>
    %115 = vector.broadcast %114 : vector<8x1xf32> to vector<8x8xf32>
    %116 = arith.mulf %111, %115 : vector<8x8xf32>
    %cst_46 = arith.constant dense<0.000000e+00> : vector<8x8xf32>
    %117 = tpu.matmul %116, %101, %cst_46 {dimension_numbers = #tpu.dot_dimension_numbers<[1], [0], [0], [1], [0, 0, 1, 1], [], []>} : vector<8x8xf32>, vector<8x8xf32>, vector<8x8xf32> -> vector<8x8xf32>
    %c8_47 = arith.constant 8 : index
    %c0_48 = arith.constant 0 : index
    %118 = vector.load %arg32[%c8_47, %c0_48] : memref<16x32xf32, #tpu.memory_space<vmem>>, vector<8x8xf32>
    tpu.vector_store %arg32[%c8_47, %c0_48], %117 {strides = array<i32>} : memref<16x32xf32, #tpu.memory_space<vmem>>, vector<8x8xf32>,
    %119 = vector.extract_strided_slice %16 {offsets = [8, 8], sizes = [8, 8], strides = [1, 1]} : vector<16x32xf32> to vector<8x8xf32>
    %120 = vector.extract_strided_slice %17 {offsets = [8, 8], sizes = [8, 8], strides = [1, 1]} : vector<16x32xf32> to vector<8x8xf32>
    %121 = vector.extract_strided_slice %18 {offsets = [8, 8], sizes = [8, 8], strides = [1, 1]} : vector<16x32xf32> to vector<8x8xf32>
    %cst_49 = arith.constant dense<0.000000e+00> : vector<8x8xf32>
    %122 = tpu.matmul %119, %120, %cst_49 {dimension_numbers = #tpu.dot_dimension_numbers<[1], [1], [0], [0], [0, 0, 1, 0], [], []>} : vector<8x8xf32>, vector<8x8xf32>, vector<8x8xf32> -> vector<8x8xf32>
    %cst_50 = arith.constant 0.353553385 : f32
    %123 = vector.broadcast %cst_50 : f32 to vector<8x8xf32>
    %124 = arith.mulf %122, %123 : vector<8x8xf32>
    %cst_51 = arith.constant 0xFF800000 : f32
    %125 = vector.broadcast %cst_51 : f32 to vector<8x8xf32>
    %126 = arith.select %10, %124, %125 : vector<8x8xi1>, vector<8x8xf32>
    %cst_52 = arith.constant dense<0xFF800000> : vector<8xf32>
    %127 = vector.multi_reduction <maximumf>, %126, %cst_52 [1] : vector<8x8xf32> to vector<8xf32>
    %128 = vector.shape_cast %127 : vector<8xf32> to vector<8x1xf32>
    %129 = vector.broadcast %128 : vector<8x1xf32> to vector<8x8xf32>
    %130 = arith.subf %126, %129 : vector<8x8xf32>
    %131 = math.exp %130 : vector<8x8xf32>
    %cst_53 = arith.constant dense<0.000000e+00> : vector<8xf32>
    %132 = vector.multi_reduction <add>, %131, %cst_53 [1] : vector<8x8xf32> to vector<8xf32>
    %133 = vector.shape_cast %132 : vector<8xf32> to vector<8x1xf32>
    %134 = tpu.reciprocal %133 {approx = true} : vector<8x1xf32> -> vector<8x1xf32>
    %135 = vector.broadcast %134 : vector<8x1xf32> to vector<8x8xf32>
    %136 = arith.mulf %131, %135 : vector<8x8xf32>
    %cst_54 = arith.constant dense<0.000000e+00> : vector<8x8xf32>
    %137 = tpu.matmul %136, %121, %cst_54 {dimension_numbers = #tpu.dot_dimension_numbers<[1], [0], [0], [1], [0, 0, 1, 1], [], []>} : vector<8x8xf32>, vector<8x8xf32>, vector<8x8xf32> -> vector<8x8xf32>
    %c8_55 = arith.constant 8 : index
    %c8_56 = arith.constant 8 : index
    %138 = vector.load %arg32[%c8_55, %c8_56] : memref<16x32xf32, #tpu.memory_space<vmem>>, vector<8x8xf32>
    tpu.vector_store %arg32[%c8_55, %c8_56], %137 {strides = array<i32>} : memref<16x32xf32, #tpu.memory_space<vmem>>, vector<8x8xf32>,
    %139 = vector.extract_strided_slice %16 {offsets = [8, 16], sizes = [8, 8], strides = [1, 1]} : vector<16x32xf32> to vector<8x8xf32>
    %140 = vector.extract_strided_slice %17 {offsets = [8, 16], sizes = [8, 8], strides = [1, 1]} : vector<16x32xf32> to vector<8x8xf32>
    %141 = vector.extract_strided_slice %18 {offsets = [8, 16], sizes = [8, 8], strides = [1, 1]} : vector<16x32xf32> to vector<8x8xf32>
    %cst_57 = arith.constant dense<0.000000e+00> : vector<8x8xf32>
    %142 = tpu.matmul %139, %140, %cst_57 {dimension_numbers = #tpu.dot_dimension_numbers<[1], [1], [0], [0], [0, 0, 1, 0], [], []>} : vector<8x8xf32>, vector<8x8xf32>, vector<8x8xf32> -> vector<8x8xf32>
    %cst_58 = arith.constant 0.353553385 : f32
    %143 = vector.broadcast %cst_58 : f32 to vector<8x8xf32>
    %144 = arith.mulf %142, %143 : vector<8x8xf32>
    %cst_59 = arith.constant 0xFF800000 : f32
    %145 = vector.broadcast %cst_59 : f32 to vector<8x8xf32>
    %146 = arith.select %10, %144, %145 : vector<8x8xi1>, vector<8x8xf32>
    %cst_60 = arith.constant dense<0xFF800000> : vector<8xf32>
    %147 = vector.multi_reduction <maximumf>, %146, %cst_60 [1] : vector<8x8xf32> to vector<8xf32>
    %148 = vector.shape_cast %147 : vector<8xf32> to vector<8x1xf32>
    %149 = vector.broadcast %148 : vector<8x1xf32> to vector<8x8xf32>
    %150 = arith.subf %146, %149 : vector<8x8xf32>
    %151 = math.exp %150 : vector<8x8xf32>
    %cst_61 = arith.constant dense<0.000000e+00> : vector<8xf32>
    %152 = vector.multi_reduction <add>, %151, %cst_61 [1] : vector<8x8xf32> to vector<8xf32>
    %153 = vector.shape_cast %152 : vector<8xf32> to vector<8x1xf32>
    %154 = tpu.reciprocal %153 {approx = true} : vector<8x1xf32> -> vector<8x1xf32>
    %155 = vector.broadcast %154 : vector<8x1xf32> to vector<8x8xf32>
    %156 = arith.mulf %151, %155 : vector<8x8xf32>
    %cst_62 = arith.constant dense<0.000000e+00> : vector<8x8xf32>
    %157 = tpu.matmul %156, %141, %cst_62 {dimension_numbers = #tpu.dot_dimension_numbers<[1], [0], [0], [1], [0, 0, 1, 1], [], []>} : vector<8x8xf32>, vector<8x8xf32>, vector<8x8xf32> -> vector<8x8xf32>
    %c8_63 = arith.constant 8 : index
    %c16_64 = arith.constant 16 : index
    %158 = vector.load %arg32[%c8_63, %c16_64] : memref<16x32xf32, #tpu.memory_space<vmem>>, vector<8x8xf32>
    tpu.vector_store %arg32[%c8_63, %c16_64], %157 {strides = array<i32>} : memref<16x32xf32, #tpu.memory_space<vmem>>, vector<8x8xf32>,
    %159 = vector.extract_strided_slice %16 {offsets = [8, 24], sizes = [8, 8], strides = [1, 1]} : vector<16x32xf32> to vector<8x8xf32>
    %160 = vector.extract_strided_slice %17 {offsets = [8, 24], sizes = [8, 8], strides = [1, 1]} : vector<16x32xf32> to vector<8x8xf32>
    %161 = vector.extract_strided_slice %18 {offsets = [8, 24], sizes = [8, 8], strides = [1, 1]} : vector<16x32xf32> to vector<8x8xf32>
    %cst_65 = arith.constant dense<0.000000e+00> : vector<8x8xf32>
    %162 = tpu.matmul %159, %160, %cst_65 {dimension_numbers = #tpu.dot_dimension_numbers<[1], [1], [0], [0], [0, 0, 1, 0], [], []>} : vector<8x8xf32>, vector<8x8xf32>, vector<8x8xf32> -> vector<8x8xf32>
    %cst_66 = arith.constant 0.353553385 : f32
    %163 = vector.broadcast %cst_66 : f32 to vector<8x8xf32>
    %164 = arith.mulf %162, %163 : vector<8x8xf32>
    %cst_67 = arith.constant 0xFF800000 : f32
    %165 = vector.broadcast %cst_67 : f32 to vector<8x8xf32>
    %166 = arith.select %10, %164, %165 : vector<8x8xi1>, vector<8x8xf32>
    %cst_68 = arith.constant dense<0xFF800000> : vector<8xf32>
    %167 = vector.multi_reduction <maximumf>, %166, %cst_68 [1] : vector<8x8xf32> to vector<8xf32>
    %168 = vector.shape_cast %167 : vector<8xf32> to vector<8x1xf32>
    %169 = vector.broadcast %168 : vector<8x1xf32> to vector<8x8xf32>
    %170 = arith.subf %166, %169 : vector<8x8xf32>
    %171 = math.exp %170 : vector<8x8xf32>
    %cst_69 = arith.constant dense<0.000000e+00> : vector<8xf32>
    %172 = vector.multi_reduction <add>, %171, %cst_69 [1] : vector<8x8xf32> to vector<8xf32>
    %173 = vector.shape_cast %172 : vector<8xf32> to vector<8x1xf32>
    %174 = tpu.reciprocal %173 {approx = true} : vector<8x1xf32> -> vector<8x1xf32>
    %175 = vector.broadcast %174 : vector<8x1xf32> to vector<8x8xf32>
    %176 = arith.mulf %171, %175 : vector<8x8xf32>
    %cst_70 = arith.constant dense<0.000000e+00> : vector<8x8xf32>
    %177 = tpu.matmul %176, %161, %cst_70 {dimension_numbers = #tpu.dot_dimension_numbers<[1], [0], [0], [1], [0, 0, 1, 1], [], []>} : vector<8x8xf32>, vector<8x8xf32>, vector<8x8xf32> -> vector<8x8xf32>
    %c8_71 = arith.constant 8 : index
    %c24_72 = arith.constant 24 : index
    %178 = vector.load %arg32[%c8_71, %c24_72] : memref<16x32xf32, #tpu.memory_space<vmem>>, vector<8x8xf32>
    tpu.vector_store %arg32[%c8_71, %c24_72], %177 {strides = array<i32>} : memref<16x32xf32, #tpu.memory_space<vmem>>, vector<8x8xf32>,
    %c0_73 = arith.constant 0 : index
    %c0_74 = arith.constant 0 : index
    %179 = vector.load %arg32[%c0_73, %c0_74] : memref<16x32xf32, #tpu.memory_space<vmem>>, vector<16x32xf32>
    %c0_75 = arith.constant 0 : index
    %c0_76 = arith.constant 0 : index
    %180 = vector.load %arg7[%c0_75, %c0_76] : memref<32x32xf32, #tpu.memory_space<vmem>>, vector<32x32xf32>
    %cst_77 = arith.constant dense<0.000000e+00> : vector<16x32xf32>
    %181 = tpu.matmul %179, %180, %cst_77 {dimension_numbers = #tpu.dot_dimension_numbers<[1], [0], [0], [1], [0, 0, 1, 1], [], []>} : vector<16x32xf32>, vector<32x32xf32>, vector<16x32xf32> -> vector<16x32xf32>
    %c0_78 = arith.constant 0 : index
    %c0_79 = arith.constant 0 : index
    %182 = vector.load %arg8[%c0_78, %c0_79] : memref<1x32xf32, #tpu.memory_space<vmem>>, vector<1x32xf32>
    %183 = vector.broadcast %182 : vector<1x32xf32> to vector<16x32xf32>
    %184 = arith.addf %181, %183 : vector<16x32xf32>
    %185 = arith.addf %7, %184 : vector<16x32xf32>
    %c0_80 = arith.constant 0 : index
    %c0_81 = arith.constant 0 : index
    %186 = vector.load %arg9[%c0_80, %c0_81] : memref<1x32xf32, #tpu.memory_space<vmem>>, vector<1x32xf32>
    %c0_82 = arith.constant 0 : index
    %c0_83 = arith.constant 0 : index
    %187 = vector.load %arg10[%c0_82, %c0_83] : memref<1x32xf32, #tpu.memory_space<vmem>>, vector<1x32xf32>
    %cst_84 = arith.constant dense<0.000000e+00> : vector<16xf32>
    %188 = vector.multi_reduction <add>, %185, %cst_84 [1] : vector<16x32xf32> to vector<16xf32>
    %189 = vector.shape_cast %188 : vector<16xf32> to vector<16x1xf32>
    %cst_85 = arith.constant 3.200000e+01 : f32
    %190 = vector.broadcast %cst_85 : f32 to vector<16x1xf32>
    %191 = arith.divf %189, %190 : vector<16x1xf32>
    %192 = vector.broadcast %191 : vector<16x1xf32> to vector<16x32xf32>
    %193 = arith.subf %185, %192 : vector<16x32xf32>
    %194 = arith.mulf %193, %193 : vector<16x32xf32>
    %cst_86 = arith.constant dense<0.000000e+00> : vector<16xf32>
    %195 = vector.multi_reduction <add>, %194, %cst_86 [1] : vector<16x32xf32> to vector<16xf32>
    %196 = vector.shape_cast %195 : vector<16xf32> to vector<16x1xf32>
    %cst_87 = arith.constant 3.200000e+01 : f32
    %197 = vector.broadcast %cst_87 : f32 to vector<16x1xf32>
    %198 = arith.divf %196, %197 : vector<16x1xf32>
    %199 = vector.broadcast %191 : vector<16x1xf32> to vector<16x32xf32>
    %200 = arith.subf %185, %199 : vector<16x32xf32>
    %cst_88 = arith.constant 9.99999974E-6 : f32
    %201 = vector.broadcast %cst_88 : f32 to vector<16x1xf32>
    %202 = arith.addf %198, %201 : vector<16x1xf32>
    %203 = math.rsqrt %202 : vector<16x1xf32>
    %204 = vector.broadcast %203 : vector<16x1xf32> to vector<16x32xf32>
    %205 = arith.mulf %200, %204 : vector<16x32xf32>
    %206 = vector.broadcast %186 : vector<1x32xf32> to vector<16x32xf32>
    %207 = arith.mulf %205, %206 : vector<16x32xf32>
    %208 = vector.broadcast %187 : vector<1x32xf32> to vector<16x32xf32>
    %209 = arith.addf %207, %208 : vector<16x32xf32>
    %c0_89 = arith.constant 0 : index
    %c0_90 = arith.constant 0 : index
    %210 = vector.load %arg11[%c0_89, %c0_90] : memref<32x2048xf32, #tpu.memory_space<vmem>>, vector<32x2048xf32>
    %cst_91 = arith.constant dense<0.000000e+00> : vector<16x2048xf32>
    %211 = tpu.matmul %209, %210, %cst_91 {dimension_numbers = #tpu.dot_dimension_numbers<[1], [0], [0], [1], [0, 0, 1, 1], [], []>} : vector<16x32xf32>, vector<32x2048xf32>, vector<16x2048xf32> -> vector<16x2048xf32>
    %c0_92 = arith.constant 0 : index
    %c0_93 = arith.constant 0 : index
    %212 = vector.load %arg12[%c0_92, %c0_93] : memref<1x2048xf32, #tpu.memory_space<vmem>>, vector<1x2048xf32>
    %213 = vector.broadcast %212 : vector<1x2048xf32> to vector<16x2048xf32>
    %214 = arith.addf %211, %213 : vector<16x2048xf32>
    %cst_94 = arith.constant 0.000000e+00 : f32
    %215 = vector.broadcast %cst_94 : f32 to vector<16x2048xf32>
    %216 = arith.maximumf %214, %215 : vector<16x2048xf32>
    %c0_95 = arith.constant 0 : index
    %c0_96 = arith.constant 0 : index
    %217 = vector.load %arg13[%c0_95, %c0_96] : memref<2048x32xf32, #tpu.memory_space<vmem>>, vector<2048x32xf32>
    %cst_97 = arith.constant dense<0.000000e+00> : vector<16x32xf32>
    %218 = tpu.matmul %216, %217, %cst_97 {dimension_numbers = #tpu.dot_dimension_numbers<[1], [0], [0], [1], [0, 0, 1, 1], [], []>} : vector<16x2048xf32>, vector<2048x32xf32>, vector<16x32xf32> -> vector<16x32xf32>
    %c0_98 = arith.constant 0 : index
    %c0_99 = arith.constant 0 : index
    %219 = vector.load %arg14[%c0_98, %c0_99] : memref<1x32xf32, #tpu.memory_space<vmem>>, vector<1x32xf32>
    %220 = vector.broadcast %219 : vector<1x32xf32> to vector<16x32xf32>
    %221 = arith.addf %218, %220 : vector<16x32xf32>
    %222 = arith.addf %209, %221 : vector<16x32xf32>
    %c0_100 = arith.constant 0 : index
    %c0_101 = arith.constant 0 : index
    %223 = vector.load %arg15[%c0_100, %c0_101] : memref<1x32xf32, #tpu.memory_space<vmem>>, vector<1x32xf32>
    %c0_102 = arith.constant 0 : index
    %c0_103 = arith.constant 0 : index
    %224 = vector.load %arg16[%c0_102, %c0_103] : memref<1x32xf32, #tpu.memory_space<vmem>>, vector<1x32xf32>
    %cst_104 = arith.constant dense<0.000000e+00> : vector<16xf32>
    %225 = vector.multi_reduction <add>, %222, %cst_104 [1] : vector<16x32xf32> to vector<16xf32>
    %226 = vector.shape_cast %225 : vector<16xf32> to vector<16x1xf32>
    %cst_105 = arith.constant 3.200000e+01 : f32
    %227 = vector.broadcast %cst_105 : f32 to vector<16x1xf32>
    %228 = arith.divf %226, %227 : vector<16x1xf32>
    %229 = vector.broadcast %228 : vector<16x1xf32> to vector<16x32xf32>
    %230 = arith.subf %222, %229 : vector<16x32xf32>
    %231 = arith.mulf %230, %230 : vector<16x32xf32>
    %cst_106 = arith.constant dense<0.000000e+00> : vector<16xf32>
    %232 = vector.multi_reduction <add>, %231, %cst_106 [1] : vector<16x32xf32> to vector<16xf32>
    %233 = vector.shape_cast %232 : vector<16xf32> to vector<16x1xf32>
    %cst_107 = arith.constant 3.200000e+01 : f32
    %234 = vector.broadcast %cst_107 : f32 to vector<16x1xf32>
    %235 = arith.divf %233, %234 : vector<16x1xf32>
    %236 = vector.broadcast %228 : vector<16x1xf32> to vector<16x32xf32>
    %237 = arith.subf %222, %236 : vector<16x32xf32>
    %cst_108 = arith.constant 9.99999974E-6 : f32
    %238 = vector.broadcast %cst_108 : f32 to vector<16x1xf32>
    %239 = arith.addf %235, %238 : vector<16x1xf32>
    %240 = math.rsqrt %239 : vector<16x1xf32>
    %241 = vector.broadcast %240 : vector<16x1xf32> to vector<16x32xf32>
    %242 = arith.mulf %237, %241 : vector<16x32xf32>
    %243 = vector.broadcast %223 : vector<1x32xf32> to vector<16x32xf32>
    %244 = arith.mulf %242, %243 : vector<16x32xf32>
    %245 = vector.broadcast %224 : vector<1x32xf32> to vector<16x32xf32>
    %246 = arith.addf %244, %245 : vector<16x32xf32>
    %c0_109 = arith.constant 0 : index
    %c0_110 = arith.constant 0 : index
    %247 = vector.load %arg17[%c0_109, %c0_110] : memref<32x96xf32, #tpu.memory_space<vmem>>, vector<32x96xf32>
    %cst_111 = arith.constant dense<0.000000e+00> : vector<16x96xf32>
    %248 = tpu.matmul %246, %247, %cst_111 {dimension_numbers = #tpu.dot_dimension_numbers<[1], [0], [0], [1], [0, 0, 1, 1], [], []>} : vector<16x32xf32>, vector<32x96xf32>, vector<16x96xf32> -> vector<16x96xf32>
    %c0_112 = arith.constant 0 : index
    %c0_113 = arith.constant 0 : index
    %249 = vector.load %arg18[%c0_112, %c0_113] : memref<1x96xf32, #tpu.memory_space<vmem>>, vector<1x96xf32>
    %250 = vector.broadcast %249 : vector<1x96xf32> to vector<16x96xf32>
    %251 = arith.addf %248, %250 : vector<16x96xf32>
    %252 = vector.extract_strided_slice %251 {offsets = [0, 0], sizes = [16, 32], strides = [1, 1]} : vector<16x96xf32> to vector<16x32xf32>
    %253 = vector.extract_strided_slice %251 {offsets = [0, 32], sizes = [16, 32], strides = [1, 1]} : vector<16x96xf32> to vector<16x32xf32>
    %254 = vector.extract_strided_slice %251 {offsets = [0, 64], sizes = [16, 32], strides = [1, 1]} : vector<16x96xf32> to vector<16x32xf32>
    %255 = vector.extract_strided_slice %252 {offsets = [0, 0], sizes = [8, 8], strides = [1, 1]} : vector<16x32xf32> to vector<8x8xf32>
    %256 = vector.extract_strided_slice %253 {offsets = [0, 0], sizes = [8, 8], strides = [1, 1]} : vector<16x32xf32> to vector<8x8xf32>
    %257 = vector.extract_strided_slice %254 {offsets = [0, 0], sizes = [8, 8], strides = [1, 1]} : vector<16x32xf32> to vector<8x8xf32>
    %cst_114 = arith.constant dense<0.000000e+00> : vector<8x8xf32>
    %258 = tpu.matmul %255, %256, %cst_114 {dimension_numbers = #tpu.dot_dimension_numbers<[1], [1], [0], [0], [0, 0, 1, 0], [], []>} : vector<8x8xf32>, vector<8x8xf32>, vector<8x8xf32> -> vector<8x8xf32>
    %cst_115 = arith.constant 0.353553385 : f32
    %259 = vector.broadcast %cst_115 : f32 to vector<8x8xf32>
    %260 = arith.mulf %258, %259 : vector<8x8xf32>
    %cst_116 = arith.constant 0xFF800000 : f32
    %261 = vector.broadcast %cst_116 : f32 to vector<8x8xf32>
    %262 = arith.select %10, %260, %261 : vector<8x8xi1>, vector<8x8xf32>
    %cst_117 = arith.constant dense<0xFF800000> : vector<8xf32>
    %263 = vector.multi_reduction <maximumf>, %262, %cst_117 [1] : vector<8x8xf32> to vector<8xf32>
    %264 = vector.shape_cast %263 : vector<8xf32> to vector<8x1xf32>
    %265 = vector.broadcast %264 : vector<8x1xf32> to vector<8x8xf32>
    %266 = arith.subf %262, %265 : vector<8x8xf32>
    %267 = math.exp %266 : vector<8x8xf32>
    %cst_118 = arith.constant dense<0.000000e+00> : vector<8xf32>
    %268 = vector.multi_reduction <add>, %267, %cst_118 [1] : vector<8x8xf32> to vector<8xf32>
    %269 = vector.shape_cast %268 : vector<8xf32> to vector<8x1xf32>
    %270 = tpu.reciprocal %269 {approx = true} : vector<8x1xf32> -> vector<8x1xf32>
    %271 = vector.broadcast %270 : vector<8x1xf32> to vector<8x8xf32>
    %272 = arith.mulf %267, %271 : vector<8x8xf32>
    %cst_119 = arith.constant dense<0.000000e+00> : vector<8x8xf32>
    %273 = tpu.matmul %272, %257, %cst_119 {dimension_numbers = #tpu.dot_dimension_numbers<[1], [0], [0], [1], [0, 0, 1, 1], [], []>} : vector<8x8xf32>, vector<8x8xf32>, vector<8x8xf32> -> vector<8x8xf32>
    %c0_120 = arith.constant 0 : index
    %c0_121 = arith.constant 0 : index
    %274 = vector.load %arg32[%c0_120, %c0_121] : memref<16x32xf32, #tpu.memory_space<vmem>>, vector<8x8xf32>
    tpu.vector_store %arg32[%c0_120, %c0_121], %273 {strides = array<i32>} : memref<16x32xf32, #tpu.memory_space<vmem>>, vector<8x8xf32>,
    %275 = vector.extract_strided_slice %252 {offsets = [0, 8], sizes = [8, 8], strides = [1, 1]} : vector<16x32xf32> to vector<8x8xf32>
    %276 = vector.extract_strided_slice %253 {offsets = [0, 8], sizes = [8, 8], strides = [1, 1]} : vector<16x32xf32> to vector<8x8xf32>
    %277 = vector.extract_strided_slice %254 {offsets = [0, 8], sizes = [8, 8], strides = [1, 1]} : vector<16x32xf32> to vector<8x8xf32>
    %cst_122 = arith.constant dense<0.000000e+00> : vector<8x8xf32>
    %278 = tpu.matmul %275, %276, %cst_122 {dimension_numbers = #tpu.dot_dimension_numbers<[1], [1], [0], [0], [0, 0, 1, 0], [], []>} : vector<8x8xf32>, vector<8x8xf32>, vector<8x8xf32> -> vector<8x8xf32>
    %cst_123 = arith.constant 0.353553385 : f32
    %279 = vector.broadcast %cst_123 : f32 to vector<8x8xf32>
    %280 = arith.mulf %278, %279 : vector<8x8xf32>
    %cst_124 = arith.constant 0xFF800000 : f32
    %281 = vector.broadcast %cst_124 : f32 to vector<8x8xf32>
    %282 = arith.select %10, %280, %281 : vector<8x8xi1>, vector<8x8xf32>
    %cst_125 = arith.constant dense<0xFF800000> : vector<8xf32>
    %283 = vector.multi_reduction <maximumf>, %282, %cst_125 [1] : vector<8x8xf32> to vector<8xf32>
    %284 = vector.shape_cast %283 : vector<8xf32> to vector<8x1xf32>
    %285 = vector.broadcast %284 : vector<8x1xf32> to vector<8x8xf32>
    %286 = arith.subf %282, %285 : vector<8x8xf32>
    %287 = math.exp %286 : vector<8x8xf32>
    %cst_126 = arith.constant dense<0.000000e+00> : vector<8xf32>
    %288 = vector.multi_reduction <add>, %287, %cst_126 [1] : vector<8x8xf32> to vector<8xf32>
    %289 = vector.shape_cast %288 : vector<8xf32> to vector<8x1xf32>
    %290 = tpu.reciprocal %289 {approx = true} : vector<8x1xf32> -> vector<8x1xf32>
    %291 = vector.broadcast %290 : vector<8x1xf32> to vector<8x8xf32>
    %292 = arith.mulf %287, %291 : vector<8x8xf32>
    %cst_127 = arith.constant dense<0.000000e+00> : vector<8x8xf32>
    %293 = tpu.matmul %292, %277, %cst_127 {dimension_numbers = #tpu.dot_dimension_numbers<[1], [0], [0], [1], [0, 0, 1, 1], [], []>} : vector<8x8xf32>, vector<8x8xf32>, vector<8x8xf32> -> vector<8x8xf32>
    %c0_128 = arith.constant 0 : index
    %c8_129 = arith.constant 8 : index
    %294 = vector.load %arg32[%c0_128, %c8_129] : memref<16x32xf32, #tpu.memory_space<vmem>>, vector<8x8xf32>
    tpu.vector_store %arg32[%c0_128, %c8_129], %293 {strides = array<i32>} : memref<16x32xf32, #tpu.memory_space<vmem>>, vector<8x8xf32>,
    %295 = vector.extract_strided_slice %252 {offsets = [0, 16], sizes = [8, 8], strides = [1, 1]} : vector<16x32xf32> to vector<8x8xf32>
    %296 = vector.extract_strided_slice %253 {offsets = [0, 16], sizes = [8, 8], strides = [1, 1]} : vector<16x32xf32> to vector<8x8xf32>
    %297 = vector.extract_strided_slice %254 {offsets = [0, 16], sizes = [8, 8], strides = [1, 1]} : vector<16x32xf32> to vector<8x8xf32>
    %cst_130 = arith.constant dense<0.000000e+00> : vector<8x8xf32>
    %298 = tpu.matmul %295, %296, %cst_130 {dimension_numbers = #tpu.dot_dimension_numbers<[1], [1], [0], [0], [0, 0, 1, 0], [], []>} : vector<8x8xf32>, vector<8x8xf32>, vector<8x8xf32> -> vector<8x8xf32>
    %cst_131 = arith.constant 0.353553385 : f32
    %299 = vector.broadcast %cst_131 : f32 to vector<8x8xf32>
    %300 = arith.mulf %298, %299 : vector<8x8xf32>
    %cst_132 = arith.constant 0xFF800000 : f32
    %301 = vector.broadcast %cst_132 : f32 to vector<8x8xf32>
    %302 = arith.select %10, %300, %301 : vector<8x8xi1>, vector<8x8xf32>
    %cst_133 = arith.constant dense<0xFF800000> : vector<8xf32>
    %303 = vector.multi_reduction <maximumf>, %302, %cst_133 [1] : vector<8x8xf32> to vector<8xf32>
    %304 = vector.shape_cast %303 : vector<8xf32> to vector<8x1xf32>
    %305 = vector.broadcast %304 : vector<8x1xf32> to vector<8x8xf32>
    %306 = arith.subf %302, %305 : vector<8x8xf32>
    %307 = math.exp %306 : vector<8x8xf32>
    %cst_134 = arith.constant dense<0.000000e+00> : vector<8xf32>
    %308 = vector.multi_reduction <add>, %307, %cst_134 [1] : vector<8x8xf32> to vector<8xf32>
    %309 = vector.shape_cast %308 : vector<8xf32> to vector<8x1xf32>
    %310 = tpu.reciprocal %309 {approx = true} : vector<8x1xf32> -> vector<8x1xf32>
    %311 = vector.broadcast %310 : vector<8x1xf32> to vector<8x8xf32>
    %312 = arith.mulf %307, %311 : vector<8x8xf32>
    %cst_135 = arith.constant dense<0.000000e+00> : vector<8x8xf32>
    %313 = tpu.matmul %312, %297, %cst_135 {dimension_numbers = #tpu.dot_dimension_numbers<[1], [0], [0], [1], [0, 0, 1, 1], [], []>} : vector<8x8xf32>, vector<8x8xf32>, vector<8x8xf32> -> vector<8x8xf32>
    %c0_136 = arith.constant 0 : index
    %c16_137 = arith.constant 16 : index
    %314 = vector.load %arg32[%c0_136, %c16_137] : memref<16x32xf32, #tpu.memory_space<vmem>>, vector<8x8xf32>
    tpu.vector_store %arg32[%c0_136, %c16_137], %313 {strides = array<i32>} : memref<16x32xf32, #tpu.memory_space<vmem>>, vector<8x8xf32>,
    %315 = vector.extract_strided_slice %252 {offsets = [0, 24], sizes = [8, 8], strides = [1, 1]} : vector<16x32xf32> to vector<8x8xf32>
    %316 = vector.extract_strided_slice %253 {offsets = [0, 24], sizes = [8, 8], strides = [1, 1]} : vector<16x32xf32> to vector<8x8xf32>
    %317 = vector.extract_strided_slice %254 {offsets = [0, 24], sizes = [8, 8], strides = [1, 1]} : vector<16x32xf32> to vector<8x8xf32>
    %cst_138 = arith.constant dense<0.000000e+00> : vector<8x8xf32>
    %318 = tpu.matmul %315, %316, %cst_138 {dimension_numbers = #tpu.dot_dimension_numbers<[1], [1], [0], [0], [0, 0, 1, 0], [], []>} : vector<8x8xf32>, vector<8x8xf32>, vector<8x8xf32> -> vector<8x8xf32>
    %cst_139 = arith.constant 0.353553385 : f32
    %319 = vector.broadcast %cst_139 : f32 to vector<8x8xf32>
    %320 = arith.mulf %318, %319 : vector<8x8xf32>
    %cst_140 = arith.constant 0xFF800000 : f32
    %321 = vector.broadcast %cst_140 : f32 to vector<8x8xf32>
    %322 = arith.select %10, %320, %321 : vector<8x8xi1>, vector<8x8xf32>
    %cst_141 = arith.constant dense<0xFF800000> : vector<8xf32>
    %323 = vector.multi_reduction <maximumf>, %322, %cst_141 [1] : vector<8x8xf32> to vector<8xf32>
    %324 = vector.shape_cast %323 : vector<8xf32> to vector<8x1xf32>
    %325 = vector.broadcast %324 : vector<8x1xf32> to vector<8x8xf32>
    %326 = arith.subf %322, %325 : vector<8x8xf32>
    %327 = math.exp %326 : vector<8x8xf32>
    %cst_142 = arith.constant dense<0.000000e+00> : vector<8xf32>
    %328 = vector.multi_reduction <add>, %327, %cst_142 [1] : vector<8x8xf32> to vector<8xf32>
    %329 = vector.shape_cast %328 : vector<8xf32> to vector<8x1xf32>
    %330 = tpu.reciprocal %329 {approx = true} : vector<8x1xf32> -> vector<8x1xf32>
    %331 = vector.broadcast %330 : vector<8x1xf32> to vector<8x8xf32>
    %332 = arith.mulf %327, %331 : vector<8x8xf32>
    %cst_143 = arith.constant dense<0.000000e+00> : vector<8x8xf32>
    %333 = tpu.matmul %332, %317, %cst_143 {dimension_numbers = #tpu.dot_dimension_numbers<[1], [0], [0], [1], [0, 0, 1, 1], [], []>} : vector<8x8xf32>, vector<8x8xf32>, vector<8x8xf32> -> vector<8x8xf32>
    %c0_144 = arith.constant 0 : index
    %c24_145 = arith.constant 24 : index
    %334 = vector.load %arg32[%c0_144, %c24_145] : memref<16x32xf32, #tpu.memory_space<vmem>>, vector<8x8xf32>
    tpu.vector_store %arg32[%c0_144, %c24_145], %333 {strides = array<i32>} : memref<16x32xf32, #tpu.memory_space<vmem>>, vector<8x8xf32>,
    %335 = vector.extract_strided_slice %252 {offsets = [8, 0], sizes = [8, 8], strides = [1, 1]} : vector<16x32xf32> to vector<8x8xf32>
    %336 = vector.extract_strided_slice %253 {offsets = [8, 0], sizes = [8, 8], strides = [1, 1]} : vector<16x32xf32> to vector<8x8xf32>
    %337 = vector.extract_strided_slice %254 {offsets = [8, 0], sizes = [8, 8], strides = [1, 1]} : vector<16x32xf32> to vector<8x8xf32>
    %cst_146 = arith.constant dense<0.000000e+00> : vector<8x8xf32>
    %338 = tpu.matmul %335, %336, %cst_146 {dimension_numbers = #tpu.dot_dimension_numbers<[1], [1], [0], [0], [0, 0, 1, 0], [], []>} : vector<8x8xf32>, vector<8x8xf32>, vector<8x8xf32> -> vector<8x8xf32>
    %cst_147 = arith.constant 0.353553385 : f32
    %339 = vector.broadcast %cst_147 : f32 to vector<8x8xf32>
    %340 = arith.mulf %338, %339 : vector<8x8xf32>
    %cst_148 = arith.constant 0xFF800000 : f32
    %341 = vector.broadcast %cst_148 : f32 to vector<8x8xf32>
    %342 = arith.select %10, %340, %341 : vector<8x8xi1>, vector<8x8xf32>
    %cst_149 = arith.constant dense<0xFF800000> : vector<8xf32>
    %343 = vector.multi_reduction <maximumf>, %342, %cst_149 [1] : vector<8x8xf32> to vector<8xf32>
    %344 = vector.shape_cast %343 : vector<8xf32> to vector<8x1xf32>
    %345 = vector.broadcast %344 : vector<8x1xf32> to vector<8x8xf32>
    %346 = arith.subf %342, %345 : vector<8x8xf32>
    %347 = math.exp %346 : vector<8x8xf32>
    %cst_150 = arith.constant dense<0.000000e+00> : vector<8xf32>
    %348 = vector.multi_reduction <add>, %347, %cst_150 [1] : vector<8x8xf32> to vector<8xf32>
    %349 = vector.shape_cast %348 : vector<8xf32> to vector<8x1xf32>
    %350 = tpu.reciprocal %349 {approx = true} : vector<8x1xf32> -> vector<8x1xf32>
    %351 = vector.broadcast %350 : vector<8x1xf32> to vector<8x8xf32>
    %352 = arith.mulf %347, %351 : vector<8x8xf32>
    %cst_151 = arith.constant dense<0.000000e+00> : vector<8x8xf32>
    %353 = tpu.matmul %352, %337, %cst_151 {dimension_numbers = #tpu.dot_dimension_numbers<[1], [0], [0], [1], [0, 0, 1, 1], [], []>} : vector<8x8xf32>, vector<8x8xf32>, vector<8x8xf32> -> vector<8x8xf32>
    %c8_152 = arith.constant 8 : index
    %c0_153 = arith.constant 0 : index
    %354 = vector.load %arg32[%c8_152, %c0_153] : memref<16x32xf32, #tpu.memory_space<vmem>>, vector<8x8xf32>
    tpu.vector_store %arg32[%c8_152, %c0_153], %353 {strides = array<i32>} : memref<16x32xf32, #tpu.memory_space<vmem>>, vector<8x8xf32>,
    %355 = vector.extract_strided_slice %252 {offsets = [8, 8], sizes = [8, 8], strides = [1, 1]} : vector<16x32xf32> to vector<8x8xf32>
    %356 = vector.extract_strided_slice %253 {offsets = [8, 8], sizes = [8, 8], strides = [1, 1]} : vector<16x32xf32> to vector<8x8xf32>
    %357 = vector.extract_strided_slice %254 {offsets = [8, 8], sizes = [8, 8], strides = [1, 1]} : vector<16x32xf32> to vector<8x8xf32>
    %cst_154 = arith.constant dense<0.000000e+00> : vector<8x8xf32>
    %358 = tpu.matmul %355, %356, %cst_154 {dimension_numbers = #tpu.dot_dimension_numbers<[1], [1], [0], [0], [0, 0, 1, 0], [], []>} : vector<8x8xf32>, vector<8x8xf32>, vector<8x8xf32> -> vector<8x8xf32>
    %cst_155 = arith.constant 0.353553385 : f32
    %359 = vector.broadcast %cst_155 : f32 to vector<8x8xf32>
    %360 = arith.mulf %358, %359 : vector<8x8xf32>
    %cst_156 = arith.constant 0xFF800000 : f32
    %361 = vector.broadcast %cst_156 : f32 to vector<8x8xf32>
    %362 = arith.select %10, %360, %361 : vector<8x8xi1>, vector<8x8xf32>
    %cst_157 = arith.constant dense<0xFF800000> : vector<8xf32>
    %363 = vector.multi_reduction <maximumf>, %362, %cst_157 [1] : vector<8x8xf32> to vector<8xf32>
    %364 = vector.shape_cast %363 : vector<8xf32> to vector<8x1xf32>
    %365 = vector.broadcast %364 : vector<8x1xf32> to vector<8x8xf32>
    %366 = arith.subf %362, %365 : vector<8x8xf32>
    %367 = math.exp %366 : vector<8x8xf32>
    %cst_158 = arith.constant dense<0.000000e+00> : vector<8xf32>
    %368 = vector.multi_reduction <add>, %367, %cst_158 [1] : vector<8x8xf32> to vector<8xf32>
    %369 = vector.shape_cast %368 : vector<8xf32> to vector<8x1xf32>
    %370 = tpu.reciprocal %369 {approx = true} : vector<8x1xf32> -> vector<8x1xf32>
    %371 = vector.broadcast %370 : vector<8x1xf32> to vector<8x8xf32>
    %372 = arith.mulf %367, %371 : vector<8x8xf32>
    %cst_159 = arith.constant dense<0.000000e+00> : vector<8x8xf32>
    %373 = tpu.matmul %372, %357, %cst_159 {dimension_numbers = #tpu.dot_dimension_numbers<[1], [0], [0], [1], [0, 0, 1, 1], [], []>} : vector<8x8xf32>, vector<8x8xf32>, vector<8x8xf32> -> vector<8x8xf32>
    %c8_160 = arith.constant 8 : index
    %c8_161 = arith.constant 8 : index
    %374 = vector.load %arg32[%c8_160, %c8_161] : memref<16x32xf32, #tpu.memory_space<vmem>>, vector<8x8xf32>
    tpu.vector_store %arg32[%c8_160, %c8_161], %373 {strides = array<i32>} : memref<16x32xf32, #tpu.memory_space<vmem>>, vector<8x8xf32>,
    %375 = vector.extract_strided_slice %252 {offsets = [8, 16], sizes = [8, 8], strides = [1, 1]} : vector<16x32xf32> to vector<8x8xf32>
    %376 = vector.extract_strided_slice %253 {offsets = [8, 16], sizes = [8, 8], strides = [1, 1]} : vector<16x32xf32> to vector<8x8xf32>
    %377 = vector.extract_strided_slice %254 {offsets = [8, 16], sizes = [8, 8], strides = [1, 1]} : vector<16x32xf32> to vector<8x8xf32>
    %cst_162 = arith.constant dense<0.000000e+00> : vector<8x8xf32>
    %378 = tpu.matmul %375, %376, %cst_162 {dimension_numbers = #tpu.dot_dimension_numbers<[1], [1], [0], [0], [0, 0, 1, 0], [], []>} : vector<8x8xf32>, vector<8x8xf32>, vector<8x8xf32> -> vector<8x8xf32>
    %cst_163 = arith.constant 0.353553385 : f32
    %379 = vector.broadcast %cst_163 : f32 to vector<8x8xf32>
    %380 = arith.mulf %378, %379 : vector<8x8xf32>
    %cst_164 = arith.constant 0xFF800000 : f32
    %381 = vector.broadcast %cst_164 : f32 to vector<8x8xf32>
    %382 = arith.select %10, %380, %381 : vector<8x8xi1>, vector<8x8xf32>
    %cst_165 = arith.constant dense<0xFF800000> : vector<8xf32>
    %383 = vector.multi_reduction <maximumf>, %382, %cst_165 [1] : vector<8x8xf32> to vector<8xf32>
    %384 = vector.shape_cast %383 : vector<8xf32> to vector<8x1xf32>
    %385 = vector.broadcast %384 : vector<8x1xf32> to vector<8x8xf32>
    %386 = arith.subf %382, %385 : vector<8x8xf32>
    %387 = math.exp %386 : vector<8x8xf32>
    %cst_166 = arith.constant dense<0.000000e+00> : vector<8xf32>
    %388 = vector.multi_reduction <add>, %387, %cst_166 [1] : vector<8x8xf32> to vector<8xf32>
    %389 = vector.shape_cast %388 : vector<8xf32> to vector<8x1xf32>
    %390 = tpu.reciprocal %389 {approx = true} : vector<8x1xf32> -> vector<8x1xf32>
    %391 = vector.broadcast %390 : vector<8x1xf32> to vector<8x8xf32>
    %392 = arith.mulf %387, %391 : vector<8x8xf32>
    %cst_167 = arith.constant dense<0.000000e+00> : vector<8x8xf32>
    %393 = tpu.matmul %392, %377, %cst_167 {dimension_numbers = #tpu.dot_dimension_numbers<[1], [0], [0], [1], [0, 0, 1, 1], [], []>} : vector<8x8xf32>, vector<8x8xf32>, vector<8x8xf32> -> vector<8x8xf32>
    %c8_168 = arith.constant 8 : index
    %c16_169 = arith.constant 16 : index
    %394 = vector.load %arg32[%c8_168, %c16_169] : memref<16x32xf32, #tpu.memory_space<vmem>>, vector<8x8xf32>
    tpu.vector_store %arg32[%c8_168, %c16_169], %393 {strides = array<i32>} : memref<16x32xf32, #tpu.memory_space<vmem>>, vector<8x8xf32>,
    %395 = vector.extract_strided_slice %252 {offsets = [8, 24], sizes = [8, 8], strides = [1, 1]} : vector<16x32xf32> to vector<8x8xf32>
    %396 = vector.extract_strided_slice %253 {offsets = [8, 24], sizes = [8, 8], strides = [1, 1]} : vector<16x32xf32> to vector<8x8xf32>
    %397 = vector.extract_strided_slice %254 {offsets = [8, 24], sizes = [8, 8], strides = [1, 1]} : vector<16x32xf32> to vector<8x8xf32>
    %cst_170 = arith.constant dense<0.000000e+00> : vector<8x8xf32>
    %398 = tpu.matmul %395, %396, %cst_170 {dimension_numbers = #tpu.dot_dimension_numbers<[1], [1], [0], [0], [0, 0, 1, 0], [], []>} : vector<8x8xf32>, vector<8x8xf32>, vector<8x8xf32> -> vector<8x8xf32>
    %cst_171 = arith.constant 0.353553385 : f32
    %399 = vector.broadcast %cst_171 : f32 to vector<8x8xf32>
    %400 = arith.mulf %398, %399 : vector<8x8xf32>
    %cst_172 = arith.constant 0xFF800000 : f32
    %401 = vector.broadcast %cst_172 : f32 to vector<8x8xf32>
    %402 = arith.select %10, %400, %401 : vector<8x8xi1>, vector<8x8xf32>
    %cst_173 = arith.constant dense<0xFF800000> : vector<8xf32>
    %403 = vector.multi_reduction <maximumf>, %402, %cst_173 [1] : vector<8x8xf32> to vector<8xf32>
    %404 = vector.shape_cast %403 : vector<8xf32> to vector<8x1xf32>
    %405 = vector.broadcast %404 : vector<8x1xf32> to vector<8x8xf32>
    %406 = arith.subf %402, %405 : vector<8x8xf32>
    %407 = math.exp %406 : vector<8x8xf32>
    %cst_174 = arith.constant dense<0.000000e+00> : vector<8xf32>
    %408 = vector.multi_reduction <add>, %407, %cst_174 [1] : vector<8x8xf32> to vector<8xf32>
    %409 = vector.shape_cast %408 : vector<8xf32> to vector<8x1xf32>
    %410 = tpu.reciprocal %409 {approx = true} : vector<8x1xf32> -> vector<8x1xf32>
    %411 = vector.broadcast %410 : vector<8x1xf32> to vector<8x8xf32>
    %412 = arith.mulf %407, %411 : vector<8x8xf32>
    %cst_175 = arith.constant dense<0.000000e+00> : vector<8x8xf32>
    %413 = tpu.matmul %412, %397, %cst_175 {dimension_numbers = #tpu.dot_dimension_numbers<[1], [0], [0], [1], [0, 0, 1, 1], [], []>} : vector<8x8xf32>, vector<8x8xf32>, vector<8x8xf32> -> vector<8x8xf32>
    %c8_176 = arith.constant 8 : index
    %c24_177 = arith.constant 24 : index
    %414 = vector.load %arg32[%c8_176, %c24_177] : memref<16x32xf32, #tpu.memory_space<vmem>>, vector<8x8xf32>
    tpu.vector_store %arg32[%c8_176, %c24_177], %413 {strides = array<i32>} : memref<16x32xf32, #tpu.memory_space<vmem>>, vector<8x8xf32>,
    %c0_178 = arith.constant 0 : index
    %c0_179 = arith.constant 0 : index
    %415 = vector.load %arg32[%c0_178, %c0_179] : memref<16x32xf32, #tpu.memory_space<vmem>>, vector<16x32xf32>
    %c0_180 = arith.constant 0 : index
    %c0_181 = arith.constant 0 : index
    %416 = vector.load %arg19[%c0_180, %c0_181] : memref<32x32xf32, #tpu.memory_space<vmem>>, vector<32x32xf32>
    %cst_182 = arith.constant dense<0.000000e+00> : vector<16x32xf32>
    %417 = tpu.matmul %415, %416, %cst_182 {dimension_numbers = #tpu.dot_dimension_numbers<[1], [0], [0], [1], [0, 0, 1, 1], [], []>} : vector<16x32xf32>, vector<32x32xf32>, vector<16x32xf32> -> vector<16x32xf32>
    %c0_183 = arith.constant 0 : index
    %c0_184 = arith.constant 0 : index
    %418 = vector.load %arg20[%c0_183, %c0_184] : memref<1x32xf32, #tpu.memory_space<vmem>>, vector<1x32xf32>
    %419 = vector.broadcast %418 : vector<1x32xf32> to vector<16x32xf32>
    %420 = arith.addf %417, %419 : vector<16x32xf32>
    %421 = arith.addf %246, %420 : vector<16x32xf32>
    %c0_185 = arith.constant 0 : index
    %c0_186 = arith.constant 0 : index
    %422 = vector.load %arg21[%c0_185, %c0_186] : memref<1x32xf32, #tpu.memory_space<vmem>>, vector<1x32xf32>
    %c0_187 = arith.constant 0 : index
    %c0_188 = arith.constant 0 : index
    %423 = vector.load %arg22[%c0_187, %c0_188] : memref<1x32xf32, #tpu.memory_space<vmem>>, vector<1x32xf32>
    %cst_189 = arith.constant dense<0.000000e+00> : vector<16xf32>
    %424 = vector.multi_reduction <add>, %421, %cst_189 [1] : vector<16x32xf32> to vector<16xf32>
    %425 = vector.shape_cast %424 : vector<16xf32> to vector<16x1xf32>
    %cst_190 = arith.constant 3.200000e+01 : f32
    %426 = vector.broadcast %cst_190 : f32 to vector<16x1xf32>
    %427 = arith.divf %425, %426 : vector<16x1xf32>
    %428 = vector.broadcast %427 : vector<16x1xf32> to vector<16x32xf32>
    %429 = arith.subf %421, %428 : vector<16x32xf32>
    %430 = arith.mulf %429, %429 : vector<16x32xf32>
    %cst_191 = arith.constant dense<0.000000e+00> : vector<16xf32>
    %431 = vector.multi_reduction <add>, %430, %cst_191 [1] : vector<16x32xf32> to vector<16xf32>
    %432 = vector.shape_cast %431 : vector<16xf32> to vector<16x1xf32>
    %cst_192 = arith.constant 3.200000e+01 : f32
    %433 = vector.broadcast %cst_192 : f32 to vector<16x1xf32>
    %434 = arith.divf %432, %433 : vector<16x1xf32>
    %435 = vector.broadcast %427 : vector<16x1xf32> to vector<16x32xf32>
    %436 = arith.subf %421, %435 : vector<16x32xf32>
    %cst_193 = arith.constant 9.99999974E-6 : f32
    %437 = vector.broadcast %cst_193 : f32 to vector<16x1xf32>
    %438 = arith.addf %434, %437 : vector<16x1xf32>
    %439 = math.rsqrt %438 : vector<16x1xf32>
    %440 = vector.broadcast %439 : vector<16x1xf32> to vector<16x32xf32>
    %441 = arith.mulf %436, %440 : vector<16x32xf32>
    %442 = vector.broadcast %422 : vector<1x32xf32> to vector<16x32xf32>
    %443 = arith.mulf %441, %442 : vector<16x32xf32>
    %444 = vector.broadcast %423 : vector<1x32xf32> to vector<16x32xf32>
    %445 = arith.addf %443, %444 : vector<16x32xf32>
    %c0_194 = arith.constant 0 : index
    %c0_195 = arith.constant 0 : index
    %446 = vector.load %arg23[%c0_194, %c0_195] : memref<32x2048xf32, #tpu.memory_space<vmem>>, vector<32x2048xf32>
    %cst_196 = arith.constant dense<0.000000e+00> : vector<16x2048xf32>
    %447 = tpu.matmul %445, %446, %cst_196 {dimension_numbers = #tpu.dot_dimension_numbers<[1], [0], [0], [1], [0, 0, 1, 1], [], []>} : vector<16x32xf32>, vector<32x2048xf32>, vector<16x2048xf32> -> vector<16x2048xf32>
    %c0_197 = arith.constant 0 : index
    %c0_198 = arith.constant 0 : index
    %448 = vector.load %arg24[%c0_197, %c0_198] : memref<1x2048xf32, #tpu.memory_space<vmem>>, vector<1x2048xf32>
    %449 = vector.broadcast %448 : vector<1x2048xf32> to vector<16x2048xf32>
    %450 = arith.addf %447, %449 : vector<16x2048xf32>
    %cst_199 = arith.constant 0.000000e+00 : f32
    %451 = vector.broadcast %cst_199 : f32 to vector<16x2048xf32>
    %452 = arith.maximumf %450, %451 : vector<16x2048xf32>
    %c0_200 = arith.constant 0 : index
    %c0_201 = arith.constant 0 : index
    %453 = vector.load %arg25[%c0_200, %c0_201] : memref<2048x32xf32, #tpu.memory_space<vmem>>, vector<2048x32xf32>
    %cst_202 = arith.constant dense<0.000000e+00> : vector<16x32xf32>
    %454 = tpu.matmul %452, %453, %cst_202 {dimension_numbers = #tpu.dot_dimension_numbers<[1], [0], [0], [1], [0, 0, 1, 1], [], []>} : vector<16x2048xf32>, vector<2048x32xf32>, vector<16x32xf32> -> vector<16x32xf32>
    %c0_203 = arith.constant 0 : index
    %c0_204 = arith.constant 0 : index
    %455 = vector.load %arg26[%c0_203, %c0_204] : memref<1x32xf32, #tpu.memory_space<vmem>>, vector<1x32xf32>
    %456 = vector.broadcast %455 : vector<1x32xf32> to vector<16x32xf32>
    %457 = arith.addf %454, %456 : vector<16x32xf32>
    %458 = arith.addf %445, %457 : vector<16x32xf32>
    %c0_205 = arith.constant 0 : index
    %c0_206 = arith.constant 0 : index
    %459 = vector.load %arg27[%c0_205, %c0_206] : memref<1x32xf32, #tpu.memory_space<vmem>>, vector<1x32xf32>
    %c0_207 = arith.constant 0 : index
    %c0_208 = arith.constant 0 : index
    %460 = vector.load %arg28[%c0_207, %c0_208] : memref<1x32xf32, #tpu.memory_space<vmem>>, vector<1x32xf32>
    %cst_209 = arith.constant dense<0.000000e+00> : vector<16xf32>
    %461 = vector.multi_reduction <add>, %458, %cst_209 [1] : vector<16x32xf32> to vector<16xf32>
    %462 = vector.shape_cast %461 : vector<16xf32> to vector<16x1xf32>
    %cst_210 = arith.constant 3.200000e+01 : f32
    %463 = vector.broadcast %cst_210 : f32 to vector<16x1xf32>
    %464 = arith.divf %462, %463 : vector<16x1xf32>
    %465 = vector.broadcast %464 : vector<16x1xf32> to vector<16x32xf32>
    %466 = arith.subf %458, %465 : vector<16x32xf32>
    %467 = arith.mulf %466, %466 : vector<16x32xf32>
    %cst_211 = arith.constant dense<0.000000e+00> : vector<16xf32>
    %468 = vector.multi_reduction <add>, %467, %cst_211 [1] : vector<16x32xf32> to vector<16xf32>
    %469 = vector.shape_cast %468 : vector<16xf32> to vector<16x1xf32>
    %cst_212 = arith.constant 3.200000e+01 : f32
    %470 = vector.broadcast %cst_212 : f32 to vector<16x1xf32>
    %471 = arith.divf %469, %470 : vector<16x1xf32>
    %472 = vector.broadcast %464 : vector<16x1xf32> to vector<16x32xf32>
    %473 = arith.subf %458, %472 : vector<16x32xf32>
    %cst_213 = arith.constant 9.99999974E-6 : f32
    %474 = vector.broadcast %cst_213 : f32 to vector<16x1xf32>
    %475 = arith.addf %471, %474 : vector<16x1xf32>
    %476 = math.rsqrt %475 : vector<16x1xf32>
    %477 = vector.broadcast %476 : vector<16x1xf32> to vector<16x32xf32>
    %478 = arith.mulf %473, %477 : vector<16x32xf32>
    %479 = vector.broadcast %459 : vector<1x32xf32> to vector<16x32xf32>
    %480 = arith.mulf %478, %479 : vector<16x32xf32>
    %481 = vector.broadcast %460 : vector<1x32xf32> to vector<16x32xf32>
    %482 = arith.addf %480, %481 : vector<16x32xf32>
    %c0_214 = arith.constant 0 : index
    %c0_215 = arith.constant 0 : index
    %483 = vector.load %arg29[%c0_214, %c0_215] : memref<32x4xf32, #tpu.memory_space<vmem>>, vector<32x4xf32>
    %cst_216 = arith.constant dense<0.000000e+00> : vector<16x4xf32>
    %484 = tpu.matmul %482, %483, %cst_216 {dimension_numbers = #tpu.dot_dimension_numbers<[1], [0], [0], [1], [0, 0, 1, 1], [], []>} : vector<16x32xf32>, vector<32x4xf32>, vector<16x4xf32> -> vector<16x4xf32>
    %c0_217 = arith.constant 0 : index
    %c0_218 = arith.constant 0 : index
    %485 = vector.load %arg30[%c0_217, %c0_218] : memref<1x4xf32, #tpu.memory_space<vmem>>, vector<1x4xf32>
    %486 = vector.broadcast %485 : vector<1x4xf32> to vector<16x4xf32>
    %487 = arith.addf %484, %486 : vector<16x4xf32>
    %c0_219 = arith.constant 0 : index
    %c0_220 = arith.constant 0 : index
    %488 = vector.load %arg31[%c0_219, %c0_220] : memref<16x4xf32, #tpu.memory_space<vmem>>, vector<16x4xf32>
    tpu.vector_store %arg31[%c0_219, %c0_220], %487 {strides = array<i32>} : memref<16x4xf32, #tpu.memory_space<vmem>>, vector<16x4xf32>,
    return
  }
  func.func @transform_0(%arg0: i32) -> (i32, i32) {
    %c0_i32 = arith.constant 0 : i32
    %c0_i32_0 = arith.constant 0 : i32
    %c0_i32_1 = arith.constant 0 : i32
    return %c0_i32, %c0_i32_0 : i32, i32
  }
  func.func @transform_1(%arg0: i32) -> (i32, i32) {
    %c0_i32 = arith.constant 0 : i32
    %c0_i32_0 = arith.constant 0 : i32
    %c0_i32_1 = arith.constant 0 : i32
    return %c0_i32, %c0_i32_0 : i32, i32
  }
  func.func @transform_2(%arg0: i32) -> (i32, i32) {
    %c0_i32 = arith.constant 0 : i32
    %c0_i32_0 = arith.constant 0 : i32
    %c0_i32_1 = arith.constant 0 : i32
    return %c0_i32, %c0_i32_0 : i32, i32
  }
  func.func @transform_3(%arg0: i32) -> (i32, i32) {
    %c0_i32 = arith.constant 0 : i32
    %c0_i32_0 = arith.constant 0 : i32
    %c0_i32_1 = arith.constant 0 : i32
    return %c0_i32, %c0_i32_0 : i32, i32
  }
  func.func @transform_4(%arg0: i32) -> (i32, i32) {
    %c0_i32 = arith.constant 0 : i32
    %c0_i32_0 = arith.constant 0 : i32
    %c0_i32_1 = arith.constant 0 : i32
    return %c0_i32, %c0_i32_0 : i32, i32
  }
  func.func @transform_5(%arg0: i32) -> (i32, i32) {
    %c0_i32 = arith.constant 0 : i32
    %c0_i32_0 = arith.constant 0 : i32
    %c0_i32_1 = arith.constant 0 : i32
    return %c0_i32, %c0_i32_0 : i32, i32
  }
  func.func @transform_6(%arg0: i32) -> (i32, i32) {
    %c0_i32 = arith.constant 0 : i32
    %c0_i32_0 = arith.constant 0 : i32
    %c0_i32_1 = arith.constant 0 : i32
    return %c0_i32, %c0_i32_0 : i32, i32
  }
  func.func @transform_7(%arg0: i32) -> (i32, i32) {
    %c0_i32 = arith.constant 0 : i32
    %c0_i32_0 = arith.constant 0 : i32
    %c0_i32_1 = arith.constant 0 : i32
    return %c0_i32, %c0_i32_0 : i32, i32
  }
  func.func @transform_8(%arg0: i32) -> (i32, i32) {
    %c0_i32 = arith.constant 0 : i32
    %c0_i32_0 = arith.constant 0 : i32
    %c0_i32_1 = arith.constant 0 : i32
    return %c0_i32, %c0_i32_0 : i32, i32
  }
  func.func @transform_9(%arg0: i32) -> (i32, i32) {
    %c0_i32 = arith.constant 0 : i32
    %c0_i32_0 = arith.constant 0 : i32
    %c0_i32_1 = arith.constant 0 : i32
    return %c0_i32, %c0_i32_0 : i32, i32
  }
  func.func @transform_10(%arg0: i32) -> (i32, i32) {
    %c0_i32 = arith.constant 0 : i32
    %c0_i32_0 = arith.constant 0 : i32
    %c0_i32_1 = arith.constant 0 : i32
    return %c0_i32, %c0_i32_0 : i32, i32
  }
  func.func @transform_11(%arg0: i32) -> (i32, i32) {
    %c0_i32 = arith.constant 0 : i32
    %c0_i32_0 = arith.constant 0 : i32
    %c0_i32_1 = arith.constant 0 : i32
    return %c0_i32, %c0_i32_0 : i32, i32
  }
  func.func @transform_12(%arg0: i32) -> (i32, i32) {
    %c0_i32 = arith.constant 0 : i32
    %c0_i32_0 = arith.constant 0 : i32
    %c0_i32_1 = arith.constant 0 : i32
    return %c0_i32, %c0_i32_0 : i32, i32
  }
  func.func @transform_13(%arg0: i32) -> (i32, i32) {
    %c0_i32 = arith.constant 0 : i32
    %c0_i32_0 = arith.constant 0 : i32
    %c0_i32_1 = arith.constant 0 : i32
    return %c0_i32, %c0_i32_0 : i32, i32
  }
  func.func @transform_14(%arg0: i32) -> (i32, i32) {
    %c0_i32 = arith.constant 0 : i32
    %c0_i32_0 = arith.constant 0 : i32
    %c0_i32_1 = arith.constant 0 : i32
    return %c0_i32, %c0_i32_0 : i32, i32
  }
  func.func @transform_15(%arg0: i32) -> (i32, i32) {
    %c0_i32 = arith.constant 0 : i32
    %c0_i32_0 = arith.constant 0 : i32
    %c0_i32_1 = arith.constant 0 : i32
    return %c0_i32, %c0_i32_0 : i32, i32
  }
  func.func @transform_16(%arg0: i32) -> (i32, i32) {
    %c0_i32 = arith.constant 0 : i32
    %c0_i32_0 = arith.constant 0 : i32
    %c0_i32_1 = arith.constant 0 : i32
    return %c0_i32, %c0_i32_0 : i32, i32
  }
  func.func @transform_17(%arg0: i32) -> (i32, i32) {
    %c0_i32 = arith.constant 0 : i32
    %c0_i32_0 = arith.constant 0 : i32
    %c0_i32_1 = arith.constant 0 : i32
    return %c0_i32, %c0_i32_0 : i32, i32
  }
  func.func @transform_18(%arg0: i32) -> (i32, i32) {
    %c0_i32 = arith.constant 0 : i32
    %c0_i32_0 = arith.constant 0 : i32
    %c0_i32_1 = arith.constant 0 : i32
    return %c0_i32, %c0_i32_0 : i32, i32
  }
  func.func @transform_19(%arg0: i32) -> (i32, i32) {
    %c0_i32 = arith.constant 0 : i32
    %c0_i32_0 = arith.constant 0 : i32
    %c0_i32_1 = arith.constant 0 : i32
    return %c0_i32, %c0_i32_0 : i32, i32
  }
  func.func @transform_20(%arg0: i32) -> (i32, i32) {
    %c0_i32 = arith.constant 0 : i32
    %c0_i32_0 = arith.constant 0 : i32
    %c0_i32_1 = arith.constant 0 : i32
    return %c0_i32, %c0_i32_0 : i32, i32
  }
  func.func @transform_21(%arg0: i32) -> (i32, i32) {
    %c0_i32 = arith.constant 0 : i32
    %c0_i32_0 = arith.constant 0 : i32
    %c0_i32_1 = arith.constant 0 : i32
    return %c0_i32, %c0_i32_0 : i32, i32
  }
  func.func @transform_22(%arg0: i32) -> (i32, i32) {
    %c0_i32 = arith.constant 0 : i32
    %c0_i32_0 = arith.constant 0 : i32
    %c0_i32_1 = arith.constant 0 : i32
    return %c0_i32, %c0_i32_0 : i32, i32
  }
  func.func @transform_23(%arg0: i32) -> (i32, i32) {
    %c0_i32 = arith.constant 0 : i32
    %c0_i32_0 = arith.constant 0 : i32
    %c0_i32_1 = arith.constant 0 : i32
    return %c0_i32, %c0_i32_0 : i32, i32
  }
  func.func @transform_24(%arg0: i32) -> (i32, i32) {
    %c0_i32 = arith.constant 0 : i32
    %c0_i32_0 = arith.constant 0 : i32
    %c0_i32_1 = arith.constant 0 : i32
    return %c0_i32, %c0_i32_0 : i32, i32
  }
  func.func @transform_25(%arg0: i32) -> (i32, i32) {
    %c0_i32 = arith.constant 0 : i32
    %c0_i32_0 = arith.constant 0 : i32
    %c0_i32_1 = arith.constant 0 : i32
    return %c0_i32, %c0_i32_0 : i32, i32
  }
  func.func @transform_26(%arg0: i32) -> (i32, i32) {
    %c0_i32 = arith.constant 0 : i32
    %c0_i32_0 = arith.constant 0 : i32
    %c0_i32_1 = arith.constant 0 : i32
    return %c0_i32, %c0_i32_0 : i32, i32
  }
  func.func @transform_27(%arg0: i32) -> (i32, i32) {
    %c0_i32 = arith.constant 0 : i32
    %c0_i32_0 = arith.constant 0 : i32
    %c0_i32_1 = arith.constant 0 : i32
    return %c0_i32, %c0_i32_0 : i32, i32
  }
  func.func @transform_28(%arg0: i32) -> (i32, i32) {
    %c0_i32 = arith.constant 0 : i32
    %c0_i32_0 = arith.constant 0 : i32
    %c0_i32_1 = arith.constant 0 : i32
    return %c0_i32, %c0_i32_0 : i32, i32
  }
  func.func @transform_29(%arg0: i32) -> (i32, i32) {
    %c0_i32 = arith.constant 0 : i32
    %c0_i32_0 = arith.constant 0 : i32
    %c0_i32_1 = arith.constant 0 : i32
    return %c0_i32, %c0_i32_0 : i32, i32
  }
  func.func @transform_30(%arg0: i32) -> (i32, i32) {
    %c0_i32 = arith.constant 0 : i32
    %c0_i32_0 = arith.constant 0 : i32
    %c0_i32_1 = arith.constant 0 : i32
    return %c0_i32, %c0_i32_0 : i32, i32
  }
}

</mosaic_0001>

<bundles_post_ra>
// kernel: generator_transformer_forward.1
= control target key start
LH: loop header
LB: loop body
LE: loop exit
PB: predicated region body
PF: predicated region fallthrough
CT: control target
= control target key end

     0   :  { %s4318_s3 = smov 2   ;;  %s4319_s10 = smov 4   ;;  %vm134_vm0 = vcmask 130048   ;;  %vm181_vm1 = vcmask 261120   ;;  %vm214_vm2 = vcmask 64512   ;;  %v168_v27 = vlaneseq  ;;  %s5749_s0 = inlined_call_operand.smem [shape: u32[31], index: -1, kind: input, shape index: {}] }
   0x1   :  { %s4014_s6 = sld [smem:[%s5749_s0 + %s4318_s3]]   ;;  %s4320_s14 = smov 3   ;;  %vm350_vm4 = vcmask 130112   ;;  %vm423_vm5 = vcmask 195712   ;;  %vm496_vm6 = vcmask 261312  }
   0x2   :  { %s1_s9 = sld [smem:[%s5749_s0]]   ;;  %s4321_s18 = smov 5   ;;  %v169_v28 = vshrl.u32 %v168_v27, 7  ;;  %v171_v29 = vand.u32 127, %v168_v27 }
   0x3   :  { %s4016_s13 = sld [smem:[%s5749_s0 + %s4319_s10]]   ;;  %s4322_s22 = smov 1  }
   0x4   :  { %s4015_s17 = sld [smem:[%s5749_s0 + %s4320_s14]]   ;;  %s4323_s26 = smov 56   ;;  %vm4419_vm3 = vcmp.le.s32.totalorder %v171_v29, %v169_v28 }
   0x5   :  { %s4017_s21 = sld [smem:[%s5749_s0 + %s4321_s18]]   ;;  %s4324_s27 = smov 88  }
   0x6   :  { %s4013_s25 = sld [smem:[%s5749_s0 + %s4322_s22]]   ;;  %s4325_s28 = smov 104  }
   0x7   :  { %v129_v0 = vld [vmem:[%s4014_s6 + $0x8] sm:$0xff]  ;;  %v128_v1 = vld [vmem:[%s4014_s6] sm:$0xff]  ;;  %s4326_s29 = smov 120   ;;  %s4327_s30 = smov 80  }
   0x8   :  { %155 = vmatpush.msra.mxu0 %v129_v0  ;;  %4167 = vmatpush.msra.mxu2 %v129_v0  ;;  %v126_v2 = vld [vmem:[%s1_s9] sm:$0xff]  ;;  %v127_v3 = vld [vmem:[%s1_s9 + $0x8] sm:$0xff]  ;;  %s4328_s1 = smov 72   ;;  %s4329_s2 = smov 112  }
   0x9   :  { %v176_v4 = vld [vmem:[%s4016_s13 + $0x18] sm:$0xff]  ;;  %v175_v5 = vld [vmem:[%s4016_s13 + $0x10] sm:$0xff]  ;;  %v174_v6 = vld [vmem:[%s4016_s13 + $0x8] sm:$0xff]  ;;  %s4330_s3 = smov 96   ;;  %s4331_s4 = smov 64  }
   0xa   :  { %156 = vmatpush.msra.mxu0 %v128_v1  ;;  %4168 = vmatpush.msra.mxu2 %v128_v1  ;;  %v173_v7 = vld [vmem:[%s4016_s13] sm:$0xff]  ;;  %s4332_s5 = smov 40   ;;  %s4333_s6 = smov 8  }
   0xb   :  { %4043 = vmatmul.msk.f32.vlgmr.msra.gmra.mxu0 %vm134_vm0, %v126_v2  ;;  %4044 = vmatmul.msk.f32.vlgmr.msra.gmra.mxu2 %vm134_vm0, %v127_v3  ;;  %v4221_v8 = vld [vmem:[%s4015_s17] ss:$0 sm:$0xff]  ;;  %s4334_s7 = smov 48   ;;  %s4335_s8 = smov 16  }
   0xc   :  { %200 = vmatpush.msra.mxu1 %v176_v4  ;;  %v164_v10 = vld [vmem:[%s4013_s25] sm:$0xff]  ;;  %v165_v14 = vld [vmem:[%s4013_s25 + $0x8] sm:$0xff]  ;;  %s4336_s9 = smov 24   ;;  %s4337_s10 = smov 7  }
   0xd   :  { %v4222_v17 = vld [vmem:[%s4017_s21] ss:$0 sm:$0xff]  ;;  %s4019_s13 = sld [smem:[%s5749_s0 + %s4337_s10]]   ;;  %s4338_s14 = smov 6  }
   0xe   :  { %201 = vmatpush.msra.mxu1 %v175_v5  ;;  %s4018_s17 = sld [smem:[%s5749_s0 + %s4338_s14]]   ;;  %s4339_s18 = smov 9  }
   0xf   :  { %s4539_s21 = sld [smem:[%s5749_s0 + %s4339_s18]]   ;;  %s4341_s22 = smov 10  }
  0x10   :  { %202 = vmatpush.msra.mxu1 %v174_v6  ;;  %s4556_s25 = sld [smem:[%s5749_s0 + %s4341_s22]]   ;;  %s4352_s11 = smov 22  }
  0x11   :  { %s4020_s12 = sld [smem:[%s5749_s0 + %s4333_s6]]  }
  0x12   :  { %203 = vmatpush.msra.mxu1 %v173_v7  ;;  %s4028_s23 = sld [smem:[%s5749_s0 + %s4335_s8]]  }
  0x13   :  { %s5239_s14 = sld [smem:[%s5749_s0 + %s4352_s11]]  }
  0x88   :  { %v158_v9 = vpop.f32.mrf.mxu0 }
  0x89   :  { %v159_v11 = vadd.f32 %v4221_v8, %v158_v9 }
  0x8b   :  { %v4383_v12 = vadd.f32 %v164_v10, %v159_v11 }
  0x8d   :  { %4045 = vmatmul.msk.f32.vlgmr.msra.gmra.mxu1 %vm181_vm1, %v4383_v12 }
  0x8e   :  { %v161_v13 = vpop.f32.mrf.mxu2 }
  0x8f   :  { %v162_v15 = vadd.f32 %v4221_v8, %v161_v13 }
  0x91   :  { %v4387_v16 = vadd.f32 %v165_v14, %v162_v15 }
  0x95   :  { %4046 = vmatmul.msk.f32.gmra.mxu1 %vm181_vm1, %v4387_v16 }
 0x10a   :  { %v205_v18 = vpop.f32.mrf.mxu1 }
 0x10b   :  { %v4391_v19 = vadd.f32 %v4222_v17, %v205_v18 }
 0x10d   :  { %320 = vrot.lane.b32.xlu2 %v4391_v19, %s4323_s26  ;;  %281 = vrot.lane.b32.xlu0 %v4391_v19, %s4324_s27 }
 0x112   :  { %v208_v20 = vpop.f32.mrf.mxu1 }
 0x113   :  { %v4401_v21 = vadd.f32 %v4222_v17, %v208_v20 }
 0x115   :  { %425 = vrot.lane.b32.xlu2 %v4391_v19, %s4325_s28  ;;  %279 = vrot.lane.b32.xlu0 %v4391_v19, %s4326_s29 }
 0x11d   :  { %354 = vrot.lane.b32.xlu0 %v4391_v19, %s4327_s30  ;;  %565 = vrot.lane.b32.xlu2 %v4401_v21, %s4326_s29 }
 0x125   :  { %427 = vrot.lane.b32.xlu0 %v4391_v19, %s4328_s1 }
 0x12d   :  { %352 = vrot.lane.b32.xlu0 %v4391_v19, %s4329_s2 }
 0x135   :  { %567 = vrot.lane.b32.xlu0 %v4401_v21, %s4324_s27 }
 0x13d   :  { %711 = vrot.lane.b32.xlu0 %v4401_v21, %s4328_s1 }
 0x167   :  { %v321_v41 = vpop.permute.xlu2 %320 }
 0x16f   :  { %v426_v48 = vpop.permute.xlu2 %425 }
 0x177   :  { %v566_v49 = vpop.permute.xlu2 %565 }
 0x17f   :  { %v282_v22 = vpop.permute.xlu0 %281 }
 0x180   :  { %4050 = vmatpush.xpose.msk.msra.mxu3 %vm214_vm2, %v282_v22 }
 0x187   :  { %v280_v23 = vpop.permute.xlu0 %279 }
 0x188   :  { %4051 = vmatmul.msk.f32.vlgmr.msra.gmra.mxu3 %vm214_vm2, %v280_v23 }
 0x18f   :  { %v355_v24 = vpop.permute.xlu0 %354 }
 0x190   :  { %4053 = vmatpush.xpose.msk.msrb.mxu3 %vm214_vm2, %v355_v24 }
 0x197   :  { %v428_v25 = vpop.permute.xlu0 %427 }
 0x19f   :  { %v353_v26 = vpop.permute.xlu0 %352 }
 0x1a0   :  { %4054 = vmatmul.msk.f32.vlgmr.msrb.gmra.mxu3 %vm214_vm2, %v353_v26 }
 0x1a7   :  { %v568_v52 = vpop.permute.xlu0 %567 }
 0x1af   :  { %v712_v55 = vpop.permute.xlu0 %711 }
 0x20b   :  { %v304_v30 = vpop.f32.mrf.mxu3 }
 0x20c   :  { %v307_v32 = vmul.f32 0.35355338, %v304_v30 }
 0x20e   :  { %v308_v33 = vsel %vm4419_vm3, %v307_v32, -inf }
 0x20f   :  { %v309_v34 = vsel %vm214_vm2, %v308_v33, -inf }
 0x210   :  { %310 = vmax.xlane.f32.xlu1 %v309_v34 }
 0x223   :  { %v377_v44 = vpop.f32.mrf.mxu3 }
 0x224   :  { %v380_v45 = vmul.f32 0.35355338, %v377_v44 }
 0x226   :  { %v381_v46 = vsel %vm4419_vm3, %v380_v45, -inf }
 0x227   :  { %v382_v47 = vsel %vm214_vm2, %v381_v46, -inf }
 0x229   :  { %212 = vrot.lane.b32.xlu1 %v4391_v19, %s4330_s3 }
 0x231   :  { %499 = vrot.lane.b32.xlu1 %v4401_v21, %s4330_s3 }
 0x239   :  { %639 = vrot.lane.b32.xlu1 %v4401_v21, %s4327_s30 }
 0x241   :  { %709 = vrot.lane.b32.xlu1 %v4401_v21, %s4325_s28 }
 0x283   :  { %v311_v35 = vpop.xlane.xlu1 %310 }
 0x284   :  { %v312_v36 = vsub.f32 %v308_v33, %v311_v35 }
 0x286   :  { %v313_v37 = vmul.f32 1.442695, %v312_v36 }
 0x288   :  { %4236 = vpow2.f32 %v313_v37 }
 0x28e   :  { %v4237_v38 = vpop.eup %4236 }
 0x28f   :  { %v315_v39 = vsel %vm214_vm2, %v4237_v38, 0.0 }
 0x290   :  { %316 = vadd.xlane.f32.xlu2 %v315_v39 }
 0x29b   :  { %v213_v40 = vpop.permute.xlu1 %212 }
 0x29c   :  { %4047 = vmatpush.xpose.msk.msrb.mxu2 %vm214_vm2, %v213_v40 }
 0x29f   :  { %4048 = vmatmul.msk.f32.vlgmr.msrb.gmra.mxu2 %vm214_vm2, %v4391_v19 }
 0x2a0   :  { %341 = vmatpush.msra.mxu2 %v321_v41 }
 0x2a2   :  { %4056 = vmatpush.xpose.msk.msrb.mxu2 %vm214_vm2, %v428_v25 }
 0x2a3   :  { %v500_v42 = vpop.permute.xlu1 %499 }
 0x2a4   :  { %4059 = vmatpush.xpose.msk.msra.mxu3 %vm214_vm2, %v500_v42 }
 0x2a7   :  { %4060 = vmatmul.msk.f32.vlgmr.msra.gmra.mxu3 %vm214_vm2, %v4401_v21 }
 0x2a8   :  { %637 = vrot.lane.b32.xlu2 %v4401_v21, %s4329_s2 }
 0x2ab   :  { %v640_v43 = vpop.permute.xlu1 %639 }
 0x2ac   :  { %4065 = vmatpush.xpose.msk.msrb.mxu3 %vm214_vm2, %v640_v43 }
 0x2b3   :  { %v710_v58 = vpop.permute.xlu1 %709 }
 0x2d1   :  { %383 = vmax.xlane.f32.xlu2 %v382_v47 }
 0x303   :  { %v317_v50 = vpop.xlane.xlu2 %316 }
 0x304   :  { %4238 = vrcp.f32 %v317_v50 }
 0x30a   :  { %v4239_v51 = vpop.eup %4238 }
 0x30b   :  { %v319_v53 = vmul.f32 %v4239_v51, %v4237_v38  ;;  %v638_v54 = vpop.permute.xlu2 %637  ;;  %v4211_v38 = vpack.i.bf16 %v4401_v21, %v4391_v19 }
 0x30c   :  { %4066 = vmatmul.msk.f32.vlgmr.msrb.gmra.mxu3 %vm214_vm2, %v638_v54 }
 0x30d   :  { %4052 = vmatmul.msk.f32.vlgmr.msra.gmra.mxu2 %vm214_vm2, %v319_v53 }
 0x30e   :  { %4062 = vmatpush.xpose.msk.msra.mxu2 %vm214_vm2, %v568_v52 }
 0x315   :  { %4057 = vmatmul.msk.f32.vlgmr.msrb.gmra.mxu2 %vm214_vm2, %v426_v48 }
 0x316   :  { %4068 = vmatpush.xpose.msk.msrb.mxu2 %vm214_vm2, %v712_v55 }
 0x31d   :  { %4063 = vmatmul.msk.f32.vlgmr.msra.gmra.mxu2 %vm214_vm2, %v566_v49 }
 0x322   :  { %v236_v56 = vpop.f32.mrf.mxu2 }
 0x323   :  { %v239_v57 = vmul.f32 0.35355338, %v236_v56 }
 0x325   :  { %4069 = vmatmul.msk.f32.vlgmr.msrb.gmra.mxu2 %vm214_vm2, %v710_v58  ;;  %v240_v59 = vsel %vm4419_vm3, %v239_v57, -inf }
 0x326   :  { %v241_v60 = vsel %vm214_vm2, %v240_v59, -inf }
 0x327   :  { %242 = vmax.xlane.f32.xlu0 %v241_v60 }
 0x32a   :  { %v522_v61 = vpop.f32.mrf.mxu3 }
 0x32b   :  { %v525_v62 = vmul.f32 0.35355338, %v522_v61 }
 0x32d   :  { %v526_v63 = vsel %vm4419_vm3, %v525_v62, -inf }
 0x32e   :  { %v527_v0 = vsel %vm214_vm2, %v526_v63, -inf }
 0x32f   :  { %528 = vmax.xlane.f32.xlu2 %v527_v0 }
 0x344   :  { %v384_v1 = vpop.xlane.xlu2 %383 }
 0x345   :  { %v385_v2 = vsub.f32 %v381_v46, %v384_v1 }
 0x347   :  { %v386_v3 = vmul.f32 1.442695, %v385_v2 }
 0x349   :  { %4240 = vpow2.f32 %v386_v3 }
 0x34f   :  { %v4464_v9 = vpop.eup %4240 }
 0x350   :  { %v388_v14 = vsel %vm214_vm2, %v4464_v9, 0.0 }
 0x38f   :  { %v662_v4 = vpop.f32.mrf.mxu3 }
 0x390   :  { %v665_v5 = vmul.f32 0.35355338, %v662_v4  ;;  %v343_v6 = vpop.f32.mrf.mxu2 }
 0x392   :  { %v666_v7 = vsel %vm4419_vm3, %v665_v5, -inf }
 0x393   :  { %v667_v8 = vsel %vm214_vm2, %v666_v7, -inf }
 0x394   :  { %668 = vmax.xlane.f32.xlu1 %v667_v8 }
 0x398   :  { %v450_v10 = vpop.f32.mrf.mxu2 }
 0x399   :  { %v453_v15 = vmul.f32 0.35355338, %v450_v10 }
 0x39a   :  { %v243_v11 = vpop.xlane.xlu0 %242 }
 0x39b   :  { %v244_v13 = vsub.f32 %v240_v59, %v243_v11  ;;  %v454_v20 = vsel %vm4419_vm3, %v453_v15, -inf }
 0x39c   :  { %389 = vadd.xlane.f32.xlu1 %v388_v14  ;;  %v455_v24 = vsel %vm214_vm2, %v454_v20, -inf }
 0x39d   :  { %v245_v17 = vmul.f32 1.442695, %v244_v13 }
 0x39f   :  { %4242 = vpow2.f32 %v245_v17 }
 0x3a0   :  { %v590_v18 = vpop.f32.mrf.mxu2 }
 0x3a1   :  { %v593_v28 = vmul.f32 0.35355338, %v590_v18 }
 0x3a2   :  { %v529_v22 = vpop.xlane.xlu2 %528 }
 0x3a3   :  { %v530_v23 = vsub.f32 %v526_v63, %v529_v22  ;;  %v594_v33 = vsel %vm4419_vm3, %v593_v28, -inf }
 0x3a4   :  { %456 = vmax.xlane.f32.xlu1 %v455_v24  ;;  %v595_v37 = vsel %vm214_vm2, %v594_v33, -inf }
 0x3a5   :  { %v4243_v25 = vpop.eup %4242  ;;  %v531_v26 = vmul.f32 1.442695, %v530_v23 }
 0x3a6   :  { %v247_v27 = vsel %vm214_vm2, %v4243_v25, 0.0 }
 0x3a7   :  { %4244 = vpow2.f32 %v531_v26  ;;  %248 = vadd.xlane.f32.xlu0 %v247_v27 }
 0x3a8   :  { %v734_v29 = vpop.f32.mrf.mxu2 }
 0x3a9   :  { %v737_v30 = vmul.f32 0.35355338, %v734_v29 }
 0x3ab   :  { %v738_v32 = vsel %vm4419_vm3, %v737_v30, -inf }
 0x3ac   :  { %v739_v34 = vsel %vm214_vm2, %v738_v32, -inf }
 0x3ad   :  { %v4477_v35 = vpop.eup %4244  ;;  %740 = vmax.xlane.f32.xlu2 %v739_v34 }
 0x3ae   :  { %v533_v36 = vsel %vm214_vm2, %v4477_v35, 0.0 }
 0x3af   :  { %534 = vadd.xlane.f32.xlu1 %v533_v36  ;;  %596 = vmax.xlane.f32.xlu0 %v595_v37  ;;  %v785_v36 = vld [vmem:[%s4018_s17 + $0x10] sm:$0xff]  ;;  %v784_v37 = vld [vmem:[%s4018_s17 + $0x8] sm:$0xff] }
 0x3c3   :  { %4212 = vrot.lane.b32.xlu0 %v4211_v38, %s4331_s4  ;;  %v783_v38 = vld [vmem:[%s4018_s17] sm:$0xff] }
 0x3c8   :  { %466 = vrot.lane.b32.xlu1 %v4391_v19, %s4332_s5 }
 0x407   :  { %v669_v39 = vpop.xlane.xlu1 %668 }
 0x408   :  { %v670_v40 = vsub.f32 %v666_v7, %v669_v39 }
 0x40a   :  { %v671_v41 = vmul.f32 1.442695, %v670_v40 }
 0x40c   :  { %4246 = vpow2.f32 %v671_v41 }
 0x40f   :  { %v390_v42 = vpop.xlane.xlu1 %389 }
 0x412   :  { %v4487_v43 = vpop.eup %4246 }
 0x413   :  { %v673_v44 = vsel %vm214_vm2, %v4487_v43, 0.0 }
 0x414   :  { %674 = vadd.xlane.f32.xlu0 %v673_v44 }
 0x417   :  { %v457_v45 = vpop.xlane.xlu1 %456 }
 0x418   :  { %v458_v46 = vsub.f32 %v454_v20, %v457_v45 }
 0x41a   :  { %v459_v47 = vmul.f32 1.442695, %v458_v46  ;;  %v249_v48 = vpop.xlane.xlu0 %248  ;;  %v4223_v46 = vld [vmem:[%s4019_s13] ss:$0 sm:$0xff]  ;;  %s4342_s13 = smov 12  }
 0x41b   :  { %s4670_s16 = sld [smem:[%s5749_s0 + %s4342_s13]]   ;;  %s4346_s13 = smov 15  }
 0x41c   :  { %4248 = vpow2.f32 %v459_v47 }
 0x420   :  { %v741_v62 = vpop.xlane.xlu2 %740 }
 0x421   :  { %v742_v63 = vsub.f32 %v738_v32, %v741_v62 }
 0x422   :  { %v4249_v49 = vpop.eup %4248  ;;  %v597_v50 = vpop.xlane.xlu0 %596 }
 0x423   :  { %v598_v51 = vsub.f32 %v594_v33, %v597_v50  ;;  %v461_v52 = vsel %vm214_vm2, %v4249_v49, 0.0  ;;  %v535_v56 = vpop.xlane.xlu1 %534  ;;  %v743_v0 = vmul.f32 1.442695, %v742_v63 }
 0x424   :  { %462 = vadd.xlane.f32.xlu2 %v461_v52 }
 0x425   :  { %v599_v53 = vmul.f32 1.442695, %v598_v51 }
 0x427   :  { %4250 = vpow2.f32 %v599_v53 }
 0x428   :  { %347 = vrot.lane.b32.xlu0 %v343_v6, %s4333_s6  ;;  %4252 = vrcp.f32 %v249_v48 }
 0x429   :  { %4254 = vpow2.f32 %v743_v0 }
 0x42a   :  { %4256 = vrcp.f32 %v390_v42 }
 0x42d   :  { %v4251_v54 = vpop.eup %4250 }
 0x42e   :  { %v601_v55 = vsel %vm214_vm2, %v4251_v54, 0.0  ;;  %v4253_v57 = vpop.eup %4252 }
 0x42f   :  { %602 = vadd.xlane.f32.xlu1 %v601_v55  ;;  %v251_v60 = vmul.f32 %v4253_v57, %v4243_v25  ;;  %v4255_v1 = vpop.eup %4254  ;;  %v4340_v55 = vmov 32.0  }
 0x430   :  { %v745_v2 = vsel %vm214_vm2, %v4255_v1, 0.0 }
 0x435   :  { %v4213_v58 = vpop.permute.xlu0 %4212 }
 0x436   :  { %v4214_v59 = vunpack.i.l.bf16 %v4213_v58  ;;  %v4215_v8 = vunpack.i.h.bf16 %v4213_v58 }
 0x438   :  { %273 = vmatpush.msrb.mxu1 %v4214_v59 }
 0x439   :  { %4049 = vmatmul.msk.f32.vlgmr.msrb.gmra.mxu1 %vm214_vm2, %v251_v60 }
 0x43a   :  { %v467_v61 = vpop.permute.xlu1 %466 }
 0x43b   :  { %487 = vmatpush.msra.mxu1 %v467_v61 }
 0x43c   :  { %393 = vrot.lane.b32.xlu2 %v4391_v19, %s4334_s7  ;;  %v4257_v19 = vpop.eup %4256 }
 0x43d   :  { %v392_v7 = vmul.f32 %v4257_v19, %v4464_v9 }
 0x448   :  { %606 = vrot.lane.b32.xlu1 %v4401_v21, %s4323_s26 }
 0x450   :  { %678 = vrot.lane.b32.xlu1 %v4401_v21, %s4334_s7 }
 0x458   :  { %750 = vrot.lane.b32.xlu1 %v4401_v21, %s4332_s5 }
 0x465   :  { %746 = vadd.xlane.f32.xlu2 %v745_v2 }
 0x487   :  { %v675_v13 = vpop.xlane.xlu0 %674 }
 0x497   :  { %v463_v3 = vpop.xlane.xlu2 %462 }
 0x498   :  { %4258 = vrcp.f32 %v463_v3 }
 0x499   :  { %4260 = vrcp.f32 %v535_v56 }
 0x49a   :  { %v348_v17 = vpop.permute.xlu0 %347 }
 0x49e   :  { %v4259_v4 = vpop.eup %4258 }
 0x49f   :  { %v465_v5 = vmul.f32 %v4259_v4, %v4249_v49  ;;  %v394_v6 = vpop.permute.xlu2 %393  ;;  %v4261_v21 = vpop.eup %4260 }
 0x4a0   :  { %414 = vmatpush.msrb.mxu0 %v394_v6  ;;  %v537_v10 = vmul.f32 %v4261_v21, %v4477_v35  ;;  %v786_v35 = vld [vmem:[%s4018_s17 + $0x18] sm:$0xff]  ;;  %v934_v6 = vld [vmem:[%s4556_s25 + $0x188] sm:$0xff]  ;;  %v917_v21 = vld [vmem:[%s4556_s25 + $0x100] sm:$0xff]  ;;  %s4343_s17 = smov 11  }
 0x4a1   :  { %4055 = vmatmul.msk.f32.vlgmr.msrb.gmra.mxu0 %vm214_vm2, %v392_v7  ;;  %4058 = vmatmul.msk.f32.vlgmr.msra.gmra.mxu1 %vm214_vm2, %v465_v5  ;;  %v933_v5 = vld [vmem:[%s4556_s25 + $0x180] sm:$0xff]  ;;  %v935_v7 = vld [vmem:[%s4556_s25 + $0x190] sm:$0xff]  ;;  %s4747_s20 = sld [smem:[%s5749_s0 + %s4343_s17]]   ;;  %s4347_s17 = smov 17  }
 0x4a2   :  { %559 = vmatpush.msra.mxu0 %v4215_v8  ;;  %v603_v11 = vpop.xlane.xlu1 %602  ;;  %809 = vmatpush.msra.mxu3 %v786_v35  ;;  %v936_v8 = vld [vmem:[%s4556_s25 + $0x198] sm:$0xff] }
 0x4a3   :  { %4262 = vrcp.f32 %v603_v11  ;;  %1026 = vmatpush.msra.mxu2 %v934_v6  ;;  %v919_v11 = vld [vmem:[%s4556_s25 + $0x110] sm:$0xff]  ;;  %v928_v6 = vld [vmem:[%s4556_s25 + $0x158] sm:$0xff] }
 0x4a4   :  { %4264 = vrcp.f32 %v675_v13  ;;  %810 = vmatpush.msra.mxu3 %v785_v36  ;;  %v920_v13 = vld [vmem:[%s4556_s25 + $0x118] sm:$0xff] }
 0x4a6   :  { %811 = vmatpush.msra.mxu3 %v784_v37  ;;  %v4583_v37 = vld [vmem:[%s4539_s21] ss:$0 sm:$0xff]  ;;  %s4344_s21 = smov 13  }
 0x4a7   :  { %s4805_s24 = sld [smem:[%s5749_s0 + %s4344_s21]]   ;;  %s4354_s21 = smov 25  }
 0x4a8   :  { %812 = vmatpush.msra.mxu3 %v783_v38 }
 0x4a9   :  { %4061 = vmatmul.msk.f32.vlgmr.msra.gmra.mxu0 %vm214_vm2, %v537_v10  ;;  %v4263_v15 = vpop.eup %4262  ;;  %v918_v10 = vld [vmem:[%s4556_s25 + $0x108] sm:$0xff] }
 0x4aa   :  { %v605_v9 = vmul.f32 %v4263_v15, %v4251_v54  ;;  %v4265_v20 = vpop.eup %4264  ;;  %1072 = vmatpush.msrb.mxu3 %v936_v8  ;;  %1027 = vmatpush.msra.mxu2 %v918_v10  ;;  %v902_v15 = vld [vmem:[%s4556_s25 + $0x88] sm:$0xff]  ;;  %v912_v10 = vld [vmem:[%s4556_s25 + $0xd8] sm:$0xff] }
 0x4ab   :  { %v677_v22 = vmul.f32 %v4265_v20, %v4487_v43  ;;  %v886_v20 = vld [vmem:[%s4556_s25 + $0x8] sm:$0xff] }
 0x4ac   :  { %1073 = vmatpush.msrb.mxu3 %v920_v13  ;;  %1028 = vmatpush.msra.mxu2 %v902_v15  ;;  %v910_v8 = vld [vmem:[%s4556_s25 + $0xc8] sm:$0xff]  ;;  %v893_v13 = vld [vmem:[%s4556_s25 + $0x40] sm:$0xff]  ;;  %v895_v15 = vld [vmem:[%s4556_s25 + $0x50] sm:$0xff] }
 0x4ae   :  { %1029 = vmatpush.msra.mxu2 %v886_v20 }
 0x4b6   :  { %v275_v14 = vpop.f32.mrf.mxu1 }
 0x4b7   :  { %278 = vst.msk [vmem:[#allocation2] sm:$0xff] %vm214_vm2, %v275_v14  ;;  %v901_v14 = vld [vmem:[%s4556_s25 + $0x80] sm:$0xff] }
 0x4b8   :  { %351 = vst.msk [vmem:[#allocation2] sm:$0xff] %vm350_vm4, %v348_v17  ;;  %v903_v17 = vld [vmem:[%s4556_s25 + $0x90] sm:$0xff] }
 0x4ba   :  { %v607_v18 = vpop.permute.xlu1 %606 }
 0x4bb   :  { %627 = vmatpush.msrb.mxu1 %v607_v18  ;;  %v885_v18 = vld [vmem:[%s4556_s25] sm:$0xff] }
 0x4bc   :  { %4064 = vmatmul.msk.f32.vlgmr.msrb.gmra.mxu1 %vm214_vm2, %v605_v9  ;;  %v904_v9 = vld [vmem:[%s4556_s25 + $0x98] sm:$0xff] }
 0x4bd   :  { %1074 = vmatpush.msrb.mxu3 %v904_v9 }
 0x4c2   :  { %v679_v23 = vpop.permute.xlu1 %678 }
 0x4c3   :  { %699 = vmatpush.msrb.mxu0 %v679_v23  ;;  %v888_v23 = vld [vmem:[%s4556_s25 + $0x18] sm:$0xff] }
 0x4c4   :  { %4067 = vmatmul.msk.f32.vlgmr.msrb.gmra.mxu0 %vm214_vm2, %v677_v22  ;;  %v887_v22 = vld [vmem:[%s4556_s25 + $0x10] sm:$0xff]  ;;  %1075 = vmatpush.msrb.mxu3 %v888_v23 }
 0x4c5   :  { %1003 = vmatpush.msra.mxu0 %v933_v5 }
 0x4c7   :  { %1004 = vmatpush.msra.mxu0 %v917_v21  ;;  %v911_v21 = vld [vmem:[%s4556_s25 + $0xd0] sm:$0xff] }
 0x4c9   :  { %1005 = vmatpush.msra.mxu0 %v901_v14  ;;  %v894_v14 = vld [vmem:[%s4556_s25 + $0x48] sm:$0xff] }
 0x4ca   :  { %v751_v24 = vpop.permute.xlu1 %750 }
 0x4cb   :  { %771 = vmatpush.msra.mxu1 %v751_v24  ;;  %1006 = vmatpush.msra.mxu0 %v885_v18 }
 0x4cd   :  { %1049 = vmatpush.msrb.mxu1 %v935_v7  ;;  %v909_v7 = vld [vmem:[%s4556_s25 + $0xc0] sm:$0xff] }
 0x4cf   :  { %1050 = vmatpush.msrb.mxu1 %v919_v11 }
 0x4d1   :  { %1051 = vmatpush.msrb.mxu1 %v903_v17  ;;  %v896_v17 = vld [vmem:[%s4556_s25 + $0x58] sm:$0xff] }
 0x4d3   :  { %1052 = vmatpush.msrb.mxu1 %v887_v22 }
 0x4d8   :  { %v747_v25 = vpop.xlane.xlu2 %746 }
 0x4d9   :  { %4266 = vrcp.f32 %v747_v25 }
 0x4da   :  { %4268 = vrcp.f32 %v4340_v55  ;;  %v889_v55 = vld [vmem:[%s4556_s25 + $0x20] sm:$0xff] }
 0x4df   :  { %v4267_v26 = vpop.eup %4266 }
 0x4e0   :  { %v749_v27 = vmul.f32 %v4267_v26, %v4255_v1  ;;  %v4269_v56 = vpop.eup %4268 }
 0x4e1   :  { %vm835_vm7 = vweird.f32 %v4269_v56 }
 0x4e2   :  { %4070 = vmatmul.msk.f32.vlgmr.msra.gmra.mxu1 %vm214_vm2, %v749_v27 }
 0x51e   :  { %v416_v28 = vpop.f32.mrf.mxu0  ;;  %v489_v29 = vpop.f32.mrf.mxu1 }
 0x51f   :  { %420 = vrot.lane.b32.xlu1 %v416_v28, %s4335_s8  ;;  %493 = vrot.lane.b32.xlu2 %v489_v29, %s4336_s9 }
 0x526   :  { %v561_v30 = vpop.f32.mrf.mxu0 }
 0x527   :  { %564 = vst.msk [vmem:[#allocation2 + $0x8] sm:$0xff] %vm214_vm2, %v561_v30 }
 0x539   :  { %v629_v32 = vpop.f32.mrf.mxu1 }
 0x53a   :  { %633 = vrot.lane.b32.xlu1 %v629_v32, %s4333_s6  ;;  %v4579_v32 = vld [vmem:[%s4020_s12] sm:$0x1] }
 0x53b   :  { %v876_v35 = vperm.slane %v4579_v32, 0  ;;  %v913_v32 = vld [vmem:[%s4556_s25 + $0xe0] sm:$0xff] }
 0x541   :  { %v701_v33 = vpop.f32.mrf.mxu0 }
 0x542   :  { %705 = vrot.lane.b32.xlu0 %v701_v33, %s4335_s8 }
 0x55f   :  { %v773_v34 = vpop.f32.mrf.mxu1 }
 0x560   :  { %777 = vrot.lane.b32.xlu1 %v773_v34, %s4336_s9 }
 0x579   :  { %v494_v40 = vpop.permute.xlu2 %493 }
 0x591   :  { %v421_v39 = vpop.permute.xlu1 %420 }
 0x592   :  { %424 = vst.msk [vmem:[#allocation2] sm:$0xff] %vm423_vm5, %v421_v39 }
 0x593   :  { %497 = vst.msk [vmem:[#allocation2] sm:$0xff] %vm496_vm6, %v494_v40 }
 0x59a   :  { %v781_v41 = vld [vmem:[#allocation2] sm:$0xff] }
 0x59b   :  { %4071 = vmatmul.msk.f32.vlgmr.msra.gmra.mxu3 %vm181_vm1, %v781_v41  ;;  %v938_v41 = vld [vmem:[%s4556_s25 + $0x1a8] sm:$0xff] }
 0x59c   :  { %1118 = vmatpush.msrb.mxu2 %v938_v41  ;;  %v1406_v41 = vld [vmem:[%s4670_s16 + $0x78] sm:$0xff] }
 0x5ac   :  { %v634_v42 = vpop.permute.xlu1 %633 }
 0x5ad   :  { %636 = vst.msk [vmem:[#allocation2 + $0x8] sm:$0xff] %vm350_vm4, %v634_v42  ;;  %v937_v42 = vld [vmem:[%s4556_s25 + $0x1a0] sm:$0xff] }
 0x5ae   :  { %1095 = vmatpush.msrb.mxu0 %v937_v42  ;;  %v1438_v42 = vld [vmem:[%s4670_s16 + $0x178] sm:$0xff] }
 0x5b4   :  { %v706_v43 = vpop.permute.xlu0 %705 }
 0x5b5   :  { %708 = vst.msk [vmem:[#allocation2 + $0x8] sm:$0xff] %vm423_vm5, %v706_v43  ;;  %v939_v43 = vld [vmem:[%s4556_s25 + $0x1b0] sm:$0xff] }
 0x5b6   :  { %1141 = vmatpush.msra.mxu1 %v939_v43  ;;  %v1422_v43 = vld [vmem:[%s4670_s16 + $0xf8] sm:$0xff] }
 0x5d2   :  { %v778_v44 = vpop.permute.xlu1 %777 }
 0x5d3   :  { %780 = vst.msk [vmem:[#allocation2 + $0x8] sm:$0xff] %vm496_vm6, %v778_v44  ;;  %v940_v44 = vld [vmem:[%s4556_s25 + $0x1b8] sm:$0xff] }
 0x5d4   :  { %1164 = vmatpush.msra.mxu3 %v940_v44  ;;  %v1454_v44 = vld [vmem:[%s4670_s16 + $0x1f8] sm:$0xff] }
 0x5da   :  { %v782_v45 = vld [vmem:[#allocation2 + $0x8] sm:$0xff] }
 0x5db   :  { %4072 = vmatmul.msk.f32.gmra.mxu3 %vm181_vm1, %v782_v45  ;;  %v921_v45 = vld [vmem:[%s4556_s25 + $0x120] sm:$0xff] }
 0x5dc   :  { %1096 = vmatpush.msrb.mxu0 %v921_v45  ;;  %v1405_v45 = vld [vmem:[%s4670_s16 + $0x70] sm:$0xff] }
 0x61e   :  { %v814_v47 = vpop.f32.mrf.mxu3 }
 0x61f   :  { %v815_v48 = vadd.f32 %v4223_v46, %v814_v47  ;;  %v923_v47 = vld [vmem:[%s4556_s25 + $0x130] sm:$0xff] }
 0x620   :  { %1142 = vmatpush.msra.mxu1 %v923_v47  ;;  %v1421_v47 = vld [vmem:[%s4670_s16 + $0xf0] sm:$0xff] }
 0x621   :  { %v820_v49 = vadd.f32 %v815_v48, %v4383_v12  ;;  %v831_v12 = vmul.f32 32.0, %v4269_v56 }
 0x623   :  { %v824_v50 = vsel %vm181_vm1, %v820_v49, 0.0  ;;  %v832_v57 = vsub.f32 1.0, %v831_v12  ;;  %v891_v12 = vld [vmem:[%s4556_s25 + $0x30] sm:$0xff] }
 0x624   :  { %825 = vadd.xlane.f32.xlu0 %v824_v50  ;;  %v905_v50 = vld [vmem:[%s4556_s25 + $0xa0] sm:$0xff] }
 0x625   :  { %v833_v58 = vmul.f32 %v4269_v56, %v832_v57  ;;  %1097 = vmatpush.msrb.mxu0 %v905_v50  ;;  %v1436_v50 = vld [vmem:[%s4670_s16 + $0x168] sm:$0xff] }
 0x627   :  { %v834_v59 = vadd.f32 %v4269_v56, %v833_v58  ;;  %v892_v58 = vld [vmem:[%s4556_s25 + $0x38] sm:$0xff]  ;;  %1098 = vmatpush.msrb.mxu0 %v889_v55  ;;  %v1419_v55 = vld [vmem:[%s4670_s16 + $0xe0] sm:$0xff] }
 0x629   :  { %v4543_v60 = vsel %vm835_vm7, %v4269_v56, %v834_v59  ;;  %v890_v56 = vld [vmem:[%s4556_s25 + $0x28] sm:$0xff] }
 0x62a   :  { %v942_v59 = vld [vmem:[%s4556_s25 + $0x1c8] sm:$0xff] }
 0x65e   :  { %v817_v51 = vpop.f32.mrf.mxu3 }
 0x65f   :  { %v818_v52 = vadd.f32 %v4223_v46, %v817_v51  ;;  %v922_v46 = vld [vmem:[%s4556_s25 + $0x128] sm:$0xff] }
 0x660   :  { %1119 = vmatpush.msrb.mxu2 %v922_v46  ;;  %v906_v51 = vld [vmem:[%s4556_s25 + $0xa8] sm:$0xff]  ;;  %v1437_v46 = vld [vmem:[%s4670_s16 + $0x170] sm:$0xff] }
 0x661   :  { %v821_v53 = vadd.f32 %v818_v52, %v4387_v16 }
 0x662   :  { %1120 = vmatpush.msrb.mxu2 %v906_v51  ;;  %v1420_v51 = vld [vmem:[%s4670_s16 + $0xe8] sm:$0xff] }
 0x663   :  { %v827_v54 = vsel %vm181_vm1, %v821_v53, 0.0 }
 0x664   :  { %828 = vadd.xlane.f32.xlu1 %v827_v54  ;;  %v908_v54 = vld [vmem:[%s4556_s25 + $0xb8] sm:$0xff]  ;;  %1121 = vmatpush.msrb.mxu2 %v890_v56  ;;  %v1451_v56 = vld [vmem:[%s4670_s16 + $0x1e0] sm:$0xff] }
 0x697   :  { %v826_v61 = vpop.xlane.xlu0 %825 }
 0x698   :  { %v837_v62 = vmul.f32 %v4543_v60, %v826_v61 }
 0x69a   :  { %v839_v63 = vsub.f32 %v820_v49, %v837_v62  ;;  %v924_v49 = vld [vmem:[%s4556_s25 + $0x138] sm:$0xff] }
 0x69b   :  { %1165 = vmatpush.msra.mxu3 %v924_v49  ;;  %v1404_v49 = vld [vmem:[%s4670_s16 + $0x68] sm:$0xff] }
 0x69c   :  { %v841_v0 = vmul.f32 %v839_v63, %v839_v63 }
 0x69d   :  { %1166 = vmatpush.msra.mxu3 %v908_v54  ;;  %v1435_v54 = vld [vmem:[%s4670_s16 + $0x160] sm:$0xff] }
 0x69e   :  { %v843_v16 = vsel %vm181_vm1, %v841_v0, 0.0  ;;  %v941_v0 = vld [vmem:[%s4556_s25 + $0x1c0] sm:$0xff] }
 0x69f   :  { %844 = vadd.xlane.f32.xlu2 %v843_v16  ;;  %1167 = vmatpush.msra.mxu3 %v892_v58  ;;  %v943_v16 = vld [vmem:[%s4556_s25 + $0x1d0] sm:$0xff]  ;;  %v1418_v58 = vld [vmem:[%s4670_s16 + $0xd8] sm:$0xff] }
 0x6d7   :  { %v829_v1 = vpop.xlane.xlu1 %828 }
 0x6d8   :  { %v838_v2 = vmul.f32 %v4543_v60, %v829_v1  ;;  %v944_v1 = vld [vmem:[%s4556_s25 + $0x1d8] sm:$0xff] }
 0x6da   :  { %v4548_v3 = vsub.f32 %v821_v53, %v838_v2  ;;  %v907_v53 = vld [vmem:[%s4556_s25 + $0xb0] sm:$0xff]  ;;  %v925_v2 = vld [vmem:[%s4556_s25 + $0x140] sm:$0xff] }
 0x6db   :  { %1143 = vmatpush.msra.mxu1 %v907_v53  ;;  %v1403_v53 = vld [vmem:[%s4670_s16 + $0x60] sm:$0xff] }
 0x6dc   :  { %v842_v19 = vmul.f32 %v4548_v3, %v4548_v3 }
 0x6dd   :  { %1144 = vmatpush.msra.mxu1 %v891_v12  ;;  %v1402_v12 = vld [vmem:[%s4670_s16 + $0x58] sm:$0xff] }
 0x6de   :  { %v846_v4 = vsel %vm181_vm1, %v842_v19, 0.0  ;;  %v926_v19 = vld [vmem:[%s4556_s25 + $0x148] sm:$0xff] }
 0x6df   :  { %847 = vadd.xlane.f32.xlu0 %v846_v4  ;;  %v927_v4 = vld [vmem:[%s4556_s25 + $0x150] sm:$0xff] }
 0x712   :  { %v845_v24 = vpop.xlane.xlu2 %844 }
 0x713   :  { %v849_v25 = vmul.f32 %v845_v24, %v4543_v60  ;;  %v947_v24 = vld [vmem:[%s4556_s25 + $0x1f0] sm:$0xff] }
 0x715   :  { %v851_v26 = vadd.f32 1e-05, %v849_v25  ;;  %v946_v25 = vld [vmem:[%s4556_s25 + $0x1e8] sm:$0xff] }
 0x717   :  { %4270 = vrsqrt.f32 %v851_v26  ;;  %vm859_vm9 = vweird.f32 %v851_v26 }
 0x71d   :  { %v4271_v27 = vpop.eup %4270 }
 0x71e   :  { %v854_v28 = vmul.f32 %v4271_v27, %v851_v26  ;;  %vm860_vm8 = vweird.f32 %v4271_v27  ;;  %v948_v26 = vld [vmem:[%s4556_s25 + $0x1f8] sm:$0xff] }
 0x71f   :  { %vm861_vm10 = vmor %vm859_vm9, %vm860_vm8 }
 0x720   :  { %v855_v29 = vmul.f32 %v4271_v27, %v854_v28  ;;  %v931_v28 = vld [vmem:[%s4556_s25 + $0x170] sm:$0xff] }
 0x722   :  { %v856_v30 = vmul.f32 0.5, %v855_v29  ;;  %v930_v29 = vld [vmem:[%s4556_s25 + $0x168] sm:$0xff] }
 0x724   :  { %v857_v33 = vsub.f32 1.5, %v856_v30  ;;  %v932_v30 = vld [vmem:[%s4556_s25 + $0x178] sm:$0xff] }
 0x726   :  { %v858_v34 = vmul.f32 %v4271_v27, %v857_v33  ;;  %v915_v33 = vld [vmem:[%s4556_s25 + $0xf0] sm:$0xff] }
 0x728   :  { %v862_v36 = vsel %vm861_vm10, %v4271_v27, %v858_v34  ;;  %v929_v27 = vld [vmem:[%s4556_s25 + $0x160] sm:$0xff]  ;;  %v914_v34 = vld [vmem:[%s4556_s25 + $0xe8] sm:$0xff] }
 0x729   :  { %v873_v38 = vmul.f32 %v862_v36, %v839_v63  ;;  %v897_v36 = vld [vmem:[%s4556_s25 + $0x60] sm:$0xff] }
 0x72b   :  { %v878_v39 = vmul.f32 %v876_v35, %v873_v38  ;;  %v898_v38 = vld [vmem:[%s4556_s25 + $0x68] sm:$0xff] }
 0x72d   :  { %v4588_v40 = vadd.f32 %v4583_v37, %v878_v39  ;;  %v900_v39 = vld [vmem:[%s4556_s25 + $0x78] sm:$0xff] }
 0x72f   :  { %4073 = vmatmul.msk.f32.vlgmr.msra.gmra.mxu0 %vm181_vm1, %v4588_v40  ;;  %4075 = vmatmul.msk.f32.vlgmr.msra.gmra.mxu2 %vm181_vm1, %v4588_v40 }
 0x730   :  { %4077 = vmatmul.msk.f32.vlgmr.msrb.gmra.mxu1 %vm181_vm1, %v4588_v40  ;;  %4079 = vmatmul.msk.f32.vlgmr.msrb.gmra.mxu3 %vm181_vm1, %v4588_v40 }
 0x731   :  { %1210 = vmatpush.msra.mxu2 %v942_v59  ;;  %1187 = vmatpush.msra.mxu0 %v941_v0  ;;  %v1450_v59 = vld [vmem:[%s4670_s16 + $0x1d8] sm:$0xff]  ;;  %v1449_v0 = vld [vmem:[%s4670_s16 + $0x1d0] sm:$0xff] }
 0x732   :  { %1233 = vmatpush.msrb.mxu1 %v943_v16  ;;  %1256 = vmatpush.msrb.mxu3 %v944_v1  ;;  %v1400_v16 = vld [vmem:[%s4670_s16 + $0x48] sm:$0xff] }
 0x733   :  { %1211 = vmatpush.msra.mxu2 %v926_v19  ;;  %1188 = vmatpush.msra.mxu0 %v925_v2  ;;  %v1432_v1 = vld [vmem:[%s4670_s16 + $0x148] sm:$0xff] }
 0x734   :  { %1234 = vmatpush.msrb.mxu1 %v927_v4  ;;  %1257 = vmatpush.msrb.mxu3 %v928_v6  ;;  %v1416_v2 = vld [vmem:[%s4670_s16 + $0xc8] sm:$0xff]  ;;  %v1399_v4 = vld [vmem:[%s4670_s16 + $0x40] sm:$0xff] }
 0x735   :  { %1212 = vmatpush.msra.mxu2 %v910_v8  ;;  %1189 = vmatpush.msra.mxu0 %v909_v7  ;;  %v1448_v19 = vld [vmem:[%s4670_s16 + $0x1c8] sm:$0xff]  ;;  %v1415_v6 = vld [vmem:[%s4670_s16 + $0xc0] sm:$0xff]  ;;  %v1398_v8 = vld [vmem:[%s4670_s16 + $0x38] sm:$0xff] }
 0x736   :  { %1235 = vmatpush.msrb.mxu1 %v911_v21  ;;  %1258 = vmatpush.msrb.mxu3 %v912_v10  ;;  %v1447_v7 = vld [vmem:[%s4670_s16 + $0x1c0] sm:$0xff]  ;;  %v1430_v21 = vld [vmem:[%s4670_s16 + $0x138] sm:$0xff] }
 0x737   :  { %1213 = vmatpush.msra.mxu2 %v894_v14  ;;  %1190 = vmatpush.msra.mxu0 %v893_v13  ;;  %v1414_v10 = vld [vmem:[%s4670_s16 + $0xb8] sm:$0xff]  ;;  %v1397_v13 = vld [vmem:[%s4670_s16 + $0x30] sm:$0xff] }
 0x738   :  { %1236 = vmatpush.msrb.mxu1 %v895_v15  ;;  %1259 = vmatpush.msrb.mxu3 %v896_v17  ;;  %v1429_v14 = vld [vmem:[%s4670_s16 + $0x130] sm:$0xff] }
 0x739   :  { %v1413_v15 = vld [vmem:[%s4670_s16 + $0xb0] sm:$0xff] }
 0x73a   :  { %v1445_v17 = vld [vmem:[%s4670_s16 + $0x1b0] sm:$0xff] }
 0x752   :  { %v848_v48 = vpop.xlane.xlu0 %847 }
 0x753   :  { %v850_v52 = vmul.f32 %v848_v48, %v4543_v60  ;;  %v1453_v48 = vld [vmem:[%s4670_s16 + $0x1f0] sm:$0xff] }
 0x755   :  { %v852_v57 = vadd.f32 1e-05, %v850_v52  ;;  %v1452_v52 = vld [vmem:[%s4670_s16 + $0x1e8] sm:$0xff] }
 0x757   :  { %4272 = vrsqrt.f32 %v852_v57  ;;  %vm869_vm12 = vweird.f32 %v852_v57 }
 0x75d   :  { %v4273_v61 = vpop.eup %4272 }
 0x75e   :  { %v864_v62 = vmul.f32 %v4273_v61, %v852_v57  ;;  %vm870_vm11 = vweird.f32 %v4273_v61  ;;  %v1434_v57 = vld [vmem:[%s4670_s16 + $0x158] sm:$0xff] }
 0x75f   :  { %vm871_vm13 = vmor %vm869_vm12, %vm870_vm11 }
 0x760   :  { %v865_v63 = vmul.f32 %v4273_v61, %v864_v62  ;;  %v1433_v62 = vld [vmem:[%s4670_s16 + $0x150] sm:$0xff] }
 0x762   :  { %v866_v5 = vmul.f32 0.5, %v865_v63  ;;  %v1417_v63 = vld [vmem:[%s4670_s16 + $0xd0] sm:$0xff] }
 0x764   :  { %v867_v11 = vsub.f32 1.5, %v866_v5  ;;  %v1431_v5 = vld [vmem:[%s4670_s16 + $0x140] sm:$0xff] }
 0x766   :  { %v868_v9 = vmul.f32 %v4273_v61, %v867_v11  ;;  %v1446_v11 = vld [vmem:[%s4670_s16 + $0x1b8] sm:$0xff] }
 0x768   :  { %v872_v18 = vsel %vm871_vm13, %v4273_v61, %v868_v9  ;;  %v1401_v61 = vld [vmem:[%s4670_s16 + $0x50] sm:$0xff]  ;;  %v1396_v9 = vld [vmem:[%s4670_s16 + $0x28] sm:$0xff] }
 0x769   :  { %v874_v20 = vmul.f32 %v872_v18, %v4548_v3  ;;  %v945_v3 = vld [vmem:[%s4556_s25 + $0x1e0] sm:$0xff]  ;;  %v1428_v18 = vld [vmem:[%s4670_s16 + $0x128] sm:$0xff] }
 0x76b   :  { %v879_v22 = vmul.f32 %v876_v35, %v874_v20  ;;  %v916_v35 = vld [vmem:[%s4556_s25 + $0xf8] sm:$0xff]  ;;  %v1412_v20 = vld [vmem:[%s4670_s16 + $0xa8] sm:$0xff] }
 0x76d   :  { %v4635_v23 = vadd.f32 %v4583_v37, %v879_v22  ;;  %v899_v37 = vld [vmem:[%s4556_s25 + $0x70] sm:$0xff]  ;;  %v1444_v22 = vld [vmem:[%s4670_s16 + $0x1a8] sm:$0xff]  ;;  %s4345_s25 = smov 14  }
 0x76e   :  { %s5040_s12 = sld [smem:[%s5749_s0 + %s4345_s25]]  }
 0x76f   :  { %4074 = vmatmul.msk.f32.gmra.mxu0 %vm181_vm1, %v4635_v23  ;;  %4076 = vmatmul.msk.f32.gmra.mxu2 %vm181_vm1, %v4635_v23 }
 0x770   :  { %4078 = vmatmul.msk.f32.gmra.mxu1 %vm181_vm1, %v4635_v23  ;;  %4080 = vmatmul.msk.f32.gmra.mxu3 %vm181_vm1, %v4635_v23 }
 0x777   :  { %4081 = vmatmul.msk.f32.vlgmr.msrb.gmra.mxu0 %vm181_vm1, %v4588_v40  ;;  %4083 = vmatmul.msk.f32.vlgmr.msrb.gmra.mxu2 %vm181_vm1, %v4588_v40 }
 0x778   :  { %4085 = vmatmul.msk.f32.vlgmr.msra.gmra.mxu1 %vm181_vm1, %v4588_v40  ;;  %4087 = vmatmul.msk.f32.vlgmr.msra.gmra.mxu3 %vm181_vm1, %v4588_v40 }
 0x779   :  { %1279 = vmatpush.msrb.mxu0 %v945_v3  ;;  %1325 = vmatpush.msra.mxu1 %v947_v24  ;;  %v1395_v3 = vld [vmem:[%s4670_s16 + $0x20] sm:$0xff] }
 0x77a   :  { %1302 = vmatpush.msrb.mxu2 %v946_v25  ;;  %1348 = vmatpush.msra.mxu3 %v948_v26  ;;  %v1427_v24 = vld [vmem:[%s4670_s16 + $0x120] sm:$0xff] }
 0x77b   :  { %1280 = vmatpush.msrb.mxu0 %v929_v27  ;;  %1326 = vmatpush.msra.mxu1 %v931_v28  ;;  %v1411_v25 = vld [vmem:[%s4670_s16 + $0xa0] sm:$0xff]  ;;  %v1394_v27 = vld [vmem:[%s4670_s16 + $0x18] sm:$0xff] }
 0x77c   :  { %1303 = vmatpush.msrb.mxu2 %v930_v29  ;;  %1349 = vmatpush.msra.mxu3 %v932_v30  ;;  %v1443_v26 = vld [vmem:[%s4670_s16 + $0x1a0] sm:$0xff]  ;;  %v1426_v28 = vld [vmem:[%s4670_s16 + $0x118] sm:$0xff] }
 0x77d   :  { %1281 = vmatpush.msrb.mxu0 %v913_v32  ;;  %1327 = vmatpush.msra.mxu1 %v915_v33  ;;  %v1410_v29 = vld [vmem:[%s4670_s16 + $0x98] sm:$0xff]  ;;  %v4772_v32 = vld [vmem:[%s4747_s20] sm:$0xff]  ;;  %v1393_v33 = vld [vmem:[%s4670_s16 + $0x10] sm:$0xff] }
 0x77e   :  { %1304 = vmatpush.msrb.mxu2 %v914_v34  ;;  %1350 = vmatpush.msra.mxu3 %v916_v35  ;;  %v1442_v30 = vld [vmem:[%s4670_s16 + $0x198] sm:$0xff]  ;;  %v1425_v34 = vld [vmem:[%s4670_s16 + $0x110] sm:$0xff] }
 0x77f   :  { %4082 = vmatmul.msk.f32.gmra.mxu0 %vm181_vm1, %v4635_v23  ;;  %4084 = vmatmul.msk.f32.gmra.mxu2 %vm181_vm1, %v4635_v23  ;;  %v1409_v35 = vld [vmem:[%s4670_s16 + $0x90] sm:$0xff] }
 0x780   :  { %4086 = vmatmul.msk.f32.gmra.mxu1 %vm181_vm1, %v4635_v23  ;;  %4088 = vmatmul.msk.f32.gmra.mxu3 %vm181_vm1, %v4635_v23 }
 0x781   :  { %1282 = vmatpush.msrb.mxu0 %v897_v36  ;;  %1328 = vmatpush.msra.mxu1 %v899_v37  ;;  %v1441_v36 = vld [vmem:[%s4670_s16 + $0x190] sm:$0xff]  ;;  %v1392_v37 = vld [vmem:[%s4670_s16 + $0x8] sm:$0xff] }
 0x782   :  { %1305 = vmatpush.msrb.mxu2 %v898_v38  ;;  %1351 = vmatpush.msra.mxu3 %v900_v39  ;;  %v1424_v38 = vld [vmem:[%s4670_s16 + $0x108] sm:$0xff]  ;;  %v953_v39 = vperm.slane %v4772_v32, 0 }
 0x787   :  { %4089 = vmatmul.msk.f32.vlgmr.msra.gmra.mxu0 %vm181_vm1, %v4588_v40  ;;  %4091 = vmatmul.msk.f32.vlgmr.msra.gmra.mxu2 %vm181_vm1, %v4588_v40 }
 0x788   :  { %4093 = vmatmul.msk.f32.vlgmr.msrb.gmra.mxu1 %vm181_vm1, %v4588_v40  ;;  %4095 = vmatmul.msk.f32.vlgmr.msrb.gmra.mxu3 %vm181_vm1, %v4588_v40 }
 0x789   :  { %1651 = vmatpush.msra.mxu0 %v1406_v41  ;;  %1697 = vmatpush.msrb.mxu1 %v1438_v42  ;;  %v1408_v41 = vld [vmem:[%s4670_s16 + $0x88] sm:$0xff] }
 0x78a   :  { %1674 = vmatpush.msra.mxu2 %v1422_v43  ;;  %1720 = vmatpush.msrb.mxu3 %v1454_v44  ;;  %v1440_v42 = vld [vmem:[%s4670_s16 + $0x188] sm:$0xff]  ;;  %v955_v43 = vperm.slane %v4772_v32, 2  ;;  %v1391_v44 = vld [vmem:[%s4670_s16] sm:$0xff] }
 0x78b   :  { %1652 = vmatpush.msra.mxu0 %v1405_v45  ;;  %1698 = vmatpush.msrb.mxu1 %v1437_v46  ;;  %v1423_v45 = vld [vmem:[%s4670_s16 + $0x100] sm:$0xff] }
 0x78c   :  { %1675 = vmatpush.msra.mxu2 %v1421_v47  ;;  %1721 = vmatpush.msrb.mxu3 %v1453_v48  ;;  %v1407_v46 = vld [vmem:[%s4670_s16 + $0x80] sm:$0xff] }
 0x78d   :  { %1653 = vmatpush.msra.mxu0 %v1404_v49  ;;  %1699 = vmatpush.msrb.mxu1 %v1436_v50  ;;  %v1439_v47 = vld [vmem:[%s4670_s16 + $0x180] sm:$0xff]  ;;  %v1470_v49 = vld [vmem:[%s4670_s16 + $0x278] sm:$0xff] }
 0x78e   :  { %1676 = vmatpush.msra.mxu2 %v1420_v51  ;;  %1722 = vmatpush.msrb.mxu3 %v1452_v52  ;;  %v1502_v50 = vld [vmem:[%s4670_s16 + $0x378] sm:$0xff] }
 0x78f   :  { %4090 = vmatmul.msk.f32.gmra.mxu0 %vm181_vm1, %v4635_v23  ;;  %4092 = vmatmul.msk.f32.gmra.mxu2 %vm181_vm1, %v4635_v23 }
 0x790   :  { %4094 = vmatmul.msk.f32.gmra.mxu1 %vm181_vm1, %v4635_v23  ;;  %4096 = vmatmul.msk.f32.gmra.mxu3 %vm181_vm1, %v4635_v23 }
 0x791   :  { %1654 = vmatpush.msra.mxu0 %v1403_v53  ;;  %1700 = vmatpush.msrb.mxu1 %v1435_v54  ;;  %v1486_v53 = vld [vmem:[%s4670_s16 + $0x2f8] sm:$0xff] }
 0x792   :  { %1677 = vmatpush.msra.mxu2 %v1419_v55  ;;  %1723 = vmatpush.msrb.mxu3 %v1451_v56  ;;  %v1518_v54 = vld [vmem:[%s4670_s16 + $0x3f8] sm:$0xff]  ;;  %v1501_v56 = vld [vmem:[%s4670_s16 + $0x370] sm:$0xff] }
 0x793   :  { %1655 = vmatpush.msra.mxu0 %v1402_v12  ;;  %1701 = vmatpush.msrb.mxu1 %v1434_v57  ;;  %v954_v57 = vperm.slane %v4772_v32, 1 }
 0x794   :  { %1678 = vmatpush.msra.mxu2 %v1418_v58  ;;  %1724 = vmatpush.msrb.mxu3 %v1450_v59  ;;  %v1469_v58 = vld [vmem:[%s4670_s16 + $0x270] sm:$0xff] }
 0x795   :  { %1656 = vmatpush.msra.mxu0 %v1401_v61  ;;  %1702 = vmatpush.msrb.mxu1 %v1433_v62  ;;  %v956_v61 = vperm.slane %v4772_v32, 3  ;;  %v1500_v62 = vld [vmem:[%s4670_s16 + $0x368] sm:$0xff] }
 0x796   :  { %1679 = vmatpush.msra.mxu2 %v1417_v63  ;;  %1725 = vmatpush.msrb.mxu3 %v1449_v0  ;;  %v1485_v63 = vld [vmem:[%s4670_s16 + $0x2f0] sm:$0xff]  ;;  %v1468_v0 = vld [vmem:[%s4670_s16 + $0x268] sm:$0xff] }
 0x797   :  { %4097 = vmatmul.msk.f32.vlgmr.msrb.gmra.mxu0 %vm181_vm1, %v4588_v40  ;;  %4099 = vmatmul.msk.f32.vlgmr.msrb.gmra.mxu2 %vm181_vm1, %v4588_v40 }
 0x798   :  { %4101 = vmatmul.msk.f32.vlgmr.msra.gmra.mxu1 %vm181_vm1, %v4588_v40  ;;  %4103 = vmatmul.msk.f32.vlgmr.msra.gmra.mxu3 %vm181_vm1, %v4588_v40 }
 0x799   :  { %1657 = vmatpush.msra.mxu0 %v1400_v16  ;;  %1703 = vmatpush.msrb.mxu1 %v1432_v1  ;;  %v1517_v16 = vld [vmem:[%s4670_s16 + $0x3f0] sm:$0xff] }
 0x79a   :  { %1680 = vmatpush.msra.mxu2 %v1416_v2  ;;  %1726 = vmatpush.msrb.mxu3 %v1448_v19  ;;  %v1499_v2 = vld [vmem:[%s4670_s16 + $0x360] sm:$0xff]  ;;  %v1484_v19 = vld [vmem:[%s4670_s16 + $0x2e8] sm:$0xff] }
 0x79b   :  { %1658 = vmatpush.msra.mxu0 %v1399_v4  ;;  %1704 = vmatpush.msrb.mxu1 %v1431_v5 }
 0x79c   :  { %1681 = vmatpush.msra.mxu2 %v1415_v6  ;;  %1727 = vmatpush.msrb.mxu3 %v1447_v7  ;;  %v1467_v6 = vld [vmem:[%s4670_s16 + $0x260] sm:$0xff]  ;;  %v1516_v7 = vld [vmem:[%s4670_s16 + $0x3e8] sm:$0xff] }
 0x79d   :  { %1659 = vmatpush.msra.mxu0 %v1398_v8  ;;  %1705 = vmatpush.msrb.mxu1 %v1430_v21  ;;  %v1498_v21 = vld [vmem:[%s4670_s16 + $0x358] sm:$0xff] }
 0x79e   :  { %1682 = vmatpush.msra.mxu2 %v1414_v10  ;;  %1728 = vmatpush.msrb.mxu3 %v1446_v11  ;;  %v1466_v11 = vld [vmem:[%s4670_s16 + $0x258] sm:$0xff] }
 0x79f   :  { %4098 = vmatmul.msk.f32.gmra.mxu0 %vm181_vm1, %v4635_v23  ;;  %4100 = vmatmul.msk.f32.gmra.mxu2 %vm181_vm1, %v4635_v23 }
 0x7a0   :  { %4102 = vmatmul.msk.f32.gmra.mxu1 %vm181_vm1, %v4635_v23  ;;  %4104 = vmatmul.msk.f32.gmra.mxu3 %vm181_vm1, %v4635_v23 }
 0x7a1   :  { %1660 = vmatpush.msra.mxu0 %v1397_v13  ;;  %1706 = vmatpush.msrb.mxu1 %v1429_v14  ;;  %v1497_v14 = vld [vmem:[%s4670_s16 + $0x350] sm:$0xff] }
 0x7a2   :  { %1683 = vmatpush.msra.mxu2 %v1413_v15  ;;  %1729 = vmatpush.msrb.mxu3 %v1445_v17  ;;  %v1483_v15 = vld [vmem:[%s4670_s16 + $0x2e0] sm:$0xff]  ;;  %v1465_v17 = vld [vmem:[%s4670_s16 + $0x250] sm:$0xff] }
 0x7a3   :  { %1661 = vmatpush.msra.mxu0 %v1396_v9  ;;  %1707 = vmatpush.msrb.mxu1 %v1428_v18  ;;  %v1515_v9 = vld [vmem:[%s4670_s16 + $0x3e0] sm:$0xff]  ;;  %v1496_v18 = vld [vmem:[%s4670_s16 + $0x348] sm:$0xff] }
 0x7a4   :  { %1684 = vmatpush.msra.mxu2 %v1412_v20  ;;  %1730 = vmatpush.msrb.mxu3 %v1444_v22  ;;  %v1482_v20 = vld [vmem:[%s4670_s16 + $0x2d8] sm:$0xff]  ;;  %v1464_v22 = vld [vmem:[%s4670_s16 + $0x248] sm:$0xff] }
 0x7a5   :  { %1662 = vmatpush.msra.mxu0 %v1395_v3  ;;  %1708 = vmatpush.msrb.mxu1 %v1427_v24  ;;  %v1514_v3 = vld [vmem:[%s4670_s16 + $0x3d8] sm:$0xff]  ;;  %v1495_v24 = vld [vmem:[%s4670_s16 + $0x340] sm:$0xff] }
 0x7a6   :  { %1685 = vmatpush.msra.mxu2 %v1411_v25  ;;  %1731 = vmatpush.msrb.mxu3 %v1443_v26  ;;  %v1481_v25 = vld [vmem:[%s4670_s16 + $0x2d0] sm:$0xff]  ;;  %v1463_v26 = vld [vmem:[%s4670_s16 + $0x240] sm:$0xff] }
 0x7a7   :  { %1663 = vmatpush.msra.mxu0 %v1394_v27  ;;  %1709 = vmatpush.msrb.mxu1 %v1426_v28  ;;  %v1513_v27 = vld [vmem:[%s4670_s16 + $0x3d0] sm:$0xff]  ;;  %v1494_v28 = vld [vmem:[%s4670_s16 + $0x338] sm:$0xff] }
 0x7a8   :  { %1686 = vmatpush.msra.mxu2 %v1410_v29  ;;  %1732 = vmatpush.msrb.mxu3 %v1442_v30  ;;  %v1480_v29 = vld [vmem:[%s4670_s16 + $0x2c8] sm:$0xff]  ;;  %v1462_v30 = vld [vmem:[%s4670_s16 + $0x238] sm:$0xff] }
 0x7a9   :  { %1664 = vmatpush.msra.mxu0 %v1393_v33  ;;  %1710 = vmatpush.msrb.mxu1 %v1425_v34  ;;  %v1512_v33 = vld [vmem:[%s4670_s16 + $0x3c8] sm:$0xff]  ;;  %v1493_v34 = vld [vmem:[%s4670_s16 + $0x330] sm:$0xff] }
 0x7aa   :  { %1687 = vmatpush.msra.mxu2 %v1409_v35  ;;  %1733 = vmatpush.msrb.mxu3 %v1441_v36  ;;  %v1479_v35 = vld [vmem:[%s4670_s16 + $0x2c0] sm:$0xff]  ;;  %v1461_v36 = vld [vmem:[%s4670_s16 + $0x230] sm:$0xff] }
 0x7ab   :  { %1665 = vmatpush.msra.mxu0 %v1392_v37  ;;  %1711 = vmatpush.msrb.mxu1 %v1424_v38  ;;  %v1511_v37 = vld [vmem:[%s4670_s16 + $0x3c0] sm:$0xff]  ;;  %v1492_v38 = vld [vmem:[%s4670_s16 + $0x328] sm:$0xff] }
 0x7ac   :  { %v1008_v48 = vpop.f32.mrf.mxu0  ;;  %1688 = vmatpush.msra.mxu2 %v1408_v41  ;;  %1734 = vmatpush.msrb.mxu3 %v1440_v42  ;;  %v1478_v41 = vld [vmem:[%s4670_s16 + $0x2b8] sm:$0xff]  ;;  %v1460_v42 = vld [vmem:[%s4670_s16 + $0x228] sm:$0xff] }
 0x7ad   :  { %v1009_v51 = vadd.f32 %v1008_v48, %v953_v39  ;;  %v1054_v52 = vpop.f32.mrf.mxu1  ;;  %1666 = vmatpush.msra.mxu0 %v1391_v44  ;;  %1712 = vmatpush.msrb.mxu1 %v1423_v45  ;;  %v1510_v44 = vld [vmem:[%s4670_s16 + $0x3b8] sm:$0xff]  ;;  %v1491_v45 = vld [vmem:[%s4670_s16 + $0x320] sm:$0xff]  ;;  %v1509_v48 = vld [vmem:[%s4670_s16 + $0x3b0] sm:$0xff] }
 0x7ae   :  { %v1055_v55 = vadd.f32 %v1054_v52, %v955_v43  ;;  %1689 = vmatpush.msra.mxu2 %v1407_v46  ;;  %1735 = vmatpush.msrb.mxu3 %v1439_v47  ;;  %v1477_v46 = vld [vmem:[%s4670_s16 + $0x2b0] sm:$0xff]  ;;  %v1459_v47 = vld [vmem:[%s4670_s16 + $0x220] sm:$0xff]  ;;  %v1508_v52 = vld [vmem:[%s4670_s16 + $0x3a8] sm:$0xff] }
 0x7af   :  { %v1359_v12 = vmax.f32 %v1009_v51, 0.0  ;;  %1743 = vmatpush.msrb.mxu0 %v1470_v49  ;;  %1789 = vmatpush.msra.mxu1 %v1502_v50  ;;  %v1490_v49 = vld [vmem:[%s4670_s16 + $0x318] sm:$0xff]  ;;  %v1476_v50 = vld [vmem:[%s4670_s16 + $0x2a8] sm:$0xff] }
 0x7b0   :  { %v1361_v59 = vmax.f32 %v1055_v55, 0.0  ;;  %1766 = vmatpush.msrb.mxu2 %v1486_v53  ;;  %1812 = vmatpush.msra.mxu3 %v1518_v54  ;;  %v1458_v51 = vld [vmem:[%s4670_s16 + $0x218] sm:$0xff]  ;;  %v1489_v53 = vld [vmem:[%s4670_s16 + $0x310] sm:$0xff]  ;;  %v1475_v54 = vld [vmem:[%s4670_s16 + $0x2a0] sm:$0xff] }
 0x7b1   :  { %1667 = vmatmul.f32.vlgmr.msra.gmra.mxu0 %v1359_v12  ;;  %1790 = vmatpush.msra.mxu1 %v1501_v56  ;;  %v1457_v55 = vld [vmem:[%s4670_s16 + $0x210] sm:$0xff]  ;;  %v1507_v56 = vld [vmem:[%s4670_s16 + $0x3a0] sm:$0xff]  ;;  %v1488_v12 = vld [vmem:[%s4670_s16 + $0x308] sm:$0xff] }
 0x7b2   :  { %1713 = vmatmul.f32.vlgmr.msrb.gmra.mxu1 %v1361_v59  ;;  %v1031_v1 = vpop.f32.mrf.mxu2  ;;  %1744 = vmatpush.msrb.mxu0 %v1469_v58  ;;  %v1474_v58 = vld [vmem:[%s4670_s16 + $0x298] sm:$0xff]  ;;  %v1456_v59 = vld [vmem:[%s4670_s16 + $0x208] sm:$0xff] }
 0x7b3   :  { %v1032_v4 = vadd.f32 %v1031_v1, %v954_v57  ;;  %v1077_v5 = vpop.f32.mrf.mxu3  ;;  %1791 = vmatpush.msra.mxu1 %v1500_v62  ;;  %1767 = vmatpush.msrb.mxu2 %v1485_v63  ;;  %v1506_v62 = vld [vmem:[%s4670_s16 + $0x398] sm:$0xff]  ;;  %v1487_v63 = vld [vmem:[%s4670_s16 + $0x300] sm:$0xff] }
 0x7b4   :  { %v1078_v8 = vadd.f32 %v1077_v5, %v956_v61  ;;  %1745 = vmatpush.msrb.mxu0 %v1468_v0  ;;  %1813 = vmatpush.msra.mxu3 %v1517_v16  ;;  %v1473_v0 = vld [vmem:[%s4670_s16 + $0x290] sm:$0xff]  ;;  %v1455_v16 = vld [vmem:[%s4670_s16 + $0x200] sm:$0xff]  ;;  %v1566_v1 = vld [vmem:[%s4670_s16 + $0x578] sm:$0xff] }
 0x7b5   :  { %v1360_v10 = vmax.f32 %v1032_v4, 0.0  ;;  %1792 = vmatpush.msra.mxu1 %v1499_v2  ;;  %1768 = vmatpush.msrb.mxu2 %v1484_v19  ;;  %v1534_v2 = vld [vmem:[%s4670_s16 + $0x478] sm:$0xff]  ;;  %v1505_v19 = vld [vmem:[%s4670_s16 + $0x390] sm:$0xff]  ;;  %v1472_v5 = vld [vmem:[%s4670_s16 + $0x288] sm:$0xff] }
 0x7b6   :  { %v1362_v13 = vmax.f32 %v1078_v8, 0.0  ;;  %1746 = vmatpush.msrb.mxu0 %v1467_v6  ;;  %1814 = vmatpush.msra.mxu3 %v1516_v7  ;;  %v1565_v4 = vld [vmem:[%s4670_s16 + $0x570] sm:$0xff]  ;;  %v1504_v7 = vld [vmem:[%s4670_s16 + $0x388] sm:$0xff] }
 0x7b7   :  { %1690 = vmatmul.f32.vlgmr.msra.gmra.mxu2 %v1360_v10  ;;  %1793 = vmatpush.msra.mxu1 %v1498_v21  ;;  %v1533_v6 = vld [vmem:[%s4670_s16 + $0x470] sm:$0xff]  ;;  %v1564_v8 = vld [vmem:[%s4670_s16 + $0x568] sm:$0xff]  ;;  %v1471_v21 = vld [vmem:[%s4670_s16 + $0x280] sm:$0xff] }
 0x7b8   :  { %1736 = vmatmul.f32.vlgmr.msrb.gmra.mxu3 %v1362_v13  ;;  %1747 = vmatpush.msrb.mxu0 %v1466_v11  ;;  %v1532_v10 = vld [vmem:[%s4670_s16 + $0x468] sm:$0xff]  ;;  %v1503_v11 = vld [vmem:[%s4670_s16 + $0x380] sm:$0xff]  ;;  %v1550_v13 = vld [vmem:[%s4670_s16 + $0x4f8] sm:$0xff] }
 0x7b9   :  { %1794 = vmatpush.msra.mxu1 %v1497_v14  ;;  %1769 = vmatpush.msrb.mxu2 %v1483_v15  ;;  %v1563_v14 = vld [vmem:[%s4670_s16 + $0x560] sm:$0xff] }
 0x7ba   :  { %1748 = vmatpush.msrb.mxu0 %v1465_v17  ;;  %1815 = vmatpush.msra.mxu3 %v1515_v9  ;;  %v1531_v15 = vld [vmem:[%s4670_s16 + $0x460] sm:$0xff]  ;;  %v1582_v17 = vld [vmem:[%s4670_s16 + $0x5f8] sm:$0xff]  ;;  %v1549_v9 = vld [vmem:[%s4670_s16 + $0x4f0] sm:$0xff] }
 0x7bb   :  { %1795 = vmatpush.msra.mxu1 %v1496_v18  ;;  %1770 = vmatpush.msrb.mxu2 %v1482_v20  ;;  %v1562_v18 = vld [vmem:[%s4670_s16 + $0x558] sm:$0xff] }
 0x7bc   :  { %1749 = vmatpush.msrb.mxu0 %v1464_v22  ;;  %1816 = vmatpush.msra.mxu3 %v1514_v3  ;;  %v1530_v20 = vld [vmem:[%s4670_s16 + $0x458] sm:$0xff]  ;;  %v1581_v22 = vld [vmem:[%s4670_s16 + $0x5f0] sm:$0xff]  ;;  %v1548_v3 = vld [vmem:[%s4670_s16 + $0x4e8] sm:$0xff] }
 0x7bd   :  { %1796 = vmatpush.msra.mxu1 %v1495_v24  ;;  %1771 = vmatpush.msrb.mxu2 %v1481_v25  ;;  %v1561_v24 = vld [vmem:[%s4670_s16 + $0x550] sm:$0xff] }
 0x7be   :  { %1750 = vmatpush.msrb.mxu0 %v1463_v26  ;;  %1817 = vmatpush.msra.mxu3 %v1513_v27  ;;  %v1529_v25 = vld [vmem:[%s4670_s16 + $0x450] sm:$0xff]  ;;  %v1580_v26 = vld [vmem:[%s4670_s16 + $0x5e8] sm:$0xff]  ;;  %v1547_v27 = vld [vmem:[%s4670_s16 + $0x4e0] sm:$0xff] }
 0x7bf   :  { %1797 = vmatpush.msra.mxu1 %v1494_v28  ;;  %1772 = vmatpush.msrb.mxu2 %v1480_v29  ;;  %v1560_v28 = vld [vmem:[%s4670_s16 + $0x548] sm:$0xff] }
 0x7c0   :  { %1751 = vmatpush.msrb.mxu0 %v1462_v30  ;;  %1818 = vmatpush.msra.mxu3 %v1512_v33  ;;  %v1528_v29 = vld [vmem:[%s4670_s16 + $0x448] sm:$0xff]  ;;  %v1579_v30 = vld [vmem:[%s4670_s16 + $0x5e0] sm:$0xff]  ;;  %v1546_v33 = vld [vmem:[%s4670_s16 + $0x4d8] sm:$0xff] }
 0x7c1   :  { %1798 = vmatpush.msra.mxu1 %v1493_v34  ;;  %1773 = vmatpush.msrb.mxu2 %v1479_v35  ;;  %v1559_v34 = vld [vmem:[%s4670_s16 + $0x540] sm:$0xff] }
 0x7c2   :  { %1752 = vmatpush.msrb.mxu0 %v1461_v36  ;;  %1819 = vmatpush.msra.mxu3 %v1511_v37  ;;  %v1527_v35 = vld [vmem:[%s4670_s16 + $0x440] sm:$0xff]  ;;  %v1578_v36 = vld [vmem:[%s4670_s16 + $0x5d8] sm:$0xff]  ;;  %v1545_v37 = vld [vmem:[%s4670_s16 + $0x4d0] sm:$0xff] }
 0x7c3   :  { %1799 = vmatpush.msra.mxu1 %v1492_v38  ;;  %1774 = vmatpush.msrb.mxu2 %v1478_v41  ;;  %v1558_v38 = vld [vmem:[%s4670_s16 + $0x538] sm:$0xff] }
 0x7c4   :  { %1753 = vmatpush.msrb.mxu0 %v1460_v42  ;;  %1820 = vmatpush.msra.mxu3 %v1510_v44  ;;  %v1526_v41 = vld [vmem:[%s4670_s16 + $0x438] sm:$0xff]  ;;  %v1577_v42 = vld [vmem:[%s4670_s16 + $0x5d0] sm:$0xff]  ;;  %v1544_v44 = vld [vmem:[%s4670_s16 + $0x4c8] sm:$0xff] }
 0x7c5   :  { %1800 = vmatpush.msra.mxu1 %v1491_v45  ;;  %1775 = vmatpush.msrb.mxu2 %v1477_v46  ;;  %v1557_v45 = vld [vmem:[%s4670_s16 + $0x530] sm:$0xff] }
 0x7c6   :  { %1754 = vmatpush.msrb.mxu0 %v1459_v47  ;;  %1821 = vmatpush.msra.mxu3 %v1509_v48  ;;  %v1525_v46 = vld [vmem:[%s4670_s16 + $0x430] sm:$0xff]  ;;  %v1576_v47 = vld [vmem:[%s4670_s16 + $0x5c8] sm:$0xff]  ;;  %v1543_v48 = vld [vmem:[%s4670_s16 + $0x4c0] sm:$0xff] }
 0x7c7   :  { %1801 = vmatpush.msra.mxu1 %v1490_v49  ;;  %1776 = vmatpush.msrb.mxu2 %v1476_v50  ;;  %v1556_v49 = vld [vmem:[%s4670_s16 + $0x528] sm:$0xff] }
 0x7c8   :  { %1755 = vmatpush.msrb.mxu0 %v1458_v51  ;;  %1822 = vmatpush.msra.mxu3 %v1508_v52  ;;  %v1524_v50 = vld [vmem:[%s4670_s16 + $0x428] sm:$0xff]  ;;  %v1575_v51 = vld [vmem:[%s4670_s16 + $0x5c0] sm:$0xff]  ;;  %v1542_v52 = vld [vmem:[%s4670_s16 + $0x4b8] sm:$0xff] }
 0x7c9   :  { %1802 = vmatpush.msra.mxu1 %v1489_v53  ;;  %1777 = vmatpush.msrb.mxu2 %v1475_v54  ;;  %v1555_v53 = vld [vmem:[%s4670_s16 + $0x520] sm:$0xff] }
 0x7ca   :  { %1756 = vmatpush.msrb.mxu0 %v1457_v55  ;;  %1823 = vmatpush.msra.mxu3 %v1507_v56  ;;  %v1523_v54 = vld [vmem:[%s4670_s16 + $0x420] sm:$0xff]  ;;  %v1574_v55 = vld [vmem:[%s4670_s16 + $0x5b8] sm:$0xff]  ;;  %v1541_v56 = vld [vmem:[%s4670_s16 + $0x4b0] sm:$0xff] }
 0x7cb   :  { %1803 = vmatpush.msra.mxu1 %v1488_v12  ;;  %1778 = vmatpush.msrb.mxu2 %v1474_v58  ;;  %v1554_v12 = vld [vmem:[%s4670_s16 + $0x518] sm:$0xff] }
 0x7cc   :  { %1757 = vmatpush.msrb.mxu0 %v1456_v59  ;;  %1824 = vmatpush.msra.mxu3 %v1506_v62  ;;  %v1522_v58 = vld [vmem:[%s4670_s16 + $0x418] sm:$0xff]  ;;  %v1573_v59 = vld [vmem:[%s4670_s16 + $0x5b0] sm:$0xff]  ;;  %v1540_v62 = vld [vmem:[%s4670_s16 + $0x4a8] sm:$0xff] }
 0x7cd   :  { %1804 = vmatpush.msra.mxu1 %v1487_v63  ;;  %1779 = vmatpush.msrb.mxu2 %v1473_v0  ;;  %v1553_v63 = vld [vmem:[%s4670_s16 + $0x510] sm:$0xff] }
 0x7ce   :  { %1758 = vmatpush.msrb.mxu0 %v1455_v16  ;;  %1825 = vmatpush.msra.mxu3 %v1505_v19  ;;  %v1521_v0 = vld [vmem:[%s4670_s16 + $0x410] sm:$0xff]  ;;  %v1572_v16 = vld [vmem:[%s4670_s16 + $0x5a8] sm:$0xff] }
 0x7cf   :  { %1881 = vmatpush.msrb.mxu1 %v1566_v1  ;;  %1780 = vmatpush.msrb.mxu2 %v1472_v5  ;;  %v1539_v1 = vld [vmem:[%s4670_s16 + $0x4a0] sm:$0xff]  ;;  %v1520_v19 = vld [vmem:[%s4670_s16 + $0x408] sm:$0xff]  ;;  %v1538_v5 = vld [vmem:[%s4670_s16 + $0x498] sm:$0xff] }
 0x7d0   :  { %1835 = vmatpush.msra.mxu0 %v1534_v2  ;;  %1826 = vmatpush.msra.mxu3 %v1504_v7  ;;  %v1552_v2 = vld [vmem:[%s4670_s16 + $0x508] sm:$0xff]  ;;  %v1519_v7 = vld [vmem:[%s4670_s16 + $0x400] sm:$0xff] }
 0x7d1   :  { %1882 = vmatpush.msrb.mxu1 %v1565_v4  ;;  %1781 = vmatpush.msrb.mxu2 %v1471_v21  ;;  %v1571_v4 = vld [vmem:[%s4670_s16 + $0x5a0] sm:$0xff]  ;;  %v1537_v21 = vld [vmem:[%s4670_s16 + $0x490] sm:$0xff] }
 0x7d2   :  { %1836 = vmatpush.msra.mxu0 %v1533_v6  ;;  %1827 = vmatpush.msra.mxu3 %v1503_v11  ;;  %v1551_v6 = vld [vmem:[%s4670_s16 + $0x500] sm:$0xff]  ;;  %v1569_v11 = vld [vmem:[%s4670_s16 + $0x590] sm:$0xff] }
 0x7d3   :  { %1883 = vmatpush.msrb.mxu1 %v1564_v8  ;;  %1858 = vmatpush.msra.mxu2 %v1550_v13  ;;  %v1570_v8 = vld [vmem:[%s4670_s16 + $0x598] sm:$0xff] }
 0x7d4   :  { %1837 = vmatpush.msra.mxu0 %v1532_v10  ;;  %1904 = vmatpush.msrb.mxu3 %v1582_v17 }
 0x7d5   :  { %1884 = vmatpush.msrb.mxu1 %v1563_v14  ;;  %1859 = vmatpush.msra.mxu2 %v1549_v9  ;;  %v1568_v9 = vld [vmem:[%s4670_s16 + $0x588] sm:$0xff] }
 0x7d6   :  { %1838 = vmatpush.msra.mxu0 %v1531_v15  ;;  %1905 = vmatpush.msrb.mxu3 %v1581_v22  ;;  %v1536_v15 = vld [vmem:[%s4670_s16 + $0x488] sm:$0xff] }
 0x7d7   :  { %1885 = vmatpush.msrb.mxu1 %v1562_v18  ;;  %1860 = vmatpush.msra.mxu2 %v1548_v3  ;;  %v1567_v3 = vld [vmem:[%s4670_s16 + $0x580] sm:$0xff] }
 0x7d8   :  { %1839 = vmatpush.msra.mxu0 %v1530_v20  ;;  %1906 = vmatpush.msrb.mxu3 %v1580_v26  ;;  %v1535_v20 = vld [vmem:[%s4670_s16 + $0x480] sm:$0xff] }
 0x7d9   :  { %1886 = vmatpush.msrb.mxu1 %v1561_v24  ;;  %1861 = vmatpush.msra.mxu2 %v1547_v27  ;;  %v957_v24 = vperm.slane %v4772_v32, 4 }
 0x7da   :  { %1840 = vmatpush.msra.mxu0 %v1529_v25  ;;  %1907 = vmatpush.msrb.mxu3 %v1579_v30  ;;  %v959_v25 = vperm.slane %v4772_v32, 6 }
 0x7db   :  { %1887 = vmatpush.msrb.mxu1 %v1560_v28  ;;  %1862 = vmatpush.msra.mxu2 %v1546_v33 }
 0x7dc   :  { %1841 = vmatpush.msra.mxu0 %v1528_v29  ;;  %1908 = vmatpush.msrb.mxu3 %v1578_v36 }
 0x7dd   :  { %1888 = vmatpush.msrb.mxu1 %v1559_v34  ;;  %1863 = vmatpush.msra.mxu2 %v1545_v37  ;;  %v958_v37 = vperm.slane %v4772_v32, 5 }
 0x7de   :  { %1842 = vmatpush.msra.mxu0 %v1527_v35  ;;  %1909 = vmatpush.msrb.mxu3 %v1577_v42  ;;  %v1597_v42 = vld [vmem:[%s4670_s16 + $0x670] sm:$0xff] }
 0x7df   :  { %1889 = vmatpush.msrb.mxu1 %v1558_v38  ;;  %1864 = vmatpush.msra.mxu2 %v1544_v44 }
 0x7e0   :  { %1843 = vmatpush.msra.mxu0 %v1526_v41  ;;  %1910 = vmatpush.msrb.mxu3 %v1576_v47  ;;  %v960_v41 = vperm.slane %v4772_v32, 7  ;;  %v1628_v32 = vld [vmem:[%s4670_s16 + $0x768] sm:$0xff] }
 0x7e1   :  { %1890 = vmatpush.msrb.mxu1 %v1557_v45  ;;  %1865 = vmatpush.msra.mxu2 %v1543_v48  ;;  %v1629_v45 = vld [vmem:[%s4670_s16 + $0x770] sm:$0xff]  ;;  %v1596_v48 = vld [vmem:[%s4670_s16 + $0x668] sm:$0xff] }
 0x7e2   :  { %1844 = vmatpush.msra.mxu0 %v1525_v46  ;;  %1911 = vmatpush.msrb.mxu3 %v1575_v51 }
 0x7e3   :  { %1891 = vmatpush.msrb.mxu1 %v1556_v49  ;;  %1866 = vmatpush.msra.mxu2 %v1542_v52 }
 0x7e4   :  { %1845 = vmatpush.msra.mxu0 %v1524_v50  ;;  %1912 = vmatpush.msrb.mxu3 %v1574_v55 }
 0x7e5   :  { %1892 = vmatpush.msrb.mxu1 %v1555_v53  ;;  %1867 = vmatpush.msra.mxu2 %v1541_v56 }
 0x7e6   :  { %1846 = vmatpush.msra.mxu0 %v1523_v54  ;;  %1913 = vmatpush.msrb.mxu3 %v1573_v59  ;;  %v1595_v54 = vld [vmem:[%s4670_s16 + $0x660] sm:$0xff]  ;;  %v4953_v59 = vld [vmem:[%s4747_s20 + $0x8] sm:$0xff]  ;;  %s5056_s20 = sld [smem:[%s5749_s0 + %s4347_s17]]  }
 0x7e7   :  { %1893 = vmatpush.msrb.mxu1 %v1554_v12  ;;  %1868 = vmatpush.msra.mxu2 %v1540_v62  ;;  %v1614_v12 = vld [vmem:[%s4670_s16 + $0x6f8] sm:$0xff]  ;;  %s5346_s17 = sld [smem:[%s5749_s0 + %s4336_s9]]  }
 0x7e8   :  { %1847 = vmatpush.msra.mxu0 %v1522_v58  ;;  %1914 = vmatpush.msrb.mxu3 %v1572_v16  ;;  %v1627_v58 = vld [vmem:[%s4670_s16 + $0x760] sm:$0xff]  ;;  %v1646_v62 = vld [vmem:[%s4670_s16 + $0x7f8] sm:$0xff] }
 0x7e9   :  { %1894 = vmatpush.msrb.mxu1 %v1553_v63  ;;  %1869 = vmatpush.msra.mxu2 %v1539_v1  ;;  %v1594_v16 = vld [vmem:[%s4670_s16 + $0x658] sm:$0xff]  ;;  %v1613_v1 = vld [vmem:[%s4670_s16 + $0x6f0] sm:$0xff] }
 0x7ea   :  { %1848 = vmatpush.msra.mxu0 %v1521_v0  ;;  %1915 = vmatpush.msrb.mxu3 %v1571_v4 }
 0x7eb   :  { %1895 = vmatpush.msrb.mxu1 %v1552_v2  ;;  %1870 = vmatpush.msra.mxu2 %v1538_v5  ;;  %v1626_v2 = vld [vmem:[%s4670_s16 + $0x758] sm:$0xff]  ;;  %v1645_v5 = vld [vmem:[%s4670_s16 + $0x7f0] sm:$0xff] }
 0x7ec   :  { %1849 = vmatpush.msra.mxu0 %v1520_v19  ;;  %v1011_v10 = vpop.f32.mrf.mxu0  ;;  %1916 = vmatpush.msrb.mxu3 %v1570_v8  ;;  %v961_v19 = vperm.slane %v4953_v59, 0 }
 0x7ed   :  { %1896 = vmatpush.msrb.mxu1 %v1551_v6  ;;  %v1012_v13 = vadd.f32 %v1011_v10, %v953_v39  ;;  %v1057_v14 = vpop.f32.mrf.mxu1  ;;  %1871 = vmatpush.msra.mxu2 %v1537_v21  ;;  %v963_v6 = vperm.slane %v4953_v59, 2  ;;  %v1612_v10 = vld [vmem:[%s4670_s16 + $0x6e8] sm:$0xff] }
 0x7ee   :  { %1850 = vmatpush.msra.mxu0 %v1519_v7  ;;  %v1058_v17 = vadd.f32 %v1057_v14, %v955_v43  ;;  %1917 = vmatpush.msrb.mxu3 %v1569_v11  ;;  %v1593_v7 = vld [vmem:[%s4670_s16 + $0x650] sm:$0xff] }
 0x7ef   :  { %v1375_v18 = vmax.f32 %v1012_v13, 0.0  ;;  %1872 = vmatpush.msra.mxu2 %v1536_v15  ;;  %v1625_v11 = vld [vmem:[%s4670_s16 + $0x750] sm:$0xff]  ;;  %v1644_v15 = vld [vmem:[%s4670_s16 + $0x7e8] sm:$0xff] }
 0x7f0   :  { %v1377_v22 = vmax.f32 %v1058_v17, 0.0  ;;  %1918 = vmatpush.msrb.mxu3 %v1568_v9  ;;  %v1592_v17 = vld [vmem:[%s4670_s16 + $0x648] sm:$0xff] }
 0x7f1   :  { %1670 = vmatmul.f32.gmra.mxu0 %v1375_v18  ;;  %1873 = vmatpush.msra.mxu2 %v1535_v20  ;;  %v1611_v20 = vld [vmem:[%s4670_s16 + $0x6e0] sm:$0xff] }
 0x7f2   :  { %1716 = vmatmul.f32.gmra.mxu1 %v1377_v22  ;;  %v1034_v39 = vpop.f32.mrf.mxu2  ;;  %1919 = vmatpush.msrb.mxu3 %v1567_v3  ;;  %v1624_v22 = vld [vmem:[%s4670_s16 + $0x748] sm:$0xff] }
 0x7f3   :  { %v1035_v43 = vadd.f32 %v1034_v39, %v954_v57  ;;  %v1080_v26 = vpop.f32.mrf.mxu3  ;;  %v1598_v57 = vld [vmem:[%s4670_s16 + $0x678] sm:$0xff]  ;;  %v1643_v39 = vld [vmem:[%s4670_s16 + $0x7e0] sm:$0xff] }
 0x7f4   :  { %v1081_v27 = vadd.f32 %v1080_v26, %v956_v61  ;;  %v1100_v28 = vpop.f32.mrf.mxu0  ;;  %v1630_v61 = vld [vmem:[%s4670_s16 + $0x778] sm:$0xff]  ;;  %v962_v26 = vperm.slane %v4953_v59, 1 }
 0x7f5   :  { %v1101_v29 = vadd.f32 %v1100_v28, %v957_v24  ;;  %v1146_v30 = vpop.f32.mrf.mxu1  ;;  %v1376_v33 = vmax.f32 %v1035_v43, 0.0  ;;  %v1591_v43 = vld [vmem:[%s4670_s16 + $0x640] sm:$0xff]  ;;  %v1610_v28 = vld [vmem:[%s4670_s16 + $0x6d8] sm:$0xff] }
 0x7f6   :  { %v1147_v34 = vadd.f32 %v1146_v30, %v959_v25  ;;  %v1378_v35 = vmax.f32 %v1081_v27, 0.0  ;;  %v964_v30 = vperm.slane %v4953_v59, 3 }
 0x7f7   :  { %v1363_v36 = vmax.f32 %v1101_v29, 0.0  ;;  %1693 = vmatmul.f32.gmra.mxu2 %v1376_v33  ;;  %v1623_v29 = vld [vmem:[%s4670_s16 + $0x740] sm:$0xff] }
 0x7f8   :  { %v1365_v38 = vmax.f32 %v1147_v34, 0.0  ;;  %1739 = vmatmul.f32.gmra.mxu3 %v1378_v35  ;;  %v1642_v34 = vld [vmem:[%s4670_s16 + $0x7d8] sm:$0xff] }
 0x7f9   :  { %1759 = vmatmul.f32.vlgmr.msrb.gmra.mxu0 %v1363_v36  ;;  %v1590_v36 = vld [vmem:[%s4670_s16 + $0x638] sm:$0xff] }
 0x7fa   :  { %1805 = vmatmul.f32.vlgmr.msra.gmra.mxu1 %v1365_v38  ;;  %v1123_v44 = vpop.f32.mrf.mxu2  ;;  %1927 = vmatpush.msrb.mxu0 %v1598_v57  ;;  %v1609_v38 = vld [vmem:[%s4670_s16 + $0x6d0] sm:$0xff] }
 0x7fb   :  { %v1124_v46 = vadd.f32 %v1123_v44, %v958_v37  ;;  %v1169_v47 = vpop.f32.mrf.mxu3  ;;  %1973 = vmatpush.msra.mxu1 %v1630_v61 }
 0x7fc   :  { %v1170_v49 = vadd.f32 %v1169_v47, %v960_v41  ;;  %v1103_v50 = vpop.f32.mrf.mxu0  ;;  %1928 = vmatpush.msrb.mxu0 %v1597_v42  ;;  %v1641_v42 = vld [vmem:[%s4670_s16 + $0x7d0] sm:$0xff]  ;;  %v1608_v47 = vld [vmem:[%s4670_s16 + $0x6c8] sm:$0xff] }
 0x7fd   :  { %v1364_v51 = vmax.f32 %v1124_v46, 0.0  ;;  %v1104_v52 = vadd.f32 %v1103_v50, %v957_v24  ;;  %v1149_v53 = vpop.f32.mrf.mxu1  ;;  %1974 = vmatpush.msra.mxu1 %v1629_v45  ;;  %v1589_v45 = vld [vmem:[%s4670_s16 + $0x630] sm:$0xff]  ;;  %v1640_v50 = vld [vmem:[%s4670_s16 + $0x7c8] sm:$0xff] }
 0x7fe   :  { %v1366_v55 = vmax.f32 %v1170_v49, 0.0  ;;  %v1150_v56 = vadd.f32 %v1149_v53, %v959_v25  ;;  %1929 = vmatpush.msrb.mxu0 %v1596_v48  ;;  %v1621_v48 = vld [vmem:[%s4670_s16 + $0x730] sm:$0xff]  ;;  %v1607_v53 = vld [vmem:[%s4670_s16 + $0x6c0] sm:$0xff] }
 0x7ff   :  { %1975 = vmatpush.msra.mxu1 %v1628_v32  ;;  %1782 = vmatmul.f32.vlgmr.msrb.gmra.mxu2 %v1364_v51  ;;  %v1379_v63 = vmax.f32 %v1104_v52, 0.0  ;;  %v1588_v32 = vld [vmem:[%s4670_s16 + $0x628] sm:$0xff] }
 0x800   :  { %1828 = vmatmul.f32.vlgmr.msra.gmra.mxu3 %v1366_v55  ;;  %1930 = vmatpush.msrb.mxu0 %v1595_v54  ;;  %v1381_v0 = vmax.f32 %v1150_v56, 0.0  ;;  %v1620_v54 = vld [vmem:[%s4670_s16 + $0x728] sm:$0xff]  ;;  %v1639_v56 = vld [vmem:[%s4670_s16 + $0x7c0] sm:$0xff] }
 0x801   :  { %1950 = vmatpush.msrb.mxu2 %v1614_v12  ;;  %1976 = vmatpush.msra.mxu1 %v1627_v58  ;;  %v1587_v12 = vld [vmem:[%s4670_s16 + $0x620] sm:$0xff]  ;;  %v1606_v58 = vld [vmem:[%s4670_s16 + $0x6b8] sm:$0xff] }
 0x802   :  { %1996 = vmatpush.msra.mxu3 %v1646_v62  ;;  %1762 = vmatmul.f32.gmra.mxu0 %v1379_v63  ;;  %v1126_v4 = vpop.f32.mrf.mxu2  ;;  %v1619_v62 = vld [vmem:[%s4670_s16 + $0x720] sm:$0xff] }
 0x803   :  { %1808 = vmatmul.f32.gmra.mxu1 %v1381_v0  ;;  %v1127_v8 = vadd.f32 %v1126_v4, %v958_v37  ;;  %v1172_v21 = vpop.f32.mrf.mxu3  ;;  %1931 = vmatpush.msrb.mxu0 %v1594_v16  ;;  %v1638_v16 = vld [vmem:[%s4670_s16 + $0x7b8] sm:$0xff]  ;;  %v965_v4 = vperm.slane %v4953_v59, 4 }
 0x804   :  { %v1173_v13 = vadd.f32 %v1172_v21, %v960_v41  ;;  %1951 = vmatpush.msrb.mxu2 %v1613_v1  ;;  %1977 = vmatpush.msra.mxu1 %v1626_v2  ;;  %v1192_v14 = vpop.f32.mrf.mxu0  ;;  %v1622_v41 = vld [vmem:[%s4670_s16 + $0x738] sm:$0xff]  ;;  %v967_v21 = vperm.slane %v4953_v59, 6 }
 0x805   :  { %1997 = vmatpush.msra.mxu3 %v1645_v5  ;;  %v1193_v9 = vadd.f32 %v1192_v14, %v961_v19  ;;  %v1238_v18 = vpop.f32.mrf.mxu1  ;;  %1932 = vmatpush.msrb.mxu0 %v1593_v7  ;;  %v1380_v3 = vmax.f32 %v1127_v8, 0.0  ;;  %v1605_v7 = vld [vmem:[%s4670_s16 + $0x6b0] sm:$0xff]  ;;  %v1618_v8 = vld [vmem:[%s4670_s16 + $0x718] sm:$0xff] }
 0x806   :  { %v1239_v24 = vadd.f32 %v1238_v18, %v963_v6  ;;  %1952 = vmatpush.msrb.mxu2 %v1612_v10  ;;  %1978 = vmatpush.msra.mxu1 %v1625_v11  ;;  %v1382_v25 = vmax.f32 %v1173_v13, 0.0  ;;  %v1637_v13 = vld [vmem:[%s4670_s16 + $0x7b0] sm:$0xff]  ;;  %v1636_v18 = vld [vmem:[%s4670_s16 + $0x7a8] sm:$0xff] }
 0x807   :  { %1998 = vmatpush.msra.mxu3 %v1644_v15  ;;  %1933 = vmatpush.msrb.mxu0 %v1592_v17  ;;  %v1367_v27 = vmax.f32 %v1193_v9, 0.0  ;;  %v1585_v14 = vld [vmem:[%s4670_s16 + $0x610] sm:$0xff]  ;;  %v1604_v15 = vld [vmem:[%s4670_s16 + $0x6a8] sm:$0xff] }
 0x808   :  { %1953 = vmatpush.msrb.mxu2 %v1611_v20  ;;  %1979 = vmatpush.msra.mxu1 %v1624_v22  ;;  %v1369_v33 = vmax.f32 %v1239_v24, 0.0  ;;  %v1617_v17 = vld [vmem:[%s4670_s16 + $0x710] sm:$0xff]  ;;  %v1584_v20 = vld [vmem:[%s4670_s16 + $0x608] sm:$0xff] }
 0x809   :  { %1999 = vmatpush.msra.mxu3 %v1643_v39  ;;  %1785 = vmatmul.f32.gmra.mxu2 %v1380_v3  ;;  %v1603_v3 = vld [vmem:[%s4670_s16 + $0x6a0] sm:$0xff]  ;;  %v1616_v24 = vld [vmem:[%s4670_s16 + $0x708] sm:$0xff] }
 0x80a   :  { %1831 = vmatmul.f32.gmra.mxu3 %v1382_v25  ;;  %1934 = vmatpush.msrb.mxu0 %v1591_v43  ;;  %v1215_v35 = vpop.f32.mrf.mxu2  ;;  %v1635_v25 = vld [vmem:[%s4670_s16 + $0x7a0] sm:$0xff] }
 0x80b   :  { %1954 = vmatpush.msrb.mxu2 %v1610_v28  ;;  %1980 = vmatpush.msra.mxu1 %v1623_v29  ;;  %v1216_v37 = vadd.f32 %v1215_v35, %v962_v26  ;;  %v1261_v57 = vpop.f32.mrf.mxu3  ;;  %v1583_v28 = vld [vmem:[%s4670_s16 + $0x600] sm:$0xff]  ;;  %v968_v29 = vperm.slane %v4953_v59, 7 }
 0x80c   :  { %2000 = vmatpush.msra.mxu3 %v1642_v34  ;;  %1851 = vmatmul.f32.vlgmr.msra.gmra.mxu0 %v1367_v27  ;;  %v1262_v61 = vadd.f32 %v1261_v57, %v964_v30  ;;  %v1195_v44 = vpop.f32.mrf.mxu0  ;;  %v1602_v34 = vld [vmem:[%s4670_s16 + $0x698] sm:$0xff]  ;;  %v1615_v35 = vld [vmem:[%s4670_s16 + $0x700] sm:$0xff] }
 0x80d   :  { %1897 = vmatmul.f32.vlgmr.msrb.gmra.mxu1 %v1369_v33  ;;  %1935 = vmatpush.msrb.mxu0 %v1590_v36  ;;  %v1241_v46 = vpop.f32.mrf.mxu1  ;;  %v1196_v49 = vadd.f32 %v1195_v44, %v961_v19  ;;  %v1368_v51 = vmax.f32 %v1216_v37, 0.0  ;;  %v1586_v19 = vld [vmem:[%s4670_s16 + $0x618] sm:$0xff] }
 0x80e   :  { %1955 = vmatpush.msrb.mxu2 %v1609_v38  ;;  %1981 = vmatpush.msra.mxu1 %v1622_v41  ;;  %v1242_v52 = vadd.f32 %v1241_v46, %v963_v6  ;;  %v1370_v55 = vmax.f32 %v1262_v61, 0.0  ;;  %v1634_v37 = vld [vmem:[%s4670_s16 + $0x798] sm:$0xff]  ;;  %v1601_v41 = vld [vmem:[%s4670_s16 + $0x690] sm:$0xff] }
 0x80f   :  { %2001 = vmatpush.msra.mxu3 %v1641_v42  ;;  %1936 = vmatpush.msrb.mxu0 %v1589_v45  ;;  %v1383_v63 = vmax.f32 %v1196_v49, 0.0  ;;  %v1633_v42 = vld [vmem:[%s4670_s16 + $0x790] sm:$0xff]  ;;  %v1600_v45 = vld [vmem:[%s4670_s16 + $0x688] sm:$0xff]  ;;  %v1599_v49 = vld [vmem:[%s4670_s16 + $0x680] sm:$0xff] }
 0x810   :  { %1956 = vmatpush.msrb.mxu2 %v1608_v47  ;;  %1982 = vmatpush.msra.mxu1 %v1621_v48  ;;  %v1385_v1 = vmax.f32 %v1242_v52, 0.0  ;;  %v1632_v47 = vld [vmem:[%s4670_s16 + $0x788] sm:$0xff] }
 0x811   :  { %2002 = vmatpush.msra.mxu3 %v1640_v50  ;;  %1937 = vmatpush.msrb.mxu0 %v1588_v32  ;;  %v1631_v32 = vld [vmem:[%s4670_s16 + $0x780] sm:$0xff]  ;;  %s5051_s16 = sld [smem:[%s5749_s0 + %s4346_s13]]  }
 0x812   :  { %1957 = vmatpush.msrb.mxu2 %v1607_v53  ;;  %1983 = vmatpush.msra.mxu1 %v1620_v54  ;;  %v1218_v0 = vpop.f32.mrf.mxu2 }
 0x813   :  { %2003 = vmatpush.msra.mxu3 %v1639_v56  ;;  %1874 = vmatmul.f32.vlgmr.msra.gmra.mxu2 %v1368_v51  ;;  %v1264_v2 = vpop.f32.mrf.mxu3  ;;  %v1219_v6 = vadd.f32 %v1218_v0, %v962_v26  ;;  %v966_v26 = vperm.slane %v4953_v59, 5 }
 0x814   :  { %1920 = vmatmul.f32.vlgmr.msrb.gmra.mxu3 %v1370_v55  ;;  %1938 = vmatpush.msrb.mxu0 %v1587_v12  ;;  %v1284_v5 = vpop.f32.mrf.mxu0  ;;  %v1265_v11 = vadd.f32 %v1264_v2, %v964_v30 }
 0x815   :  { %1958 = vmatpush.msrb.mxu2 %v1606_v58  ;;  %1984 = vmatpush.msra.mxu1 %v1619_v62  ;;  %v1330_v10 = vpop.f32.mrf.mxu1  ;;  %v1285_v9 = vadd.f32 %v1284_v5, %v965_v4  ;;  %v1384_v39 = vmax.f32 %v1219_v6, 0.0  ;;  %v4225_v5 = vld [vmem:[%s4805_s24] ss:$0 sm:$0xff]  ;;  %s4358_s24 = smov 28  }
 0x816   :  { %2004 = vmatpush.msra.mxu3 %v1638_v16  ;;  %1854 = vmatmul.f32.gmra.mxu0 %v1383_v63  ;;  %v1331_v22 = vadd.f32 %v1330_v10, %v967_v21  ;;  %v1386_v43 = vmax.f32 %v1265_v11, 0.0  ;;  %s4040_s11 = sld [smem:[%s5749_s0 + %s4358_s24]]  }
 0x817   :  { %1900 = vmatmul.f32.gmra.mxu1 %v1385_v1  ;;  %1939 = vmatpush.msrb.mxu0 %v1586_v19  ;;  %v1371_v33 = vmax.f32 %v1285_v9, 0.0 }
 0x818   :  { %1959 = vmatpush.msrb.mxu2 %v1605_v7  ;;  %1985 = vmatpush.msra.mxu1 %v1618_v8  ;;  %v1373_v36 = vmax.f32 %v1331_v22, 0.0 }
 0x819   :  { %2005 = vmatpush.msra.mxu3 %v1637_v13  ;;  %1940 = vmatpush.msrb.mxu0 %v1585_v14 }
 0x81a   :  { %1960 = vmatpush.msrb.mxu2 %v1604_v15  ;;  %1986 = vmatpush.msra.mxu1 %v1617_v17  ;;  %v1307_v27 = vpop.f32.mrf.mxu2 }
 0x81b   :  { %2006 = vmatpush.msra.mxu3 %v1636_v18  ;;  %1941 = vmatpush.msrb.mxu0 %v1584_v20  ;;  %v1353_v30 = vpop.f32.mrf.mxu3  ;;  %v1308_v38 = vadd.f32 %v1307_v27, %v966_v26 }
 0x81c   :  { %1961 = vmatpush.msrb.mxu2 %v1603_v3  ;;  %1987 = vmatpush.msra.mxu1 %v1616_v24  ;;  %v1287_v57 = vpop.f32.mrf.mxu0  ;;  %v1354_v61 = vadd.f32 %v1353_v30, %v968_v29 }
 0x81d   :  { %2007 = vmatpush.msra.mxu3 %v1635_v25  ;;  %1877 = vmatmul.f32.gmra.mxu2 %v1384_v39  ;;  %v1333_v59 = vpop.f32.mrf.mxu1  ;;  %v1288_v44 = vadd.f32 %v1287_v57, %v965_v4  ;;  %v1372_v48 = vmax.f32 %v1308_v38, 0.0 }
 0x81e   :  { %1923 = vmatmul.f32.gmra.mxu3 %v1386_v43  ;;  %1942 = vmatpush.msrb.mxu0 %v1583_v28  ;;  %v1334_v46 = vadd.f32 %v1333_v59, %v967_v21  ;;  %v1374_v50 = vmax.f32 %v1354_v61, 0.0 }
 0x81f   :  { %1962 = vmatpush.msrb.mxu2 %v1602_v34  ;;  %1988 = vmatpush.msra.mxu1 %v1615_v35  ;;  %v1387_v52 = vmax.f32 %v1288_v44, 0.0 }
 0x820   :  { %2008 = vmatpush.msra.mxu3 %v1634_v37  ;;  %1943 = vmatmul.f32.vlgmr.msrb.gmra.mxu0 %v1371_v33  ;;  %v1389_v54 = vmax.f32 %v1334_v46, 0.0 }
 0x821   :  { %1989 = vmatmul.f32.vlgmr.msra.gmra.mxu1 %v1373_v36  ;;  %1963 = vmatpush.msrb.mxu2 %v1601_v41 }
 0x822   :  { %2009 = vmatpush.msra.mxu3 %v1633_v42  ;;  %v1310_v51 = vpop.f32.mrf.mxu2 }
 0x823   :  { %1964 = vmatpush.msrb.mxu2 %v1600_v45  ;;  %v1356_v53 = vpop.f32.mrf.mxu3  ;;  %v1311_v55 = vadd.f32 %v1310_v51, %v966_v26 }
 0x824   :  { %2010 = vmatpush.msra.mxu3 %v1632_v47  ;;  %v1357_v56 = vadd.f32 %v1356_v53, %v968_v29 }
 0x825   :  { %1965 = vmatpush.msrb.mxu2 %v1599_v49  ;;  %v1388_v12 = vmax.f32 %v1311_v55, 0.0 }
 0x826   :  { %2011 = vmatpush.msra.mxu3 %v1631_v32  ;;  %1966 = vmatmul.f32.vlgmr.msrb.gmra.mxu2 %v1372_v48  ;;  %v1390_v58 = vmax.f32 %v1357_v56, 0.0 }
 0x827   :  { %2012 = vmatmul.f32.vlgmr.msra.gmra.mxu3 %v1374_v50 }
 0x828   :  { %1946 = vmatmul.f32.gmra.mxu0 %v1387_v52 }
 0x829   :  { %1992 = vmatmul.f32.gmra.mxu1 %v1389_v54 }
 0x82e   :  { %1969 = vmatmul.f32.gmra.mxu2 %v1388_v12  ;;  %v1668_v62 = vpop.f32.mrf.mxu0 }
 0x82f   :  { %2015 = vmatmul.f32.gmra.mxu3 %v1390_v58  ;;  %v1714_v63 = vpop.f32.mrf.mxu1  ;;  %v1669_v7 = vadd.f32 %v4225_v5, %v1668_v62 }
 0x83a   :  { %v1691_v0 = vpop.f32.mrf.mxu2 }
 0x83b   :  { %v1737_v16 = vpop.f32.mrf.mxu3  ;;  %v1692_v21 = vadd.f32 %v1691_v0, %v1669_v7 }
 0x83d   :  { %v1715_v13 = vadd.f32 %v1714_v63, %v1692_v21 }
 0x83f   :  { %v1738_v9 = vadd.f32 %v1737_v16, %v1715_v13 }
 0x86e   :  { %v1671_v1 = vpop.f32.mrf.mxu0 }
 0x86f   :  { %v1717_v2 = vpop.f32.mrf.mxu1  ;;  %v1672_v14 = vadd.f32 %v4225_v5, %v1671_v1 }
 0x876   :  { %v1760_v6 = vpop.f32.mrf.mxu0 }
 0x877   :  { %v1806_v8 = vpop.f32.mrf.mxu1  ;;  %v1761_v20 = vadd.f32 %v1760_v6, %v1738_v9  ;;  %v2078_v9 = vld [vmem:[%s4028_s23 + $0x8] sm:$0xff] }
 0x87a   :  { %v1694_v19 = vpop.f32.mrf.mxu2 }
 0x87b   :  { %v1740_v4 = vpop.f32.mrf.mxu3  ;;  %v1695_v17 = vadd.f32 %v1694_v19, %v1672_v14 }
 0x87d   :  { %v1718_v22 = vadd.f32 %v1717_v2, %v1695_v17  ;;  %v2079_v17 = vld [vmem:[%s4028_s23 + $0x10] sm:$0xff] }
 0x87f   :  { %v1763_v15 = vpop.f32.mrf.mxu0  ;;  %v1741_v25 = vadd.f32 %v1740_v4, %v1718_v22 }
 0x880   :  { %v1809_v18 = vpop.f32.mrf.mxu1 }
 0x881   :  { %v1764_v27 = vadd.f32 %v1763_v15, %v1741_v25 }
 0x882   :  { %v1783_v10 = vpop.f32.mrf.mxu2 }
 0x883   :  { %v1829_v11 = vpop.f32.mrf.mxu3  ;;  %v1784_v39 = vadd.f32 %v1783_v10, %v1761_v20 }
 0x885   :  { %v1807_v26 = vadd.f32 %v1806_v8, %v1784_v39 }
 0x887   :  { %v1830_v29 = vadd.f32 %v1829_v11, %v1807_v26 }
 0x889   :  { %v1852_v43 = vpop.f32.mrf.mxu0 }
 0x88a   :  { %v1898_v28 = vpop.f32.mrf.mxu1  ;;  %v1853_v35 = vadd.f32 %v1852_v43, %v1830_v29 }
 0x88c   :  { %v1786_v3 = vpop.f32.mrf.mxu2 }
 0x88d   :  { %v1832_v24 = vpop.f32.mrf.mxu3  ;;  %v1787_v30 = vadd.f32 %v1786_v3, %v1764_v27 }
 0x88f   :  { %v1810_v36 = vadd.f32 %v1809_v18, %v1787_v30  ;;  %v2077_v18 = vld [vmem:[%s4028_s23] sm:$0xff] }
 0x891   :  { %v1833_v38 = vadd.f32 %v1832_v24, %v1810_v36 }
 0x893   :  { %v1855_v37 = vpop.f32.mrf.mxu0 }
 0x894   :  { %v1901_v41 = vpop.f32.mrf.mxu1  ;;  %v1856_v44 = vadd.f32 %v1855_v37, %v1833_v38  ;;  %v4227_v38 = vld [vmem:[%s5051_s16] ss:$0 sm:$0xff] }
 0x896   :  { %v1875_v33 = vpop.f32.mrf.mxu2 }
 0x897   :  { %v1921_v34 = vpop.f32.mrf.mxu3  ;;  %v1876_v57 = vadd.f32 %v1875_v33, %v1853_v35  ;;  %v4226_v35 = vld [vmem:[%s5040_s12] ss:$0 sm:$0xff]  ;;  %s4359_s12 = smov 30  }
 0x898   :  { %s4042_s15 = sld [smem:[%s5749_s0 + %s4359_s12]]  }
 0x899   :  { %v1899_v59 = vadd.f32 %v1898_v28, %v1876_v57 }
 0x89b   :  { %v1922_v45 = vadd.f32 %v1921_v34, %v1899_v59 }
 0x89d   :  { %v1944_v47 = vpop.f32.mrf.mxu0 }
 0x89e   :  { %v1945_v48 = vadd.f32 %v1944_v47, %v1922_v45  ;;  %v1990_v50 = vpop.f32.mrf.mxu1 }
 0x8a0   :  { %v1878_v61 = vpop.f32.mrf.mxu2 }
 0x8a1   :  { %v1924_v42 = vpop.f32.mrf.mxu3  ;;  %v1879_v46 = vadd.f32 %v1878_v61, %v1856_v44 }
 0x8a3   :  { %v1902_v49 = vadd.f32 %v1901_v41, %v1879_v46 }
 0x8a5   :  { %v1925_v53 = vadd.f32 %v1924_v42, %v1902_v49  ;;  %v1947_v56 = vpop.f32.mrf.mxu0  ;;  %v4228_v49 = vld [vmem:[%s5056_s20] ss:$0 sm:$0xff] }
 0x8a6   :  { %v1993_v16 = vpop.f32.mrf.mxu1 }
 0x8a7   :  { %v1948_v12 = vadd.f32 %v1947_v56, %v1925_v53 }
 0x8a9   :  { %v1967_v32 = vpop.f32.mrf.mxu2 }
 0x8aa   :  { %v1968_v51 = vadd.f32 %v1967_v32, %v1945_v48  ;;  %v2013_v52 = vpop.f32.mrf.mxu3 }
 0x8ac   :  { %v1991_v54 = vadd.f32 %v1990_v50, %v1968_v51 }
 0x8ae   :  { %v2014_v55 = vadd.f32 %v2013_v52, %v1991_v54 }
 0x8b0   :  { %v2019_v58 = vadd.f32 %v2014_v55, %v4588_v40 }
 0x8b1   :  { %v1970_v62 = vpop.f32.mrf.mxu2 }
 0x8b2   :  { %v1971_v63 = vadd.f32 %v1970_v62, %v1948_v12  ;;  %v2023_v0 = vsel %vm181_vm1, %v2019_v58, 0.0  ;;  %v2016_v2 = vpop.f32.mrf.mxu3 }
 0x8b3   :  { %2024 = vadd.xlane.f32.xlu1 %v2023_v0 }
 0x8b4   :  { %v1994_v1 = vadd.f32 %v1993_v16, %v1971_v63 }
 0x8b6   :  { %v2017_v19 = vadd.f32 %v2016_v2, %v1994_v1 }
 0x8b8   :  { %v2020_v4 = vadd.f32 %v2017_v19, %v4635_v23  ;;  %v2080_v23 = vld [vmem:[%s4028_s23 + $0x18] sm:$0xff] }
 0x8b9   :  { %2103 = vmatpush.msra.mxu0 %v2080_v23 }
 0x8ba   :  { %v2026_v5 = vsel %vm181_vm1, %v2020_v4, 0.0 }
 0x8bb   :  { %2027 = vadd.xlane.f32.xlu2 %v2026_v5  ;;  %2104 = vmatpush.msra.mxu0 %v2079_v17 }
 0x8bd   :  { %2105 = vmatpush.msra.mxu0 %v2078_v9 }
 0x8bf   :  { %2106 = vmatpush.msra.mxu0 %v2077_v18 }
 0x926   :  { %v2025_v40 = vpop.xlane.xlu1 %2024 }
 0x927   :  { %v2029_v6 = vmul.f32 %v2025_v40, %v4543_v60 }
 0x929   :  { %v2031_v7 = vsub.f32 %v2019_v58, %v2029_v6 }
 0x92b   :  { %v2033_v8 = vmul.f32 %v2031_v7, %v2031_v7 }
 0x92d   :  { %v2035_v21 = vsel %vm181_vm1, %v2033_v8, 0.0 }
 0x92e   :  { %2036 = vadd.xlane.f32.xlu0 %v2035_v21  ;;  %v2028_v10 = vpop.xlane.xlu2 %2027 }
 0x92f   :  { %v2030_v11 = vmul.f32 %v2028_v10, %v4543_v60 }
 0x931   :  { %v2032_v13 = vsub.f32 %v2020_v4, %v2030_v11 }
 0x933   :  { %v2034_v14 = vmul.f32 %v2032_v13, %v2032_v13 }
 0x935   :  { %v2038_v15 = vsel %vm181_vm1, %v2034_v14, 0.0 }
 0x936   :  { %2039 = vadd.xlane.f32.xlu1 %v2038_v15 }
 0x9a1   :  { %v2037_v20 = vpop.xlane.xlu0 %2036 }
 0x9a2   :  { %v2041_v22 = vmul.f32 %v2037_v20, %v4543_v60 }
 0x9a4   :  { %v2043_v3 = vadd.f32 1e-05, %v2041_v22 }
 0x9a6   :  { %4274 = vrsqrt.f32 %v2043_v3  ;;  %vm2051_vm15 = vweird.f32 %v2043_v3 }
 0x9a9   :  { %v2040_v24 = vpop.xlane.xlu1 %2039 }
 0x9aa   :  { %v2042_v39 = vmul.f32 %v2040_v24, %v4543_v60 }
 0x9ac   :  { %v4275_v25 = vpop.eup %4274  ;;  %v2044_v43 = vadd.f32 1e-05, %v2042_v39 }
 0x9ad   :  { %v2046_v26 = vmul.f32 %v4275_v25, %v2043_v3  ;;  %vm2052_vm14 = vweird.f32 %v4275_v25 }
 0x9ae   :  { %4276 = vrsqrt.f32 %v2044_v43  ;;  %vm2053_vm0 = vmor %vm2051_vm15, %vm2052_vm14  ;;  %vm2061_vm8 = vweird.f32 %v2044_v43 }
 0x9af   :  { %v2047_v27 = vmul.f32 %v4275_v25, %v2046_v26 }
 0x9b1   :  { %v2048_v28 = vmul.f32 0.5, %v2047_v27 }
 0x9b3   :  { %v2049_v29 = vsub.f32 1.5, %v2048_v28 }
 0x9b4   :  { %v4277_v30 = vpop.eup %4276 }
 0x9b5   :  { %v2050_v33 = vmul.f32 %v4275_v25, %v2049_v29  ;;  %v2056_v34 = vmul.f32 %v4277_v30, %v2044_v43  ;;  %vm2062_vm7 = vweird.f32 %v4277_v30 }
 0x9b6   :  { %vm2063_vm9 = vmor %vm2061_vm8, %vm2062_vm7  ;;  %vm4006_vm7 = vcmask 31744  }
 0x9b7   :  { %v2054_v36 = vsel %vm2053_vm0, %v4275_v25, %v2050_v33  ;;  %v2057_v37 = vmul.f32 %v4277_v30, %v2056_v34 }
 0x9b8   :  { %v2065_v57 = vmul.f32 %v2054_v36, %v2031_v7 }
 0x9b9   :  { %v2058_v41 = vmul.f32 0.5, %v2057_v37 }
 0x9ba   :  { %v2070_v59 = vmul.f32 %v4226_v35, %v2065_v57 }
 0x9bb   :  { %v2059_v61 = vsub.f32 1.5, %v2058_v41 }
 0x9bc   :  { %v5066_v42 = vadd.f32 %v4227_v38, %v2070_v59 }
 0x9bd   :  { %v2060_v44 = vmul.f32 %v4277_v30, %v2059_v61 }
 0x9be   :  { %4105 = vmatmul.msk.f32.vlgmr.msra.gmra.mxu0 %vm181_vm1, %v5066_v42 }
 0x9bf   :  { %v2064_v45 = vsel %vm2063_vm9, %v4277_v30, %v2060_v44 }
 0x9c0   :  { %v2066_v46 = vmul.f32 %v2064_v45, %v2032_v13 }
 0x9c2   :  { %v2071_v47 = vmul.f32 %v4226_v35, %v2066_v46 }
 0x9c4   :  { %v5070_v48 = vadd.f32 %v4227_v38, %v2071_v47 }
 0x9c6   :  { %4106 = vmatmul.msk.f32.gmra.mxu0 %vm181_vm1, %v5070_v48 }
 0xa3b   :  { %v2108_v50 = vpop.f32.mrf.mxu0 }
 0xa3c   :  { %v5075_v32 = vadd.f32 %v4228_v49, %v2108_v50 }
 0xa3e   :  { %2183 = vrot.lane.b32.xlu0 %v5075_v32, %s4324_s27  ;;  %2115 = vrot.lane.b32.xlu2 %v5075_v32, %s4330_s3 }
 0xa3f   :  { %2181 = vrot.lane.b32.xlu1 %v5075_v32, %s4326_s29 }
 0xa43   :  { %v2111_v51 = vpop.f32.mrf.mxu0 }
 0xa44   :  { %v5089_v52 = vadd.f32 %v4228_v49, %v2111_v51 }
 0xa46   :  { %2255 = vrot.lane.b32.xlu0 %v5075_v32, %s4327_s30  ;;  %2327 = vrot.lane.b32.xlu2 %v5075_v32, %s4328_s1  ;;  %v4216_v39 = vpack.i.bf16 %v5089_v52, %v5075_v32 }
 0xa47   :  { %2253 = vrot.lane.b32.xlu1 %v5075_v32, %s4329_s2 }
 0xa4e   :  { %2325 = vrot.lane.b32.xlu0 %v5075_v32, %s4325_s28  ;;  %2398 = vrot.lane.b32.xlu2 %v5089_v52, %s4330_s3 }
 0xa4f   :  { %2466 = vrot.lane.b32.xlu1 %v5089_v52, %s4324_s27  ;;  %s4355_s27 = smov 26  }
 0xa56   :  { %2464 = vrot.lane.b32.xlu0 %v5089_v52, %s4326_s29  ;;  %2538 = vrot.lane.b32.xlu2 %v5089_v52, %s4327_s30  ;;  %s4349_s30 = smov 18  }
 0xa57   :  { %2610 = vrot.lane.b32.xlu1 %v5089_v52, %s4328_s1  ;;  %s4030_s3 = sld [smem:[%s5749_s0 + %s4349_s30]]   ;;  %s4356_s1 = smov 27  }
 0xa58   :  { %s5718_s30 = sld [smem:[%s5749_s0 + %s4355_s27]]  }
 0xa5e   :  { %2536 = vrot.lane.b32.xlu0 %v5089_v52, %s4329_s2  ;;  %2608 = vrot.lane.b32.xlu2 %v5089_v52, %s4325_s28 }
 0xa98   :  { %v2116_v53 = vpop.permute.xlu2 %2115 }
 0xa99   :  { %4107 = vmatpush.xpose.msk.msra.mxu2 %vm214_vm2, %v2116_v53 }
 0xa9c   :  { %4108 = vmatmul.msk.f32.vlgmr.msra.gmra.mxu2 %vm214_vm2, %v5075_v32 }
 0xaa0   :  { %v2328_v54 = vpop.permute.xlu2 %2327 }
 0xaa8   :  { %v2399_v12 = vpop.permute.xlu2 %2398 }
 0xab0   :  { %v2184_v55 = vpop.permute.xlu0 %2183  ;;  %v2539_v63 = vpop.permute.xlu2 %2538 }
 0xab1   :  { %v2182_v56 = vpop.permute.xlu1 %2181  ;;  %4110 = vmatpush.xpose.msk.msrb.mxu2 %vm214_vm2, %v2184_v55 }
 0xab4   :  { %4111 = vmatmul.msk.f32.vlgmr.msrb.gmra.mxu2 %vm214_vm2, %v2182_v56 }
 0xab5   :  { %4116 = vmatpush.xpose.msk.msra.mxu2 %vm214_vm2, %v2328_v54 }
 0xab8   :  { %v2256_v58 = vpop.permute.xlu0 %2255  ;;  %v2609_v19 = vpop.permute.xlu2 %2608 }
 0xab9   :  { %v2254_v62 = vpop.permute.xlu1 %2253  ;;  %4113 = vmatpush.xpose.msk.msrb.mxu3 %vm214_vm2, %v2256_v58 }
 0xabc   :  { %4114 = vmatmul.msk.f32.vlgmr.msrb.gmra.mxu3 %vm214_vm2, %v2254_v62 }
 0xabd   :  { %4119 = vmatpush.xpose.msk.msra.mxu3 %vm214_vm2, %v2399_v12 }
 0xac0   :  { %v2326_v0 = vpop.permute.xlu0 %2325 }
 0xac1   :  { %4125 = vmatpush.xpose.msk.msrb.mxu3 %vm214_vm2, %v2539_v63  ;;  %v2467_v16 = vpop.permute.xlu1 %2466  ;;  %4117 = vmatmul.msk.f32.vlgmr.msra.gmra.mxu2 %vm214_vm2, %v2326_v0 }
 0xac2   :  { %4122 = vmatpush.xpose.msk.msrb.mxu2 %vm214_vm2, %v2467_v16 }
 0xac4   :  { %4120 = vmatmul.msk.f32.vlgmr.msra.gmra.mxu3 %vm214_vm2, %v5089_v52 }
 0xac8   :  { %v2465_v1 = vpop.permute.xlu0 %2464 }
 0xac9   :  { %v2611_v2 = vpop.permute.xlu1 %2610  ;;  %4123 = vmatmul.msk.f32.vlgmr.msrb.gmra.mxu2 %vm214_vm2, %v2465_v1 }
 0xaca   :  { %4128 = vmatpush.xpose.msk.msra.mxu2 %vm214_vm2, %v2611_v2 }
 0xad0   :  { %v2537_v4 = vpop.permute.xlu0 %2536 }
 0xad1   :  { %4126 = vmatmul.msk.f32.vlgmr.msrb.gmra.mxu3 %vm214_vm2, %v2537_v4  ;;  %4129 = vmatmul.msk.f32.vlgmr.msra.gmra.mxu2 %vm214_vm2, %v2609_v19 }
 0xb1f   :  { %v2138_v5 = vpop.f32.mrf.mxu2 }
 0xb20   :  { %v2141_v40 = vmul.f32 0.35355338, %v2138_v5 }
 0xb22   :  { %v2142_v6 = vsel %vm4419_vm3, %v2141_v40, -inf }
 0xb23   :  { %v2143_v7 = vsel %vm214_vm2, %v2142_v6, -inf }
 0xb24   :  { %2144 = vmax.xlane.f32.xlu1 %v2143_v7 }
 0xb37   :  { %v2206_v8 = vpop.f32.mrf.mxu2 }
 0xb38   :  { %v2209_v21 = vmul.f32 0.35355338, %v2206_v8 }
 0xb3a   :  { %v2210_v10 = vsel %vm4419_vm3, %v2209_v21, -inf }
 0xb3b   :  { %v2211_v11 = vsel %vm214_vm2, %v2210_v10, -inf }
 0xb3c   :  { %2212 = vmax.xlane.f32.xlu0 %v2211_v11 }
 0xb3f   :  { %v2278_v13 = vpop.f32.mrf.mxu3 }
 0xb40   :  { %v2281_v14 = vmul.f32 0.35355338, %v2278_v13 }
 0xb42   :  { %v2282_v15 = vsel %vm4419_vm3, %v2281_v14, -inf }
 0xb43   :  { %v2283_v23 = vsel %vm214_vm2, %v2282_v15, -inf }
 0xb44   :  { %2284 = vmax.xlane.f32.xlu2 %v2283_v23  ;;  %v2350_v17 = vpop.f32.mrf.mxu2 }
 0xb45   :  { %v2353_v9 = vmul.f32 0.35355338, %v2350_v17 }
 0xb47   :  { %v2354_v18 = vsel %vm4419_vm3, %v2353_v9, -inf  ;;  %v2421_v22 = vpop.f32.mrf.mxu3 }
 0xb48   :  { %v2355_v20 = vsel %vm214_vm2, %v2354_v18, -inf  ;;  %v2424_v30 = vmul.f32 0.35355338, %v2421_v22 }
 0xb49   :  { %2356 = vmax.xlane.f32.xlu1 %v2355_v20 }
 0xb4a   :  { %v2425_v33 = vsel %vm4419_vm3, %v2424_v30, -inf }
 0xb4b   :  { %v2426_v35 = vsel %vm214_vm2, %v2425_v33, -inf }
 0xb4c   :  { %v2489_v3 = vpop.f32.mrf.mxu2 }
 0xb4d   :  { %v2492_v24 = vmul.f32 0.35355338, %v2489_v3 }
 0xb4f   :  { %v5141_v25 = vsel %vm4419_vm3, %v2492_v24, -inf }
 0xb50   :  { %4217 = vrot.lane.b32.xlu0 %v4216_v39, %s4331_s4  ;;  %v2494_v43 = vsel %vm214_vm2, %v5141_v25, -inf  ;;  %s4350_s4 = smov 20  }
 0xb51   :  { %2495 = vmax.xlane.f32.xlu2 %v2494_v43 }
 0xb54   :  { %v2561_v26 = vpop.f32.mrf.mxu3  ;;  %v2633_v34 = vpop.f32.mrf.mxu2 }
 0xb55   :  { %v2564_v27 = vmul.f32 0.35355338, %v2561_v26  ;;  %v2636_v36 = vmul.f32 0.35355338, %v2633_v34 }
 0xb57   :  { %v2565_v28 = vsel %vm4419_vm3, %v2564_v27, -inf  ;;  %v2637_v37 = vsel %vm4419_vm3, %v2636_v36, -inf }
 0xb58   :  { %v2566_v29 = vsel %vm214_vm2, %v2565_v28, -inf  ;;  %v2638_v57 = vsel %vm214_vm2, %v2637_v37, -inf }
 0xb59   :  { %2567 = vmax.xlane.f32.xlu1 %v2566_v29 }
 0xb7a   :  { %2427 = vmax.xlane.f32.xlu0 %v2426_v35 }
 0xb82   :  { %2639 = vmax.xlane.f32.xlu0 %v2638_v57 }
 0xb96   :  { %2294 = vrot.lane.b32.xlu0 %v5075_v32, %s4334_s7 }
 0xb97   :  { %v2145_v38 = vpop.xlane.xlu1 %2144 }
 0xb98   :  { %v2146_v41 = vsub.f32 %v2142_v6, %v2145_v38 }
 0xb9a   :  { %v2147_v59 = vmul.f32 1.442695, %v2146_v41 }
 0xb9c   :  { %4278 = vpow2.f32 %v2147_v59 }
 0xb9e   :  { %2366 = vrot.lane.b32.xlu0 %v5075_v32, %s4332_s5 }
 0xba2   :  { %v5159_v61 = vpop.eup %4278 }
 0xba3   :  { %v2149_v44 = vsel %vm214_vm2, %v5159_v61, 0.0 }
 0xba4   :  { %2150 = vadd.xlane.f32.xlu2 %v2149_v44 }
 0xba6   :  { %2505 = vrot.lane.b32.xlu0 %v5089_v52, %s4323_s26 }
 0xbae   :  { %2649 = vrot.lane.b32.xlu0 %v5089_v52, %s4332_s5  ;;  %s4357_s5 = smov 29  }
 0xbaf   :  { %v2213_v31 = vpop.xlane.xlu0 %2212 }
 0xbb0   :  { %v2214_v45 = vsub.f32 %v2210_v10, %v2213_v31 }
 0xbb2   :  { %v2215_v46 = vmul.f32 1.442695, %v2214_v45 }
 0xbb4   :  { %4280 = vpow2.f32 %v2215_v46 }
 0xbb7   :  { %v2285_v47 = vpop.xlane.xlu2 %2284 }
 0xbb8   :  { %v2286_v49 = vsub.f32 %v2282_v15, %v2285_v47 }
 0xbba   :  { %v5167_v50 = vpop.eup %4280  ;;  %v2287_v51 = vmul.f32 1.442695, %v2286_v49 }
 0xbbb   :  { %v2217_v53 = vsel %vm214_vm2, %v5167_v50, 0.0 }
 0xbbc   :  { %4282 = vpow2.f32 %v2287_v51  ;;  %2218 = vadd.xlane.f32.xlu1 %v2217_v53  ;;  %v2357_v58 = vpop.xlane.xlu1 %2356 }
 0xbbd   :  { %v2358_v0 = vsub.f32 %v2354_v18, %v2357_v58 }
 0xbbf   :  { %v2359_v1 = vmul.f32 1.442695, %v2358_v0 }
 0xbc2   :  { %v4283_v54 = vpop.eup %4282  ;;  %v4218_v55 = vpop.permute.xlu0 %4217 }
 0xbc3   :  { %v4219_v56 = vunpack.i.l.bf16 %v4218_v55  ;;  %v2289_v12 = vsel %vm214_vm2, %v4283_v54, 0.0  ;;  %v4220_v17 = vunpack.i.h.bf16 %v4218_v55 }
 0xbc4   :  { %2290 = vadd.xlane.f32.xlu2 %v2289_v12 }
 0xbc5   :  { %2175 = vmatpush.msrb.mxu1 %v4219_v56 }
 0xbcc   :  { %v2568_v2 = vpop.xlane.xlu1 %2567 }
 0xbcd   :  { %v2569_v40 = vsub.f32 %v2565_v28, %v2568_v2  ;;  %v2684_v2 = vld [vmem:[%s4030_s3 + $0x10] sm:$0xff] }
 0xbcf   :  { %v2570_v8 = vmul.f32 1.442695, %v2569_v40 }
 0xbdc   :  { %2222 = vrot.lane.b32.xlu2 %v5075_v32, %s4323_s26  ;;  %v2496_v32 = vpop.xlane.xlu2 %2495  ;;  %s4348_s26 = smov 19  }
 0xbdd   :  { %v2497_v10 = vsub.f32 %v5141_v25, %v2496_v32  ;;  %s4031_s29 = sld [smem:[%s5749_s0 + %s4348_s26]]  }
 0xbde   :  { %s5506_s26 = sld [smem:[%s5749_s0 + %s4354_s21]]  }
 0xbdf   :  { %v2498_v14 = vmul.f32 1.442695, %v2497_v10 }
 0xbed   :  { %v2428_v62 = vpop.xlane.xlu0 %2427 }
 0xbee   :  { %v2429_v63 = vsub.f32 %v2425_v33, %v2428_v62 }
 0xbf0   :  { %v2430_v16 = vmul.f32 1.442695, %v2429_v63 }
 0xbf2   :  { %4284 = vpow2.f32 %v2430_v16 }
 0xbf3   :  { %4286 = vpow2.f32 %v2359_v1  ;;  %v2685_v1 = vld [vmem:[%s4030_s3 + $0x18] sm:$0xff] }
 0xbf4   :  { %2708 = vmatpush.msra.mxu3 %v2685_v1  ;;  %v2832_v1 = vld [vmem:[%s5239_s14 + $0x1b8] sm:$0xff] }
 0xbf5   :  { %v2640_v19 = vpop.xlane.xlu0 %2639 }
 0xbf6   :  { %v2641_v4 = vsub.f32 %v2637_v37, %v2640_v19  ;;  %v2683_v19 = vld [vmem:[%s4030_s3 + $0x8] sm:$0xff]  ;;  %2709 = vmatpush.msra.mxu3 %v2684_v2  ;;  %v2813_v2 = vld [vmem:[%s5239_s14 + $0x120] sm:$0xff] }
 0xbf8   :  { %v4285_v5 = vpop.eup %4284  ;;  %v2642_v6 = vmul.f32 1.442695, %v2641_v4  ;;  %v2682_v4 = vld [vmem:[%s4030_s3] sm:$0xff]  ;;  %2710 = vmatpush.msra.mxu3 %v2683_v19  ;;  %v2814_v19 = vld [vmem:[%s5239_s14 + $0x128] sm:$0xff] }
 0xbf9   :  { %v2432_v7 = vsel %vm214_vm2, %v4285_v5, 0.0  ;;  %v4287_v21 = vpop.eup %4286 }
 0xbfa   :  { %2433 = vadd.xlane.f32.xlu1 %v2432_v7  ;;  %4288 = vpow2.f32 %v2642_v6  ;;  %v2361_v13 = vsel %vm214_vm2, %v4287_v21, 0.0  ;;  %2711 = vmatpush.msra.mxu3 %v2682_v4  ;;  %v2815_v4 = vld [vmem:[%s5239_s14 + $0x130] sm:$0xff] }
 0xbfb   :  { %4290 = vpow2.f32 %v2570_v8 }
 0xbfc   :  { %4292 = vpow2.f32 %v2498_v14 }
 0xc00   :  { %v4289_v11 = vpop.eup %4288 }
 0xc01   :  { %v2644_v15 = vsel %vm214_vm2, %v4289_v11, 0.0  ;;  %v4291_v23 = vpop.eup %4290 }
 0xc02   :  { %2362 = vadd.xlane.f32.xlu1 %v2361_v13  ;;  %v2572_v18 = vsel %vm214_vm2, %v4291_v23, 0.0  ;;  %v4293_v20 = vpop.eup %4292 }
 0xc03   :  { %v2500_v22 = vsel %vm214_vm2, %v4293_v20, 0.0 }
 0xc05   :  { %2645 = vadd.xlane.f32.xlu2 %v2644_v15 }
 0xc08   :  { %v2295_v9 = vpop.permute.xlu0 %2294 }
 0xc09   :  { %2315 = vmatpush.msrb.mxu0 %v2295_v9 }
 0xc0a   :  { %2573 = vadd.xlane.f32.xlu1 %v2572_v18 }
 0xc0b   :  { %2458 = vmatpush.msra.mxu0 %v4220_v17 }
 0xc10   :  { %v2367_v26 = vpop.permute.xlu0 %2366 }
 0xc12   :  { %2501 = vadd.xlane.f32.xlu1 %v2500_v22 }
 0xc17   :  { %v2151_v3 = vpop.xlane.xlu2 %2150 }
 0xc18   :  { %4294 = vrcp.f32 %v2151_v3  ;;  %v2506_v34 = vpop.permute.xlu0 %2505 }
 0xc1e   :  { %v4295_v24 = vpop.eup %4294 }
 0xc1f   :  { %v2153_v39 = vmul.f32 %v4295_v24, %v5159_v61 }
 0xc20   :  { %v2650_v59 = vpop.permute.xlu0 %2649 }
 0xc21   :  { %4109 = vmatmul.msk.f32.vlgmr.msrb.gmra.mxu1 %vm214_vm2, %v2153_v39 }
 0xc2b   :  { %2577 = vrot.lane.b32.xlu1 %v5089_v52, %s4334_s7  ;;  %s5219_s7 = sld [smem:[%s5749_s0 + %s4350_s4]]  }
 0xc2c   :  { %s5724_s4 = sld [smem:[%s5749_s0 + %s4356_s1]]  }
 0xc2f   :  { %v2219_v25 = vpop.xlane.xlu1 %2218 }
 0xc30   :  { %4296 = vrcp.f32 %v2219_v25 }
 0xc36   :  { %v4297_v27 = vpop.eup %4296 }
 0xc37   :  { %v2291_v43 = vpop.xlane.xlu2 %2290  ;;  %v2221_v29 = vmul.f32 %v4297_v27, %v5167_v50  ;;  %v2826_v27 = vld [vmem:[%s5239_s14 + $0x188] sm:$0xff] }
 0xc38   :  { %4298 = vrcp.f32 %v2291_v43  ;;  %2918 = vmatpush.msrb.mxu2 %v2826_v27  ;;  %v2802_v27 = vld [vmem:[%s5239_s14 + $0xc8] sm:$0xff] }
 0xc3e   :  { %v4299_v28 = vpop.eup %4298 }
 0xc3f   :  { %v2293_v30 = vmul.f32 %v4299_v28, %v4283_v54  ;;  %v2223_v33 = vpop.permute.xlu2 %2222  ;;  %v2827_v28 = vld [vmem:[%s5239_s14 + $0x190] sm:$0xff] }
 0xc40   :  { %2243 = vmatpush.msra.mxu1 %v2223_v33  ;;  %v2810_v33 = vld [vmem:[%s5239_s14 + $0x108] sm:$0xff] }
 0xc41   :  { %4112 = vmatmul.msk.f32.vlgmr.msra.gmra.mxu1 %vm214_vm2, %v2221_v29  ;;  %4115 = vmatmul.msk.f32.vlgmr.msrb.gmra.mxu0 %vm214_vm2, %v2293_v30  ;;  %v2828_v29 = vld [vmem:[%s5239_s14 + $0x198] sm:$0xff]  ;;  %v2809_v30 = vld [vmem:[%s5239_s14 + $0x100] sm:$0xff] }
 0xc42   :  { %2387 = vmatpush.msrb.mxu1 %v2367_v26  ;;  %v2825_v26 = vld [vmem:[%s5239_s14 + $0x180] sm:$0xff]  ;;  %2964 = vmatpush.msrb.mxu3 %v2828_v29  ;;  %v2804_v29 = vld [vmem:[%s5239_s14 + $0xd8] sm:$0xff] }
 0xc43   :  { %2919 = vmatpush.msrb.mxu2 %v2810_v33  ;;  %v2785_v33 = vld [vmem:[%s5239_s14 + $0x40] sm:$0xff] }
 0xc44   :  { %2526 = vmatpush.msra.mxu1 %v2506_v34  ;;  %v2811_v34 = vld [vmem:[%s5239_s14 + $0x110] sm:$0xff] }
 0xc6d   :  { %v2434_v52 = vpop.xlane.xlu1 %2433 }
 0xc6e   :  { %4300 = vrcp.f32 %v2434_v52  ;;  %v2812_v52 = vld [vmem:[%s5239_s14 + $0x118] sm:$0xff] }
 0xc6f   :  { %2965 = vmatpush.msrb.mxu3 %v2812_v52  ;;  %v2787_v52 = vld [vmem:[%s5239_s14 + $0x50] sm:$0xff] }
 0xc74   :  { %v4301_v35 = vpop.eup %4300 }
 0xc75   :  { %v2436_v36 = vmul.f32 %v4301_v35, %v4285_v5  ;;  %v2363_v37 = vpop.xlane.xlu1 %2362  ;;  %v2793_v35 = vld [vmem:[%s5239_s14 + $0x80] sm:$0xff] }
 0xc76   :  { %4302 = vrcp.f32 %v2363_v37  ;;  %v2795_v37 = vld [vmem:[%s5239_s14 + $0x90] sm:$0xff] }
 0xc77   :  { %4121 = vmatmul.msk.f32.vlgmr.msra.gmra.mxu0 %vm214_vm2, %v2436_v36  ;;  %v2794_v36 = vld [vmem:[%s5239_s14 + $0x88] sm:$0xff] }
 0xc78   :  { %v2646_v44 = vpop.xlane.xlu2 %2645  ;;  %2920 = vmatpush.msrb.mxu2 %v2794_v36 }
 0xc7c   :  { %v4303_v57 = vpop.eup %4302 }
 0xc7d   :  { %v2365_v38 = vmul.f32 %v4303_v57, %v4287_v21  ;;  %v2574_v41 = vpop.xlane.xlu1 %2573  ;;  %v4229_v21 = vld [vmem:[%s4031_s29] ss:$0 sm:$0xff]  ;;  %v2796_v57 = vld [vmem:[%s5239_s14 + $0x98] sm:$0xff] }
 0xc7e   :  { %2966 = vmatpush.msrb.mxu3 %v2796_v57 }
 0xc7f   :  { %4118 = vmatmul.msk.f32.vlgmr.msrb.gmra.mxu1 %vm214_vm2, %v2365_v38  ;;  %v2777_v38 = vld [vmem:[%s5239_s14] sm:$0xff] }
 0xc80   :  { %2670 = vmatpush.msrb.mxu1 %v2650_v59  ;;  %v2779_v59 = vld [vmem:[%s5239_s14 + $0x10] sm:$0xff] }
 0xc85   :  { %v2502_v61 = vpop.xlane.xlu1 %2501 }
 0xc86   :  { %4304 = vrcp.f32 %v2502_v61  ;;  %v2780_v61 = vld [vmem:[%s5239_s14 + $0x18] sm:$0xff] }
 0xc87   :  { %4306 = vrcp.f32 %v2646_v44  ;;  %2967 = vmatpush.msrb.mxu3 %v2780_v61  ;;  %v2839_v61 = vld [vmem:[%s5239_s14 + $0x1f0] sm:$0xff] }
 0xc88   :  { %4308 = vrcp.f32 %v2574_v41  ;;  %v2778_v41 = vld [vmem:[%s5239_s14 + $0x8] sm:$0xff] }
 0xc89   :  { %2921 = vmatpush.msrb.mxu2 %v2778_v41 }
 0xc8c   :  { %v4305_v31 = vpop.eup %4304 }
 0xc8d   :  { %v2504_v45 = vmul.f32 %v4305_v31, %v4293_v20  ;;  %v4307_v46 = vpop.eup %4306 }
 0xc8e   :  { %v2648_v47 = vmul.f32 %v4307_v46, %v4289_v11  ;;  %v4309_v49 = vpop.eup %4308 }
 0xc8f   :  { %4124 = vmatmul.msk.f32.vlgmr.msra.gmra.mxu1 %vm214_vm2, %v2504_v45  ;;  %v2576_v50 = vmul.f32 %v4309_v49, %v4291_v23 }
 0xc90   :  { %2941 = vmatpush.msra.mxu1 %v2827_v28  ;;  %v2803_v28 = vld [vmem:[%s5239_s14 + $0xd0] sm:$0xff] }
 0xc92   :  { %2942 = vmatpush.msra.mxu1 %v2811_v34  ;;  %v2786_v34 = vld [vmem:[%s5239_s14 + $0x48] sm:$0xff] }
 0xc94   :  { %2943 = vmatpush.msra.mxu1 %v2795_v37 }
 0xc96   :  { %2944 = vmatpush.msra.mxu1 %v2779_v59  ;;  %v2837_v59 = vld [vmem:[%s5239_s14 + $0x1e0] sm:$0xff] }
 0xc97   :  { %4130 = vmatmul.msk.f32.vlgmr.msrb.gmra.mxu1 %vm214_vm2, %v2648_v47 }
 0xc9d   :  { %v2578_v51 = vpop.permute.xlu1 %2577 }
 0xc9e   :  { %v2177_v53 = vpop.f32.mrf.mxu1  ;;  %2598 = vmatpush.msrb.mxu0 %v2578_v51 }
 0xc9f   :  { %2180 = vst.msk [vmem:[#allocation2] sm:$0xff] %vm214_vm2, %v2177_v53  ;;  %4127 = vmatmul.msk.f32.vlgmr.msrb.gmra.mxu0 %vm214_vm2, %v2576_v50 }
 0xca0   :  { %2895 = vmatpush.msra.mxu0 %v2825_v26  ;;  %v2801_v26 = vld [vmem:[%s5239_s14 + $0xc0] sm:$0xff] }
 0xca2   :  { %2896 = vmatpush.msra.mxu0 %v2809_v30 }
 0xca4   :  { %2897 = vmatpush.msra.mxu0 %v2793_v35  ;;  %v2788_v35 = vld [vmem:[%s5239_s14 + $0x58] sm:$0xff] }
 0xca6   :  { %2898 = vmatpush.msra.mxu0 %v2777_v38 }
 0xcbe   :  { %v2317_v54 = vpop.f32.mrf.mxu0  ;;  %v2245_v55 = vpop.f32.mrf.mxu1 }
 0xcbf   :  { %2321 = vrot.lane.b32.xlu0 %v2317_v54, %s4335_s8  ;;  %v5259_v54 = vld [vmem:[%s5219_s7] ss:$0 sm:$0xff] }
 0xcc7   :  { %2249 = vrot.lane.b32.xlu0 %v2245_v55, %s4333_s6 }
 0xcf4   :  { %v2460_v56 = vpop.f32.mrf.mxu0 }
 0xcf5   :  { %2463 = vst.msk [vmem:[#allocation2 + $0x8] sm:$0xff] %vm214_vm2, %v2460_v56 }
 0xcfc   :  { %v2389_v12 = vpop.f32.mrf.mxu1 }
 0xcfd   :  { %2393 = vrot.lane.b32.xlu1 %v2389_v12, %s4336_s9 }
 0xd0c   :  { %v2528_v58 = vpop.f32.mrf.mxu1 }
 0xd0d   :  { %2532 = vrot.lane.b32.xlu0 %v2528_v58, %s4333_s6 }
 0xd14   :  { %v2672_v62 = vpop.f32.mrf.mxu1 }
 0xd15   :  { %2676 = vrot.lane.b32.xlu2 %v2672_v62, %s4336_s9  ;;  %s4353_s9 = smov 23  }
 0xd16   :  { %s5493_s20 = sld [smem:[%s5749_s0 + %s4353_s9]]  }
 0xd1c   :  { %v2600_v63 = vpop.f32.mrf.mxu0 }
 0xd1d   :  { %2604 = vrot.lane.b32.xlu1 %v2600_v63, %s4335_s8  ;;  %s4351_s8 = smov 21   ;;  %v2830_v63 = vld [vmem:[%s5239_s14 + $0x1a8] sm:$0xff] }
 0xd1e   :  { %s5225_s10 = sld [smem:[%s5749_s0 + %s4351_s8]]   ;;  %3010 = vmatpush.msra.mxu2 %v2830_v63  ;;  %v3330_v63 = vld [vmem:[%s5346_s17 + $0x178] sm:$0xff] }
 0xd1f   :  { %s5734_s8 = sld [smem:[%s5749_s0 + %s4357_s5]]  }
 0xd20   :  { %3011 = vmatpush.msra.mxu2 %v2814_v19  ;;  %v3313_v19 = vld [vmem:[%s5346_s17 + $0xf0] sm:$0xff] }
 0xd24   :  { %v5262_v56 = vld [vmem:[%s5225_s10] ss:$0 sm:$0xff] }
 0xd31   :  { %v2322_v0 = vpop.permute.xlu0 %2321 }
 0xd39   :  { %v2250_v16 = vpop.permute.xlu0 %2249 }
 0xd3a   :  { %2252 = vst.msk [vmem:[#allocation2] sm:$0xff] %vm350_vm4, %v2250_v16  ;;  %v2831_v16 = vld [vmem:[%s5239_s14 + $0x1b0] sm:$0xff] }
 0xd3b   :  { %2324 = vst.msk [vmem:[#allocation2] sm:$0xff] %vm423_vm5, %v2322_v0  ;;  %v2829_v0 = vld [vmem:[%s5239_s14 + $0x1a0] sm:$0xff]  ;;  %3033 = vmatpush.msrb.mxu1 %v2831_v16  ;;  %v3346_v16 = vld [vmem:[%s5346_s17 + $0x1f8] sm:$0xff] }
 0xd3c   :  { %2987 = vmatpush.msrb.mxu0 %v2829_v0  ;;  %v3314_v0 = vld [vmem:[%s5346_s17 + $0xf8] sm:$0xff] }
 0xd3d   :  { %3034 = vmatpush.msrb.mxu1 %v2815_v4  ;;  %v3345_v4 = vld [vmem:[%s5346_s17 + $0x1f0] sm:$0xff] }
 0xd3e   :  { %2988 = vmatpush.msrb.mxu0 %v2813_v2  ;;  %v3329_v2 = vld [vmem:[%s5346_s17 + $0x170] sm:$0xff] }
 0xd6f   :  { %v2394_v5 = vpop.permute.xlu1 %2393  ;;  %v2677_v8 = vpop.permute.xlu2 %2676 }
 0xd70   :  { %2396 = vst.msk [vmem:[#allocation2] sm:$0xff] %vm496_vm6, %v2394_v5 }
 0xd77   :  { %v2680_v40 = vld [vmem:[#allocation2] sm:$0xff] }
 0xd78   :  { %4131 = vmatmul.msk.f32.vlgmr.msra.gmra.mxu3 %vm181_vm1, %v2680_v40  ;;  %v2816_v40 = vld [vmem:[%s5239_s14 + $0x138] sm:$0xff] }
 0xd79   :  { %3056 = vmatpush.msra.mxu3 %v2832_v1  ;;  %v3297_v1 = vld [vmem:[%s5346_s17 + $0x70] sm:$0xff] }
 0xd7b   :  { %3057 = vmatpush.msra.mxu3 %v2816_v40  ;;  %v3328_v40 = vld [vmem:[%s5346_s17 + $0x168] sm:$0xff] }
 0xd7f   :  { %v2533_v6 = vpop.permute.xlu0 %2532 }
 0xd80   :  { %2535 = vst.msk [vmem:[#allocation2 + $0x8] sm:$0xff] %vm350_vm4, %v2533_v6  ;;  %v2797_v6 = vld [vmem:[%s5239_s14 + $0xa0] sm:$0xff] }
 0xd81   :  { %2989 = vmatpush.msrb.mxu0 %v2797_v6  ;;  %v3312_v6 = vld [vmem:[%s5346_s17 + $0xe8] sm:$0xff] }
 0xd8f   :  { %v2605_v7 = vpop.permute.xlu1 %2604 }
 0xd90   :  { %2607 = vst.msk [vmem:[#allocation2 + $0x8] sm:$0xff] %vm423_vm5, %v2605_v7  ;;  %v2798_v7 = vld [vmem:[%s5239_s14 + $0xa8] sm:$0xff] }
 0xd91   :  { %2679 = vst.msk [vmem:[#allocation2 + $0x8] sm:$0xff] %vm496_vm6, %v2677_v8  ;;  %3012 = vmatpush.msra.mxu2 %v2798_v7  ;;  %v3344_v7 = vld [vmem:[%s5346_s17 + $0x1e8] sm:$0xff] }
 0xd98   :  { %v2681_v32 = vld [vmem:[#allocation2 + $0x8] sm:$0xff] }
 0xd99   :  { %4132 = vmatmul.msk.f32.gmra.mxu3 %vm181_vm1, %v2681_v32  ;;  %v2799_v32 = vld [vmem:[%s5239_s14 + $0xb0] sm:$0xff] }
 0xd9a   :  { %3035 = vmatpush.msrb.mxu1 %v2799_v32  ;;  %v3327_v32 = vld [vmem:[%s5346_s17 + $0x160] sm:$0xff] }
 0xdfb   :  { %v2713_v10 = vpop.f32.mrf.mxu3 }
 0xdfc   :  { %v2714_v11 = vadd.f32 %v4229_v21, %v2713_v10  ;;  %v2781_v10 = vld [vmem:[%s5239_s14 + $0x20] sm:$0xff] }
 0xdfd   :  { %2990 = vmatpush.msrb.mxu0 %v2781_v10  ;;  %v3343_v10 = vld [vmem:[%s5346_s17 + $0x1e0] sm:$0xff] }
 0xdfe   :  { %v2719_v13 = vadd.f32 %v2714_v11, %v5066_v42  ;;  %v2782_v11 = vld [vmem:[%s5239_s14 + $0x28] sm:$0xff] }
 0xdff   :  { %3013 = vmatpush.msra.mxu2 %v2782_v11  ;;  %v3294_v11 = vld [vmem:[%s5346_s17 + $0x58] sm:$0xff] }
 0xe00   :  { %v2723_v14 = vsel %vm181_vm1, %v2719_v13, 0.0 }
 0xe01   :  { %2724 = vadd.xlane.f32.xlu0 %v2723_v14 }
 0xe1c   :  { %v2716_v15 = vpop.f32.mrf.mxu3 }
 0xe1d   :  { %v2717_v23 = vadd.f32 %v4229_v21, %v2716_v15  ;;  %v2800_v21 = vld [vmem:[%s5239_s14 + $0xb8] sm:$0xff] }
 0xe1e   :  { %v2784_v15 = vld [vmem:[%s5239_s14 + $0x38] sm:$0xff]  ;;  %3058 = vmatpush.msra.mxu3 %v2800_v21  ;;  %v3311_v21 = vld [vmem:[%s5346_s17 + $0xe0] sm:$0xff] }
 0xe1f   :  { %v2720_v17 = vadd.f32 %v2717_v23, %v5070_v48  ;;  %v2834_v23 = vld [vmem:[%s5239_s14 + $0x1c8] sm:$0xff] }
 0xe20   :  { %3059 = vmatpush.msra.mxu3 %v2784_v15  ;;  %v3342_v15 = vld [vmem:[%s5346_s17 + $0x1d8] sm:$0xff] }
 0xe21   :  { %v2726_v42 = vsel %vm181_vm1, %v2720_v17, 0.0 }
 0xe22   :  { %2727 = vadd.xlane.f32.xlu1 %v2726_v42 }
 0xe74   :  { %v2725_v9 = vpop.xlane.xlu0 %2724 }
 0xe75   :  { %v2729_v18 = vmul.f32 %v2725_v9, %v4543_v60 }
 0xe77   :  { %v2731_v20 = vsub.f32 %v2719_v13, %v2729_v18  ;;  %v2783_v13 = vld [vmem:[%s5239_s14 + $0x30] sm:$0xff]  ;;  %v2833_v18 = vld [vmem:[%s5239_s14 + $0x1c0] sm:$0xff] }
 0xe78   :  { %3036 = vmatpush.msrb.mxu1 %v2783_v13  ;;  %v3326_v13 = vld [vmem:[%s5346_s17 + $0x158] sm:$0xff] }
 0xe79   :  { %v2733_v22 = vmul.f32 %v2731_v20, %v2731_v20 }
 0xe7b   :  { %v2735_v3 = vsel %vm181_vm1, %v2733_v22, 0.0  ;;  %v2836_v22 = vld [vmem:[%s5239_s14 + $0x1d8] sm:$0xff] }
 0xe7c   :  { %2736 = vadd.xlane.f32.xlu2 %v2735_v3  ;;  %v2817_v3 = vld [vmem:[%s5239_s14 + $0x140] sm:$0xff] }
 0xe95   :  { %v2728_v24 = vpop.xlane.xlu1 %2727 }
 0xe96   :  { %v2730_v48 = vmul.f32 %v2728_v24, %v4543_v60  ;;  %v2818_v24 = vld [vmem:[%s5239_s14 + $0x148] sm:$0xff] }
 0xe98   :  { %v5231_v39 = vsub.f32 %v2720_v17, %v2730_v48  ;;  %v2819_v48 = vld [vmem:[%s5239_s14 + $0x150] sm:$0xff] }
 0xe9a   :  { %v2734_v25 = vmul.f32 %v5231_v39, %v5231_v39 }
 0xe9c   :  { %v2738_v43 = vsel %vm181_vm1, %v2734_v25, 0.0 }
 0xe9d   :  { %2739 = vadd.xlane.f32.xlu0 %v2738_v43  ;;  %v2820_v43 = vld [vmem:[%s5239_s14 + $0x158] sm:$0xff] }
 0xeef   :  { %v2737_v44 = vpop.xlane.xlu2 %2736 }
 0xef0   :  { %v2741_v31 = vmul.f32 %v2737_v44, %v4543_v60  ;;  %v2840_v44 = vld [vmem:[%s5239_s14 + $0x1f8] sm:$0xff] }
 0xef2   :  { %v2743_v45 = vadd.f32 1e-05, %v2741_v31  ;;  %v2821_v31 = vld [vmem:[%s5239_s14 + $0x160] sm:$0xff] }
 0xef4   :  { %4310 = vrsqrt.f32 %v2743_v45  ;;  %vm2751_vm3 = vweird.f32 %v2743_v45 }
 0xefa   :  { %v4311_v46 = vpop.eup %4310 }
 0xefb   :  { %v2746_v47 = vmul.f32 %v4311_v46, %v2743_v45  ;;  %vm2752_vm2 = vweird.f32 %v4311_v46  ;;  %v2822_v45 = vld [vmem:[%s5239_s14 + $0x168] sm:$0xff] }
 0xefc   :  { %vm2753_vm4 = vmor %vm2751_vm3, %vm2752_vm2 }
 0xefd   :  { %v2747_v49 = vmul.f32 %v4311_v46, %v2746_v47  ;;  %v2824_v47 = vld [vmem:[%s5239_s14 + $0x178] sm:$0xff] }
 0xeff   :  { %v2748_v50 = vmul.f32 0.5, %v2747_v49  ;;  %v2805_v49 = vld [vmem:[%s5239_s14 + $0xe0] sm:$0xff] }
 0xf01   :  { %v2749_v51 = vsub.f32 1.5, %v2748_v50  ;;  %v2806_v50 = vld [vmem:[%s5239_s14 + $0xe8] sm:$0xff] }
 0xf03   :  { %v2750_v53 = vmul.f32 %v4311_v46, %v2749_v51  ;;  %v2807_v51 = vld [vmem:[%s5239_s14 + $0xf0] sm:$0xff] }
 0xf05   :  { %v2754_v55 = vsel %vm2753_vm4, %v4311_v46, %v2750_v53  ;;  %v2823_v46 = vld [vmem:[%s5239_s14 + $0x170] sm:$0xff]  ;;  %v2808_v53 = vld [vmem:[%s5239_s14 + $0xf8] sm:$0xff] }
 0xf06   :  { %v2765_v12 = vmul.f32 %v2754_v55, %v2731_v20  ;;  %v2835_v20 = vld [vmem:[%s5239_s14 + $0x1d0] sm:$0xff]  ;;  %v2790_v55 = vld [vmem:[%s5239_s14 + $0x68] sm:$0xff] }
 0xf08   :  { %v2770_v58 = vmul.f32 %v5259_v54, %v2765_v12  ;;  %v2792_v12 = vld [vmem:[%s5239_s14 + $0x78] sm:$0xff] }
 0xf0a   :  { %v5266_v62 = vadd.f32 %v5262_v56, %v2770_v58  ;;  %v3298_v58 = vld [vmem:[%s5346_s17 + $0x78] sm:$0xff] }
 0xf0c   :  { %4133 = vmatmul.msk.f32.vlgmr.msra.gmra.mxu0 %vm181_vm1, %v5266_v62  ;;  %4135 = vmatmul.msk.f32.vlgmr.msrb.gmra.mxu2 %vm181_vm1, %v5266_v62 }
 0xf0d   :  { %4137 = vmatmul.msk.f32.vlgmr.msra.gmra.mxu1 %vm181_vm1, %v5266_v62  ;;  %4139 = vmatmul.msk.f32.vlgmr.msrb.gmra.mxu3 %vm181_vm1, %v5266_v62 }
 0xf0e   :  { %3102 = vmatpush.msrb.mxu2 %v2834_v23  ;;  %3079 = vmatpush.msra.mxu0 %v2833_v18  ;;  %v3293_v23 = vld [vmem:[%s5346_s17 + $0x50] sm:$0xff]  ;;  %v3292_v18 = vld [vmem:[%s5346_s17 + $0x48] sm:$0xff] }
 0xf0f   :  { %3125 = vmatpush.msra.mxu1 %v2835_v20  ;;  %3148 = vmatpush.msrb.mxu3 %v2836_v22  ;;  %v3324_v20 = vld [vmem:[%s5346_s17 + $0x148] sm:$0xff] }
 0xf10   :  { %v2740_v5 = vpop.xlane.xlu0 %2739  ;;  %3103 = vmatpush.msrb.mxu2 %v2818_v24  ;;  %3080 = vmatpush.msra.mxu0 %v2817_v3  ;;  %v3308_v22 = vld [vmem:[%s5346_s17 + $0xc8] sm:$0xff]  ;;  %v3291_v24 = vld [vmem:[%s5346_s17 + $0x40] sm:$0xff] }
 0xf11   :  { %v2742_v8 = vmul.f32 %v2740_v5, %v4543_v60  ;;  %3126 = vmatpush.msra.mxu1 %v2819_v48  ;;  %3149 = vmatpush.msrb.mxu3 %v2820_v43  ;;  %v3296_v5 = vld [vmem:[%s5346_s17 + $0x68] sm:$0xff]  ;;  %v3323_v48 = vld [vmem:[%s5346_s17 + $0x140] sm:$0xff] }
 0xf12   :  { %3104 = vmatpush.msrb.mxu2 %v2802_v27  ;;  %3081 = vmatpush.msra.mxu0 %v2801_v26  ;;  %v3340_v3 = vld [vmem:[%s5346_s17 + $0x1c8] sm:$0xff]  ;;  %v3339_v43 = vld [vmem:[%s5346_s17 + $0x1c0] sm:$0xff]  ;;  %v3290_v26 = vld [vmem:[%s5346_s17 + $0x38] sm:$0xff] }
 0xf13   :  { %v2744_v14 = vadd.f32 1e-05, %v2742_v8  ;;  %3127 = vmatpush.msra.mxu1 %v2803_v28  ;;  %3150 = vmatpush.msrb.mxu3 %v2804_v29  ;;  %v3295_v8 = vld [vmem:[%s5346_s17 + $0x60] sm:$0xff]  ;;  %v3322_v27 = vld [vmem:[%s5346_s17 + $0x138] sm:$0xff] }
 0xf14   :  { %3105 = vmatpush.msrb.mxu2 %v2786_v34  ;;  %3082 = vmatpush.msra.mxu0 %v2785_v33  ;;  %v3306_v28 = vld [vmem:[%s5346_s17 + $0xb8] sm:$0xff]  ;;  %v3321_v33 = vld [vmem:[%s5346_s17 + $0x130] sm:$0xff] }
 0xf15   :  { %4312 = vrsqrt.f32 %v2744_v14  ;;  %vm2761_vm6 = vweird.f32 %v2744_v14  ;;  %3128 = vmatpush.msra.mxu1 %v2787_v52  ;;  %3151 = vmatpush.msrb.mxu3 %v2788_v35  ;;  %v3338_v29 = vld [vmem:[%s5346_s17 + $0x1b8] sm:$0xff]  ;;  %v3305_v34 = vld [vmem:[%s5346_s17 + $0xb0] sm:$0xff]  ;;  %v3288_v35 = vld [vmem:[%s5346_s17 + $0x28] sm:$0xff] }
 0xf16   :  { %v3337_v52 = vld [vmem:[%s5346_s17 + $0x1b0] sm:$0xff] }
 0xf1b   :  { %v4313_v17 = vpop.eup %4312 }
 0xf1c   :  { %v2756_v42 = vmul.f32 %v4313_v17, %v2744_v14  ;;  %vm2762_vm5 = vweird.f32 %v4313_v17  ;;  %v3310_v14 = vld [vmem:[%s5346_s17 + $0xd8] sm:$0xff] }
 0xf1d   :  { %vm2763_vm10 = vmor %vm2761_vm6, %vm2762_vm5 }
 0xf1e   :  { %v2757_v9 = vmul.f32 %v4313_v17, %v2756_v42  ;;  %v3309_v42 = vld [vmem:[%s5346_s17 + $0xd0] sm:$0xff] }
 0xf20   :  { %v2758_v25 = vmul.f32 0.5, %v2757_v9  ;;  %v3341_v9 = vld [vmem:[%s5346_s17 + $0x1d0] sm:$0xff] }
 0xf22   :  { %v2759_v30 = vsub.f32 1.5, %v2758_v25  ;;  %v3307_v25 = vld [vmem:[%s5346_s17 + $0xc0] sm:$0xff] }
 0xf24   :  { %v2760_v36 = vmul.f32 %v4313_v17, %v2759_v30  ;;  %v3289_v30 = vld [vmem:[%s5346_s17 + $0x30] sm:$0xff] }
 0xf26   :  { %v2764_v37 = vsel %vm2763_vm10, %v4313_v17, %v2760_v36  ;;  %v3325_v17 = vld [vmem:[%s5346_s17 + $0x150] sm:$0xff]  ;;  %v3320_v36 = vld [vmem:[%s5346_s17 + $0x128] sm:$0xff] }
 0xf27   :  { %v2766_v57 = vmul.f32 %v2764_v37, %v5231_v39  ;;  %v2838_v39 = vld [vmem:[%s5239_s14 + $0x1e8] sm:$0xff] }
 0xf28   :  { %v3304_v37 = vld [vmem:[%s5346_s17 + $0xa8] sm:$0xff] }
 0xf29   :  { %v2771_v38 = vmul.f32 %v5259_v54, %v2766_v57  ;;  %v2789_v54 = vld [vmem:[%s5239_s14 + $0x60] sm:$0xff]  ;;  %v3336_v57 = vld [vmem:[%s5346_s17 + $0x1a8] sm:$0xff] }
 0xf2b   :  { %v5312_v41 = vadd.f32 %v5262_v56, %v2771_v38  ;;  %v2791_v56 = vld [vmem:[%s5239_s14 + $0x70] sm:$0xff]  ;;  %v3287_v38 = vld [vmem:[%s5346_s17 + $0x20] sm:$0xff] }
 0xf2d   :  { %4134 = vmatmul.msk.f32.gmra.mxu0 %vm181_vm1, %v5312_v41  ;;  %4136 = vmatmul.msk.f32.gmra.mxu2 %vm181_vm1, %v5312_v41 }
 0xf2e   :  { %4138 = vmatmul.msk.f32.gmra.mxu1 %vm181_vm1, %v5312_v41  ;;  %4140 = vmatmul.msk.f32.gmra.mxu3 %vm181_vm1, %v5312_v41 }
 0xf35   :  { %4141 = vmatmul.msk.f32.vlgmr.msrb.gmra.mxu0 %vm181_vm1, %v5266_v62  ;;  %4143 = vmatmul.msk.f32.vlgmr.msra.gmra.mxu2 %vm181_vm1, %v5266_v62 }
 0xf36   :  { %4145 = vmatmul.msk.f32.vlgmr.msrb.gmra.mxu1 %vm181_vm1, %v5266_v62  ;;  %4147 = vmatmul.msk.f32.vlgmr.msra.gmra.mxu3 %vm181_vm1, %v5266_v62 }
 0xf37   :  { %3194 = vmatpush.msra.mxu2 %v2838_v39  ;;  %3171 = vmatpush.msrb.mxu0 %v2837_v59  ;;  %v3319_v39 = vld [vmem:[%s5346_s17 + $0x120] sm:$0xff] }
 0xf38   :  { %3217 = vmatpush.msrb.mxu1 %v2839_v61  ;;  %3240 = vmatpush.msra.mxu3 %v2840_v44  ;;  %v3303_v59 = vld [vmem:[%s5346_s17 + $0xa0] sm:$0xff]  ;;  %v3286_v44 = vld [vmem:[%s5346_s17 + $0x18] sm:$0xff] }
 0xf39   :  { %3172 = vmatpush.msrb.mxu0 %v2821_v31  ;;  %3195 = vmatpush.msra.mxu2 %v2822_v45  ;;  %v3335_v61 = vld [vmem:[%s5346_s17 + $0x1a0] sm:$0xff]  ;;  %v3318_v31 = vld [vmem:[%s5346_s17 + $0x118] sm:$0xff] }
 0xf3a   :  { %3218 = vmatpush.msrb.mxu1 %v2823_v46  ;;  %3241 = vmatpush.msra.mxu3 %v2824_v47  ;;  %v3302_v45 = vld [vmem:[%s5346_s17 + $0x98] sm:$0xff]  ;;  %v3285_v47 = vld [vmem:[%s5346_s17 + $0x10] sm:$0xff] }
 0xf3b   :  { %3173 = vmatpush.msrb.mxu0 %v2805_v49  ;;  %3196 = vmatpush.msra.mxu2 %v2806_v50  ;;  %v3334_v46 = vld [vmem:[%s5346_s17 + $0x198] sm:$0xff]  ;;  %v3317_v49 = vld [vmem:[%s5346_s17 + $0x110] sm:$0xff] }
 0xf3c   :  { %3219 = vmatpush.msrb.mxu1 %v2807_v51  ;;  %3242 = vmatpush.msra.mxu3 %v2808_v53  ;;  %v3301_v50 = vld [vmem:[%s5346_s17 + $0x90] sm:$0xff]  ;;  %v3284_v53 = vld [vmem:[%s5346_s17 + $0x8] sm:$0xff] }
 0xf3d   :  { %4142 = vmatmul.msk.f32.gmra.mxu0 %vm181_vm1, %v5312_v41  ;;  %4144 = vmatmul.msk.f32.gmra.mxu2 %vm181_vm1, %v5312_v41  ;;  %v3333_v51 = vld [vmem:[%s5346_s17 + $0x190] sm:$0xff] }
 0xf3e   :  { %4146 = vmatmul.msk.f32.gmra.mxu1 %vm181_vm1, %v5312_v41  ;;  %4148 = vmatmul.msk.f32.gmra.mxu3 %vm181_vm1, %v5312_v41 }
 0xf3f   :  { %3174 = vmatpush.msrb.mxu0 %v2789_v54  ;;  %3197 = vmatpush.msra.mxu2 %v2790_v55  ;;  %v3316_v54 = vld [vmem:[%s5346_s17 + $0x108] sm:$0xff] }
 0xf40   :  { %3220 = vmatpush.msrb.mxu1 %v2791_v56  ;;  %3243 = vmatpush.msra.mxu3 %v2792_v12  ;;  %v3300_v55 = vld [vmem:[%s5346_s17 + $0x88] sm:$0xff]  ;;  %v3283_v12 = vld [vmem:[%s5346_s17] sm:$0xff] }
 0xf41   :  { %v3332_v56 = vld [vmem:[%s5346_s17 + $0x188] sm:$0xff] }
 0xf45   :  { %4149 = vmatmul.msk.f32.vlgmr.msra.gmra.mxu0 %vm181_vm1, %v5266_v62  ;;  %4151 = vmatmul.msk.f32.vlgmr.msrb.gmra.mxu2 %vm181_vm1, %v5266_v62 }
 0xf46   :  { %4153 = vmatmul.msk.f32.vlgmr.msra.gmra.mxu1 %vm181_vm1, %v5266_v62  ;;  %4155 = vmatmul.msk.f32.vlgmr.msrb.gmra.mxu3 %vm181_vm1, %v5266_v62 }
 0xf47   :  { %3543 = vmatpush.msra.mxu0 %v3298_v58  ;;  %3589 = vmatpush.msra.mxu1 %v3330_v63  ;;  %v3315_v58 = vld [vmem:[%s5346_s17 + $0x100] sm:$0xff]  ;;  %v3362_v63 = vld [vmem:[%s5346_s17 + $0x278] sm:$0xff] }
 0xf48   :  { %3566 = vmatpush.msrb.mxu2 %v3314_v0  ;;  %3612 = vmatpush.msrb.mxu3 %v3346_v16  ;;  %v3394_v0 = vld [vmem:[%s5346_s17 + $0x378] sm:$0xff]  ;;  %v3299_v16 = vld [vmem:[%s5346_s17 + $0x80] sm:$0xff] }
 0xf49   :  { %3544 = vmatpush.msra.mxu0 %v3297_v1  ;;  %3590 = vmatpush.msra.mxu1 %v3329_v2  ;;  %v3331_v1 = vld [vmem:[%s5346_s17 + $0x180] sm:$0xff]  ;;  %v3361_v2 = vld [vmem:[%s5346_s17 + $0x270] sm:$0xff] }
 0xf4a   :  { %3567 = vmatpush.msrb.mxu2 %v3313_v19  ;;  %3613 = vmatpush.msrb.mxu3 %v3345_v4  ;;  %v3393_v19 = vld [vmem:[%s5346_s17 + $0x370] sm:$0xff]  ;;  %v3378_v4 = vld [vmem:[%s5346_s17 + $0x2f8] sm:$0xff] }
 0xf4b   :  { %3545 = vmatpush.msra.mxu0 %v3296_v5  ;;  %3591 = vmatpush.msra.mxu1 %v3328_v40  ;;  %v3410_v5 = vld [vmem:[%s5346_s17 + $0x3f8] sm:$0xff]  ;;  %v3360_v40 = vld [vmem:[%s5346_s17 + $0x268] sm:$0xff] }
 0xf4c   :  { %3568 = vmatpush.msrb.mxu2 %v3312_v6  ;;  %3614 = vmatpush.msrb.mxu3 %v3344_v7  ;;  %v3392_v6 = vld [vmem:[%s5346_s17 + $0x368] sm:$0xff]  ;;  %v3377_v7 = vld [vmem:[%s5346_s17 + $0x2f0] sm:$0xff] }
 0xf4d   :  { %4150 = vmatmul.msk.f32.gmra.mxu0 %vm181_vm1, %v5312_v41  ;;  %4152 = vmatmul.msk.f32.gmra.mxu2 %vm181_vm1, %v5312_v41 }
 0xf4e   :  { %4154 = vmatmul.msk.f32.gmra.mxu1 %vm181_vm1, %v5312_v41  ;;  %4156 = vmatmul.msk.f32.gmra.mxu3 %vm181_vm1, %v5312_v41 }
 0xf4f   :  { %3546 = vmatpush.msra.mxu0 %v3295_v8  ;;  %3592 = vmatpush.msra.mxu1 %v3327_v32  ;;  %v3409_v8 = vld [vmem:[%s5346_s17 + $0x3f0] sm:$0xff]  ;;  %v3359_v32 = vld [vmem:[%s5346_s17 + $0x260] sm:$0xff] }
 0xf50   :  { %3569 = vmatpush.msrb.mxu2 %v3311_v21  ;;  %3615 = vmatpush.msrb.mxu3 %v3343_v10  ;;  %v3391_v21 = vld [vmem:[%s5346_s17 + $0x360] sm:$0xff]  ;;  %v3376_v10 = vld [vmem:[%s5346_s17 + $0x2e8] sm:$0xff] }
 0xf51   :  { %3547 = vmatpush.msra.mxu0 %v3294_v11  ;;  %3593 = vmatpush.msra.mxu1 %v3326_v13  ;;  %v3408_v11 = vld [vmem:[%s5346_s17 + $0x3e8] sm:$0xff]  ;;  %v3358_v13 = vld [vmem:[%s5346_s17 + $0x258] sm:$0xff] }
 0xf52   :  { %3570 = vmatpush.msrb.mxu2 %v3310_v14  ;;  %3616 = vmatpush.msrb.mxu3 %v3342_v15  ;;  %v3390_v14 = vld [vmem:[%s5346_s17 + $0x358] sm:$0xff]  ;;  %v3375_v15 = vld [vmem:[%s5346_s17 + $0x2e0] sm:$0xff] }
 0xf53   :  { %3548 = vmatpush.msra.mxu0 %v3293_v23  ;;  %3594 = vmatpush.msra.mxu1 %v3325_v17  ;;  %v3407_v23 = vld [vmem:[%s5346_s17 + $0x3e0] sm:$0xff]  ;;  %v3357_v17 = vld [vmem:[%s5346_s17 + $0x250] sm:$0xff] }
 0xf54   :  { %3571 = vmatpush.msrb.mxu2 %v3309_v42  ;;  %3617 = vmatpush.msrb.mxu3 %v3341_v9  ;;  %v3389_v42 = vld [vmem:[%s5346_s17 + $0x350] sm:$0xff]  ;;  %v3374_v9 = vld [vmem:[%s5346_s17 + $0x2d8] sm:$0xff] }
 0xf55   :  { %4157 = vmatmul.msk.f32.vlgmr.msrb.gmra.mxu0 %vm181_vm1, %v5266_v62  ;;  %4159 = vmatmul.msk.f32.vlgmr.msra.gmra.mxu2 %vm181_vm1, %v5266_v62 }
 0xf56   :  { %4161 = vmatmul.msk.f32.vlgmr.msrb.gmra.mxu1 %vm181_vm1, %v5266_v62  ;;  %4163 = vmatmul.msk.f32.vlgmr.msra.gmra.mxu3 %vm181_vm1, %v5266_v62 }
 0xf57   :  { %3549 = vmatpush.msra.mxu0 %v3292_v18  ;;  %3595 = vmatpush.msra.mxu1 %v3324_v20  ;;  %v3406_v18 = vld [vmem:[%s5346_s17 + $0x3d8] sm:$0xff]  ;;  %v3356_v20 = vld [vmem:[%s5346_s17 + $0x248] sm:$0xff] }
 0xf58   :  { %3572 = vmatpush.msrb.mxu2 %v3308_v22  ;;  %3618 = vmatpush.msrb.mxu3 %v3340_v3  ;;  %v3388_v22 = vld [vmem:[%s5346_s17 + $0x348] sm:$0xff]  ;;  %v3373_v3 = vld [vmem:[%s5346_s17 + $0x2d0] sm:$0xff] }
 0xf59   :  { %3550 = vmatpush.msra.mxu0 %v3291_v24  ;;  %3596 = vmatpush.msra.mxu1 %v3323_v48  ;;  %v3405_v24 = vld [vmem:[%s5346_s17 + $0x3d0] sm:$0xff]  ;;  %v3355_v48 = vld [vmem:[%s5346_s17 + $0x240] sm:$0xff] }
 0xf5a   :  { %3573 = vmatpush.msrb.mxu2 %v3307_v25  ;;  %3619 = vmatpush.msrb.mxu3 %v3339_v43  ;;  %v3387_v25 = vld [vmem:[%s5346_s17 + $0x340] sm:$0xff]  ;;  %v3372_v43 = vld [vmem:[%s5346_s17 + $0x2c8] sm:$0xff] }
 0xf5b   :  { %3551 = vmatpush.msra.mxu0 %v3290_v26  ;;  %3597 = vmatpush.msra.mxu1 %v3322_v27  ;;  %v3404_v26 = vld [vmem:[%s5346_s17 + $0x3c8] sm:$0xff]  ;;  %v3354_v27 = vld [vmem:[%s5346_s17 + $0x238] sm:$0xff] }
 0xf5c   :  { %3574 = vmatpush.msrb.mxu2 %v3306_v28  ;;  %3620 = vmatpush.msrb.mxu3 %v3338_v29  ;;  %v3386_v28 = vld [vmem:[%s5346_s17 + $0x338] sm:$0xff]  ;;  %v3371_v29 = vld [vmem:[%s5346_s17 + $0x2c0] sm:$0xff] }
 0xf5d   :  { %4158 = vmatmul.msk.f32.gmra.mxu0 %vm181_vm1, %v5312_v41  ;;  %4160 = vmatmul.msk.f32.gmra.mxu2 %vm181_vm1, %v5312_v41 }
 0xf5e   :  { %4162 = vmatmul.msk.f32.gmra.mxu1 %vm181_vm1, %v5312_v41  ;;  %4164 = vmatmul.msk.f32.gmra.mxu3 %vm181_vm1, %v5312_v41 }
 0xf5f   :  { %3552 = vmatpush.msra.mxu0 %v3289_v30  ;;  %3598 = vmatpush.msra.mxu1 %v3321_v33  ;;  %v3403_v30 = vld [vmem:[%s5346_s17 + $0x3c0] sm:$0xff]  ;;  %v3353_v33 = vld [vmem:[%s5346_s17 + $0x230] sm:$0xff] }
 0xf60   :  { %3575 = vmatpush.msrb.mxu2 %v3305_v34  ;;  %3621 = vmatpush.msrb.mxu3 %v3337_v52  ;;  %v3385_v34 = vld [vmem:[%s5346_s17 + $0x330] sm:$0xff]  ;;  %v3370_v52 = vld [vmem:[%s5346_s17 + $0x2b8] sm:$0xff] }
 0xf61   :  { %3553 = vmatpush.msra.mxu0 %v3288_v35  ;;  %3599 = vmatpush.msra.mxu1 %v3320_v36  ;;  %v3402_v35 = vld [vmem:[%s5346_s17 + $0x3b8] sm:$0xff]  ;;  %v3352_v36 = vld [vmem:[%s5346_s17 + $0x228] sm:$0xff] }
 0xf62   :  { %3576 = vmatpush.msrb.mxu2 %v3304_v37  ;;  %3622 = vmatpush.msrb.mxu3 %v3336_v57  ;;  %v3384_v37 = vld [vmem:[%s5346_s17 + $0x328] sm:$0xff]  ;;  %v3369_v57 = vld [vmem:[%s5346_s17 + $0x2b0] sm:$0xff] }
 0xf63   :  { %3554 = vmatpush.msra.mxu0 %v3287_v38  ;;  %3600 = vmatpush.msra.mxu1 %v3319_v39  ;;  %v3401_v38 = vld [vmem:[%s5346_s17 + $0x3b0] sm:$0xff]  ;;  %v3351_v39 = vld [vmem:[%s5346_s17 + $0x220] sm:$0xff] }
 0xf64   :  { %3577 = vmatpush.msrb.mxu2 %v3303_v59  ;;  %3623 = vmatpush.msrb.mxu3 %v3335_v61  ;;  %v3383_v59 = vld [vmem:[%s5346_s17 + $0x320] sm:$0xff]  ;;  %v3368_v61 = vld [vmem:[%s5346_s17 + $0x2a8] sm:$0xff] }
 0xf65   :  { %3555 = vmatpush.msra.mxu0 %v3286_v44  ;;  %3601 = vmatpush.msra.mxu1 %v3318_v31  ;;  %v3400_v44 = vld [vmem:[%s5346_s17 + $0x3a8] sm:$0xff]  ;;  %v3350_v31 = vld [vmem:[%s5346_s17 + $0x218] sm:$0xff] }
 0xf66   :  { %3578 = vmatpush.msrb.mxu2 %v3302_v45  ;;  %3624 = vmatpush.msrb.mxu3 %v3334_v46  ;;  %v3382_v45 = vld [vmem:[%s5346_s17 + $0x318] sm:$0xff]  ;;  %v3367_v46 = vld [vmem:[%s5346_s17 + $0x2a0] sm:$0xff] }
 0xf67   :  { %3556 = vmatpush.msra.mxu0 %v3285_v47  ;;  %3602 = vmatpush.msra.mxu1 %v3317_v49  ;;  %v3399_v47 = vld [vmem:[%s5346_s17 + $0x3a0] sm:$0xff] }
 0xf68   :  { %3579 = vmatpush.msrb.mxu2 %v3301_v50  ;;  %3625 = vmatpush.msrb.mxu3 %v3333_v51  ;;  %v5517_v49 = vld [vmem:[%s5493_s20] sm:$0xff]  ;;  %v3349_v50 = vld [vmem:[%s5346_s17 + $0x210] sm:$0xff] }
 0xf69   :  { %3557 = vmatpush.msra.mxu0 %v3284_v53  ;;  %3603 = vmatpush.msra.mxu1 %v3316_v54  ;;  %v3381_v51 = vld [vmem:[%s5346_s17 + $0x310] sm:$0xff]  ;;  %v3366_v53 = vld [vmem:[%s5346_s17 + $0x298] sm:$0xff] }
 0xf6a   :  { %3580 = vmatpush.msrb.mxu2 %v3300_v55  ;;  %3626 = vmatpush.msrb.mxu3 %v3332_v56  ;;  %v3398_v54 = vld [vmem:[%s5346_s17 + $0x398] sm:$0xff]  ;;  %v3348_v55 = vld [vmem:[%s5346_s17 + $0x208] sm:$0xff] }
 0xf6b   :  { %3558 = vmatpush.msra.mxu0 %v3283_v12  ;;  %3604 = vmatpush.msra.mxu1 %v3315_v58  ;;  %v3380_v56 = vld [vmem:[%s5346_s17 + $0x308] sm:$0xff]  ;;  %v2845_v12 = vperm.slane %v5517_v49, 0  ;;  %v3365_v58 = vld [vmem:[%s5346_s17 + $0x290] sm:$0xff] }
 0xf6c   :  { %3581 = vmatpush.msrb.mxu2 %v3299_v16  ;;  %3627 = vmatpush.msrb.mxu3 %v3331_v1  ;;  %v3347_v16 = vld [vmem:[%s5346_s17 + $0x200] sm:$0xff] }
 0xf6d   :  { %3635 = vmatpush.msrb.mxu0 %v3362_v63  ;;  %3681 = vmatpush.msrb.mxu1 %v3394_v0  ;;  %v3397_v63 = vld [vmem:[%s5346_s17 + $0x390] sm:$0xff]  ;;  %v2847_v0 = vperm.slane %v5517_v49, 2  ;;  %v3379_v1 = vld [vmem:[%s5346_s17 + $0x300] sm:$0xff] }
 0xf6e   :  { %3658 = vmatpush.msra.mxu2 %v3378_v4  ;;  %3704 = vmatpush.msra.mxu3 %v3410_v5 }
 0xf6f   :  { %3636 = vmatpush.msrb.mxu0 %v3361_v2  ;;  %3682 = vmatpush.msrb.mxu1 %v3393_v19  ;;  %v3364_v2 = vld [vmem:[%s5346_s17 + $0x288] sm:$0xff] }
 0xf70   :  { %3659 = vmatpush.msra.mxu2 %v3377_v7  ;;  %3705 = vmatpush.msra.mxu3 %v3409_v8  ;;  %v3396_v19 = vld [vmem:[%s5346_s17 + $0x388] sm:$0xff]  ;;  %v3395_v7 = vld [vmem:[%s5346_s17 + $0x380] sm:$0xff] }
 0xf71   :  { %3637 = vmatpush.msrb.mxu0 %v3360_v40  ;;  %3683 = vmatpush.msrb.mxu1 %v3392_v6  ;;  %v3363_v6 = vld [vmem:[%s5346_s17 + $0x280] sm:$0xff] }
 0xf72   :  { %3660 = vmatpush.msra.mxu2 %v3376_v10  ;;  %3706 = vmatpush.msra.mxu3 %v3408_v11  ;;  %v3426_v10 = vld [vmem:[%s5346_s17 + $0x478] sm:$0xff] }
 0xf73   :  { %3638 = vmatpush.msrb.mxu0 %v3359_v32  ;;  %3684 = vmatpush.msrb.mxu1 %v3391_v21  ;;  %v2846_v21 = vperm.slane %v5517_v49, 1 }
 0xf74   :  { %3661 = vmatpush.msra.mxu2 %v3375_v15  ;;  %3707 = vmatpush.msra.mxu3 %v3407_v23  ;;  %v3425_v15 = vld [vmem:[%s5346_s17 + $0x470] sm:$0xff] }
 0xf75   :  { %3639 = vmatpush.msrb.mxu0 %v3358_v13  ;;  %3685 = vmatpush.msrb.mxu1 %v3390_v14  ;;  %v2848_v13 = vperm.slane %v5517_v49, 3  ;;  %v3458_v14 = vld [vmem:[%s5346_s17 + $0x578] sm:$0xff] }
 0xf76   :  { %3662 = vmatpush.msra.mxu2 %v3374_v9  ;;  %3708 = vmatpush.msra.mxu3 %v3406_v18  ;;  %v3424_v18 = vld [vmem:[%s5346_s17 + $0x468] sm:$0xff] }
 0xf77   :  { %3640 = vmatpush.msrb.mxu0 %v3357_v17  ;;  %3686 = vmatpush.msrb.mxu1 %v3389_v42  ;;  %v3457_v17 = vld [vmem:[%s5346_s17 + $0x570] sm:$0xff] }
 0xf78   :  { %3663 = vmatpush.msra.mxu2 %v3373_v3  ;;  %3709 = vmatpush.msra.mxu3 %v3405_v24  ;;  %v3423_v24 = vld [vmem:[%s5346_s17 + $0x460] sm:$0xff] }
 0xf79   :  { %3641 = vmatpush.msrb.mxu0 %v3356_v20  ;;  %3687 = vmatpush.msrb.mxu1 %v3388_v22  ;;  %v3456_v22 = vld [vmem:[%s5346_s17 + $0x568] sm:$0xff] }
 0xf7a   :  { %3664 = vmatpush.msra.mxu2 %v3372_v43  ;;  %3710 = vmatpush.msra.mxu3 %v3404_v26  ;;  %v3455_v43 = vld [vmem:[%s5346_s17 + $0x560] sm:$0xff]  ;;  %v3474_v26 = vld [vmem:[%s5346_s17 + $0x5f8] sm:$0xff] }
 0xf7b   :  { %3642 = vmatpush.msrb.mxu0 %v3355_v48  ;;  %3688 = vmatpush.msrb.mxu1 %v3387_v25  ;;  %v3442_v25 = vld [vmem:[%s5346_s17 + $0x4f8] sm:$0xff] }
 0xf7c   :  { %3665 = vmatpush.msra.mxu2 %v3371_v29  ;;  %3711 = vmatpush.msra.mxu3 %v3403_v30  ;;  %v3454_v29 = vld [vmem:[%s5346_s17 + $0x558] sm:$0xff]  ;;  %v3473_v30 = vld [vmem:[%s5346_s17 + $0x5f0] sm:$0xff] }
 0xf7d   :  { %3643 = vmatpush.msrb.mxu0 %v3354_v27  ;;  %3689 = vmatpush.msrb.mxu1 %v3386_v28  ;;  %v3422_v27 = vld [vmem:[%s5346_s17 + $0x458] sm:$0xff]  ;;  %v3441_v28 = vld [vmem:[%s5346_s17 + $0x4f0] sm:$0xff] }
 0xf7e   :  { %3666 = vmatpush.msra.mxu2 %v3370_v52  ;;  %3712 = vmatpush.msra.mxu3 %v3402_v35  ;;  %v3453_v52 = vld [vmem:[%s5346_s17 + $0x550] sm:$0xff]  ;;  %v3472_v35 = vld [vmem:[%s5346_s17 + $0x5e8] sm:$0xff] }
 0xf7f   :  { %3644 = vmatpush.msrb.mxu0 %v3353_v33  ;;  %3690 = vmatpush.msrb.mxu1 %v3385_v34  ;;  %v3421_v33 = vld [vmem:[%s5346_s17 + $0x450] sm:$0xff]  ;;  %v3440_v34 = vld [vmem:[%s5346_s17 + $0x4e8] sm:$0xff] }
 0xf80   :  { %3667 = vmatpush.msra.mxu2 %v3369_v57  ;;  %3713 = vmatpush.msra.mxu3 %v3401_v38  ;;  %v3452_v57 = vld [vmem:[%s5346_s17 + $0x548] sm:$0xff]  ;;  %v3471_v38 = vld [vmem:[%s5346_s17 + $0x5e0] sm:$0xff] }
 0xf81   :  { %3645 = vmatpush.msrb.mxu0 %v3352_v36  ;;  %3691 = vmatpush.msrb.mxu1 %v3384_v37  ;;  %v3420_v36 = vld [vmem:[%s5346_s17 + $0x448] sm:$0xff]  ;;  %v3439_v37 = vld [vmem:[%s5346_s17 + $0x4e0] sm:$0xff] }
 0xf82   :  { %3668 = vmatpush.msra.mxu2 %v3368_v61  ;;  %3714 = vmatpush.msra.mxu3 %v3400_v44  ;;  %v3451_v61 = vld [vmem:[%s5346_s17 + $0x540] sm:$0xff]  ;;  %v3470_v44 = vld [vmem:[%s5346_s17 + $0x5d8] sm:$0xff] }
 0xf83   :  { %3646 = vmatpush.msrb.mxu0 %v3351_v39  ;;  %3692 = vmatpush.msrb.mxu1 %v3383_v59  ;;  %v3419_v39 = vld [vmem:[%s5346_s17 + $0x440] sm:$0xff]  ;;  %v3438_v59 = vld [vmem:[%s5346_s17 + $0x4d8] sm:$0xff] }
 0xf84   :  { %3669 = vmatpush.msra.mxu2 %v3367_v46  ;;  %3715 = vmatpush.msra.mxu3 %v3399_v47  ;;  %v3450_v46 = vld [vmem:[%s5346_s17 + $0x538] sm:$0xff]  ;;  %v3469_v47 = vld [vmem:[%s5346_s17 + $0x5d0] sm:$0xff] }
 0xf85   :  { %3647 = vmatpush.msrb.mxu0 %v3350_v31  ;;  %3693 = vmatpush.msrb.mxu1 %v3382_v45  ;;  %v3418_v31 = vld [vmem:[%s5346_s17 + $0x438] sm:$0xff]  ;;  %v3437_v45 = vld [vmem:[%s5346_s17 + $0x4d0] sm:$0xff] }
 0xf86   :  { %3670 = vmatpush.msra.mxu2 %v3366_v53  ;;  %3716 = vmatpush.msra.mxu3 %v3398_v54  ;;  %v3449_v53 = vld [vmem:[%s5346_s17 + $0x530] sm:$0xff]  ;;  %v3468_v54 = vld [vmem:[%s5346_s17 + $0x5c8] sm:$0xff] }
 0xf87   :  { %3648 = vmatpush.msrb.mxu0 %v3349_v50  ;;  %3694 = vmatpush.msrb.mxu1 %v3381_v51  ;;  %v3417_v50 = vld [vmem:[%s5346_s17 + $0x430] sm:$0xff]  ;;  %v3436_v51 = vld [vmem:[%s5346_s17 + $0x4c8] sm:$0xff] }
 0xf88   :  { %3671 = vmatpush.msra.mxu2 %v3365_v58  ;;  %3717 = vmatpush.msra.mxu3 %v3397_v63  ;;  %v3448_v58 = vld [vmem:[%s5346_s17 + $0x528] sm:$0xff]  ;;  %v3467_v63 = vld [vmem:[%s5346_s17 + $0x5c0] sm:$0xff] }
 0xf89   :  { %3649 = vmatpush.msrb.mxu0 %v3348_v55  ;;  %3695 = vmatpush.msrb.mxu1 %v3380_v56  ;;  %v2900_v4 = vpop.f32.mrf.mxu0  ;;  %v3416_v55 = vld [vmem:[%s5346_s17 + $0x428] sm:$0xff]  ;;  %v3435_v56 = vld [vmem:[%s5346_s17 + $0x4c0] sm:$0xff] }
 0xf8a   :  { %v2901_v5 = vadd.f32 %v2900_v4, %v2845_v12  ;;  %v2946_v40 = vpop.f32.mrf.mxu1  ;;  %3672 = vmatpush.msra.mxu2 %v3364_v2  ;;  %3718 = vmatpush.msra.mxu3 %v3396_v19  ;;  %v3447_v2 = vld [vmem:[%s5346_s17 + $0x520] sm:$0xff]  ;;  %v3466_v19 = vld [vmem:[%s5346_s17 + $0x5b8] sm:$0xff] }
 0xf8b   :  { %3650 = vmatpush.msrb.mxu0 %v3347_v16  ;;  %3696 = vmatpush.msrb.mxu1 %v3379_v1  ;;  %v2947_v8 = vadd.f32 %v2946_v40, %v2847_v0  ;;  %v3415_v16 = vld [vmem:[%s5346_s17 + $0x420] sm:$0xff]  ;;  %v3434_v1 = vld [vmem:[%s5346_s17 + $0x4b8] sm:$0xff] }
 0xf8c   :  { %v3251_v32 = vmax.f32 %v2901_v5, 0.0  ;;  %3673 = vmatpush.msra.mxu2 %v3363_v6  ;;  %3719 = vmatpush.msra.mxu3 %v3395_v7  ;;  %v3414_v4 = vld [vmem:[%s5346_s17 + $0x418] sm:$0xff]  ;;  %v3433_v5 = vld [vmem:[%s5346_s17 + $0x4b0] sm:$0xff] }
 0xf8d   :  { %v3253_v11 = vmax.f32 %v2947_v8, 0.0  ;;  %v3446_v40 = vld [vmem:[%s5346_s17 + $0x518] sm:$0xff]  ;;  %v3465_v6 = vld [vmem:[%s5346_s17 + $0x5b0] sm:$0xff]  ;;  %v3432_v8 = vld [vmem:[%s5346_s17 + $0x4a8] sm:$0xff] }
 0xf8e   :  { %3559 = vmatmul.f32.vlgmr.msra.gmra.mxu0 %v3251_v32  ;;  %v3413_v7 = vld [vmem:[%s5346_s17 + $0x410] sm:$0xff] }
 0xf8f   :  { %3605 = vmatmul.f32.vlgmr.msra.gmra.mxu1 %v3253_v11  ;;  %v2923_v23 = vpop.f32.mrf.mxu2  ;;  %3727 = vmatpush.msra.mxu0 %v3426_v10  ;;  %v3445_v32 = vld [vmem:[%s5346_s17 + $0x510] sm:$0xff]  ;;  %v3464_v10 = vld [vmem:[%s5346_s17 + $0x5a8] sm:$0xff] }
 0xf90   :  { %v2924_v42 = vadd.f32 %v2923_v23, %v2846_v21  ;;  %v2969_v9 = vpop.f32.mrf.mxu3  ;;  %3773 = vmatpush.msra.mxu1 %v3458_v14  ;;  %v3412_v11 = vld [vmem:[%s5346_s17 + $0x408] sm:$0xff]  ;;  %v3431_v14 = vld [vmem:[%s5346_s17 + $0x4a0] sm:$0xff] }
 0xf91   :  { %v2970_v20 = vadd.f32 %v2969_v9, %v2848_v13  ;;  %3728 = vmatpush.msra.mxu0 %v3425_v15  ;;  %v3444_v15 = vld [vmem:[%s5346_s17 + $0x508] sm:$0xff] }
 0xf92   :  { %v3252_v3 = vmax.f32 %v2924_v42, 0.0  ;;  %3774 = vmatpush.msra.mxu1 %v3457_v17  ;;  %v3463_v17 = vld [vmem:[%s5346_s17 + $0x5a0] sm:$0xff] }
 0xf93   :  { %v3254_v48 = vmax.f32 %v2970_v20, 0.0  ;;  %3729 = vmatpush.msra.mxu0 %v3424_v18  ;;  %v3411_v42 = vld [vmem:[%s5346_s17 + $0x400] sm:$0xff]  ;;  %v3430_v20 = vld [vmem:[%s5346_s17 + $0x498] sm:$0xff] }
 0xf94   :  { %3582 = vmatmul.f32.vlgmr.msrb.gmra.mxu2 %v3252_v3  ;;  %3775 = vmatpush.msra.mxu1 %v3456_v22  ;;  %v3443_v22 = vld [vmem:[%s5346_s17 + $0x500] sm:$0xff] }
 0xf95   :  { %3628 = vmatmul.f32.vlgmr.msrb.gmra.mxu3 %v3254_v48  ;;  %3730 = vmatpush.msra.mxu0 %v3423_v24  ;;  %v3462_v24 = vld [vmem:[%s5346_s17 + $0x598] sm:$0xff] }
 0xf96   :  { %3750 = vmatpush.msrb.mxu2 %v3442_v25  ;;  %3776 = vmatpush.msra.mxu1 %v3455_v43  ;;  %v3429_v25 = vld [vmem:[%s5346_s17 + $0x490] sm:$0xff] }
 0xf97   :  { %3796 = vmatpush.msrb.mxu3 %v3474_v26  ;;  %3731 = vmatpush.msra.mxu0 %v3422_v27  ;;  %v2849_v26 = vperm.slane %v5517_v49, 4  ;;  %v3428_v27 = vld [vmem:[%s5346_s17 + $0x488] sm:$0xff] }
 0xf98   :  { %3751 = vmatpush.msrb.mxu2 %v3441_v28  ;;  %3777 = vmatpush.msra.mxu1 %v3454_v29  ;;  %v2851_v28 = vperm.slane %v5517_v49, 6  ;;  %v3460_v29 = vld [vmem:[%s5346_s17 + $0x588] sm:$0xff] }
 0xf99   :  { %3797 = vmatpush.msrb.mxu3 %v3473_v30  ;;  %3732 = vmatpush.msra.mxu0 %v3421_v33 }
 0xf9a   :  { %3752 = vmatpush.msrb.mxu2 %v3440_v34  ;;  %3778 = vmatpush.msra.mxu1 %v3453_v52  ;;  %v3427_v34 = vld [vmem:[%s5346_s17 + $0x480] sm:$0xff] }
 0xf9b   :  { %3798 = vmatpush.msrb.mxu3 %v3472_v35  ;;  %3733 = vmatpush.msra.mxu0 %v3420_v36  ;;  %v3459_v36 = vld [vmem:[%s5346_s17 + $0x580] sm:$0xff] }
 0xf9c   :  { %3753 = vmatpush.msrb.mxu2 %v3439_v37  ;;  %3779 = vmatpush.msra.mxu1 %v3452_v57 }
 0xf9d   :  { %3799 = vmatpush.msrb.mxu3 %v3471_v38  ;;  %3734 = vmatpush.msra.mxu0 %v3419_v39 }
 0xf9e   :  { %3754 = vmatpush.msrb.mxu2 %v3438_v59  ;;  %3780 = vmatpush.msra.mxu1 %v3451_v61  ;;  %v2850_v61 = vperm.slane %v5517_v49, 5 }
 0xf9f   :  { %3800 = vmatpush.msrb.mxu3 %v3470_v44  ;;  %3735 = vmatpush.msra.mxu0 %v3418_v31  ;;  %v3490_v44 = vld [vmem:[%s5346_s17 + $0x678] sm:$0xff]  ;;  %v2852_v31 = vperm.slane %v5517_v49, 7  ;;  %v3520_v49 = vld [vmem:[%s5346_s17 + $0x768] sm:$0xff] }
 0xfa0   :  { %3755 = vmatpush.msrb.mxu2 %v3437_v45  ;;  %3781 = vmatpush.msra.mxu1 %v3450_v46  ;;  %v3522_v45 = vld [vmem:[%s5346_s17 + $0x778] sm:$0xff]  ;;  %v3489_v46 = vld [vmem:[%s5346_s17 + $0x670] sm:$0xff] }
 0xfa1   :  { %3801 = vmatpush.msrb.mxu3 %v3469_v47  ;;  %3736 = vmatpush.msra.mxu0 %v3417_v50  ;;  %v3521_v50 = vld [vmem:[%s5346_s17 + $0x770] sm:$0xff] }
 0xfa2   :  { %3756 = vmatpush.msrb.mxu2 %v3436_v51  ;;  %3782 = vmatpush.msra.mxu1 %v3449_v53 }
 0xfa3   :  { %3802 = vmatpush.msrb.mxu3 %v3468_v54  ;;  %3737 = vmatpush.msra.mxu0 %v3416_v55  ;;  %v3488_v54 = vld [vmem:[%s5346_s17 + $0x668] sm:$0xff] }
 0xfa4   :  { %3757 = vmatpush.msrb.mxu2 %v3435_v56  ;;  %3783 = vmatpush.msra.mxu1 %v3448_v58 }
 0xfa5   :  { %3803 = vmatpush.msrb.mxu3 %v3467_v63  ;;  %3738 = vmatpush.msra.mxu0 %v3415_v16 }
 0xfa6   :  { %3758 = vmatpush.msrb.mxu2 %v3434_v1  ;;  %3784 = vmatpush.msra.mxu1 %v3447_v2  ;;  %v3487_v1 = vld [vmem:[%s5346_s17 + $0x660] sm:$0xff] }
 0xfa7   :  { %3804 = vmatpush.msrb.mxu3 %v3466_v19  ;;  %3739 = vmatpush.msra.mxu0 %v3414_v4  ;;  %v3506_v4 = vld [vmem:[%s5346_s17 + $0x6f8] sm:$0xff] }
 0xfa8   :  { %3759 = vmatpush.msrb.mxu2 %v3433_v5  ;;  %3785 = vmatpush.msra.mxu1 %v3446_v40  ;;  %v3519_v5 = vld [vmem:[%s5346_s17 + $0x760] sm:$0xff]  ;;  %v5631_v40 = vld [vmem:[%s5493_s20 + $0x8] sm:$0xff] }
 0xfa9   :  { %3805 = vmatpush.msrb.mxu3 %v3465_v6  ;;  %3740 = vmatpush.msra.mxu0 %v3413_v7  ;;  %v3538_v7 = vld [vmem:[%s5346_s17 + $0x7f8] sm:$0xff] }
 0xfaa   :  { %v2903_v23 = vpop.f32.mrf.mxu0  ;;  %3760 = vmatpush.msrb.mxu2 %v3432_v8  ;;  %3786 = vmatpush.msra.mxu1 %v3445_v32  ;;  %v3486_v32 = vld [vmem:[%s5346_s17 + $0x658] sm:$0xff] }
 0xfab   :  { %v2904_v9 = vadd.f32 %v2903_v23, %v2845_v12  ;;  %v2949_v18 = vpop.f32.mrf.mxu1  ;;  %3806 = vmatpush.msrb.mxu3 %v3464_v10  ;;  %3741 = vmatpush.msra.mxu0 %v3412_v11  ;;  %v3461_v12 = vld [vmem:[%s5346_s17 + $0x590] sm:$0xff]  ;;  %v3518_v11 = vld [vmem:[%s5346_s17 + $0x758] sm:$0xff] }
 0xfac   :  { %v2950_v3 = vadd.f32 %v2949_v18, %v2847_v0  ;;  %3761 = vmatpush.msrb.mxu2 %v3431_v14  ;;  %3787 = vmatpush.msra.mxu1 %v3444_v15  ;;  %v3505_v10 = vld [vmem:[%s5346_s17 + $0x6f0] sm:$0xff]  ;;  %v2853_v14 = vperm.slane %v5631_v40, 0 }
 0xfad   :  { %v3267_v48 = vmax.f32 %v2904_v9, 0.0  ;;  %3807 = vmatpush.msrb.mxu3 %v3463_v17  ;;  %3742 = vmatpush.msra.mxu0 %v3411_v42  ;;  %v3537_v23 = vld [vmem:[%s5346_s17 + $0x7f0] sm:$0xff]  ;;  %v2855_v17 = vperm.slane %v5631_v40, 2 }
 0xfae   :  { %v3269_v43 = vmax.f32 %v2950_v3, 0.0  ;;  %3762 = vmatpush.msrb.mxu2 %v3430_v20  ;;  %3788 = vmatpush.msra.mxu1 %v3443_v22  ;;  %v3485_v42 = vld [vmem:[%s5346_s17 + $0x650] sm:$0xff]  ;;  %v3504_v20 = vld [vmem:[%s5346_s17 + $0x6e8] sm:$0xff] }
 0xfaf   :  { %3562 = vmatmul.f32.gmra.mxu0 %v3267_v48  ;;  %3808 = vmatpush.msrb.mxu3 %v3462_v24  ;;  %v3517_v22 = vld [vmem:[%s5346_s17 + $0x750] sm:$0xff]  ;;  %v3536_v48 = vld [vmem:[%s5346_s17 + $0x7e8] sm:$0xff] }
 0xfb0   :  { %3608 = vmatmul.f32.gmra.mxu1 %v3269_v43  ;;  %v2926_v0 = vpop.f32.mrf.mxu2  ;;  %3763 = vmatpush.msrb.mxu2 %v3429_v25  ;;  %v3484_v25 = vld [vmem:[%s5346_s17 + $0x648] sm:$0xff] }
 0xfb1   :  { %v2927_v30 = vadd.f32 %v2926_v0, %v2846_v21  ;;  %v2972_v33 = vpop.f32.mrf.mxu3  ;;  %3809 = vmatpush.msrb.mxu3 %v3461_v12  ;;  %v3516_v0 = vld [vmem:[%s5346_s17 + $0x748] sm:$0xff] }
 0xfb2   :  { %v2973_v52 = vadd.f32 %v2972_v33, %v2848_v13  ;;  %v2992_v35 = vpop.f32.mrf.mxu0  ;;  %3764 = vmatpush.msrb.mxu2 %v3428_v27  ;;  %v3503_v27 = vld [vmem:[%s5346_s17 + $0x6e0] sm:$0xff] }
 0xfb3   :  { %v3268_v37 = vmax.f32 %v2927_v30, 0.0  ;;  %v2993_v57 = vadd.f32 %v2992_v35, %v2849_v26  ;;  %v3038_v38 = vpop.f32.mrf.mxu1  ;;  %3810 = vmatpush.msrb.mxu3 %v3460_v29  ;;  %v3535_v30 = vld [vmem:[%s5346_s17 + $0x7e0] sm:$0xff]  ;;  %v3502_v35 = vld [vmem:[%s5346_s17 + $0x6d8] sm:$0xff] }
 0xfb4   :  { %v3270_v39 = vmax.f32 %v2973_v52, 0.0  ;;  %v3039_v59 = vadd.f32 %v3038_v38, %v2851_v28  ;;  %3765 = vmatpush.msrb.mxu2 %v3427_v34  ;;  %v3483_v33 = vld [vmem:[%s5346_s17 + $0x640] sm:$0xff]  ;;  %v2854_v34 = vperm.slane %v5631_v40, 1  ;;  %v3534_v38 = vld [vmem:[%s5346_s17 + $0x7d8] sm:$0xff] }
 0xfb5   :  { %v3255_v21 = vmax.f32 %v2993_v57, 0.0  ;;  %3585 = vmatmul.f32.gmra.mxu2 %v3268_v37  ;;  %3811 = vmatpush.msrb.mxu3 %v3459_v36  ;;  %v3515_v36 = vld [vmem:[%s5346_s17 + $0x740] sm:$0xff]  ;;  %v2856_v37 = vperm.slane %v5631_v40, 3 }
 0xfb6   :  { %v3257_v13 = vmax.f32 %v3039_v59, 0.0  ;;  %3631 = vmatmul.f32.gmra.mxu3 %v3270_v39  ;;  %v3482_v59 = vld [vmem:[%s5346_s17 + $0x638] sm:$0xff] }
 0xfb7   :  { %3651 = vmatmul.f32.vlgmr.msrb.gmra.mxu0 %v3255_v21 }
 0xfb8   :  { %3697 = vmatmul.f32.vlgmr.msrb.gmra.mxu1 %v3257_v13  ;;  %v3015_v47 = vpop.f32.mrf.mxu2  ;;  %3819 = vmatpush.msrb.mxu0 %v3490_v44  ;;  %v3501_v44 = vld [vmem:[%s5346_s17 + $0x6d0] sm:$0xff]  ;;  %v3514_v13 = vld [vmem:[%s5346_s17 + $0x738] sm:$0xff] }
 0xfb9   :  { %v3016_v51 = vadd.f32 %v3015_v47, %v2850_v61  ;;  %v3061_v53 = vpop.f32.mrf.mxu3  ;;  %3865 = vmatpush.msrb.mxu1 %v3522_v45  ;;  %v3533_v45 = vld [vmem:[%s5346_s17 + $0x7d0] sm:$0xff] }
 0xfba   :  { %v3062_v55 = vadd.f32 %v3061_v53, %v2852_v31  ;;  %v2995_v56 = vpop.f32.mrf.mxu0  ;;  %3820 = vmatpush.msrb.mxu0 %v3489_v46  ;;  %v3481_v47 = vld [vmem:[%s5346_s17 + $0x630] sm:$0xff] }
 0xfbb   :  { %v3256_v58 = vmax.f32 %v3016_v51, 0.0  ;;  %v2996_v63 = vadd.f32 %v2995_v56, %v2849_v26  ;;  %v3041_v16 = vpop.f32.mrf.mxu1  ;;  %3866 = vmatpush.msrb.mxu1 %v3521_v50  ;;  %v3500_v51 = vld [vmem:[%s5346_s17 + $0x6c8] sm:$0xff]  ;;  %v3513_v53 = vld [vmem:[%s5346_s17 + $0x730] sm:$0xff] }
 0xfbc   :  { %v3258_v2 = vmax.f32 %v3062_v55, 0.0  ;;  %v3042_v19 = vadd.f32 %v3041_v16, %v2851_v28  ;;  %3821 = vmatpush.msrb.mxu0 %v3488_v54  ;;  %v3532_v55 = vld [vmem:[%s5346_s17 + $0x7c8] sm:$0xff] }
 0xfbd   :  { %v3271_v6 = vmax.f32 %v2996_v63, 0.0  ;;  %3867 = vmatpush.msrb.mxu1 %v3520_v49  ;;  %3674 = vmatmul.f32.vlgmr.msra.gmra.mxu2 %v3256_v58  ;;  %v3480_v56 = vld [vmem:[%s5346_s17 + $0x628] sm:$0xff]  ;;  %v3499_v63 = vld [vmem:[%s5346_s17 + $0x6c0] sm:$0xff] }
 0xfbe   :  { %v3273_v8 = vmax.f32 %v3042_v19, 0.0  ;;  %3720 = vmatmul.f32.vlgmr.msra.gmra.mxu3 %v3258_v2  ;;  %3822 = vmatpush.msrb.mxu0 %v3487_v1  ;;  %v3512_v16 = vld [vmem:[%s5346_s17 + $0x728] sm:$0xff]  ;;  %v3531_v2 = vld [vmem:[%s5346_s17 + $0x7c0] sm:$0xff] }
 0xfbf   :  { %3842 = vmatpush.msra.mxu2 %v3506_v4  ;;  %3868 = vmatpush.msrb.mxu1 %v3519_v5  ;;  %v3479_v19 = vld [vmem:[%s5346_s17 + $0x620] sm:$0xff]  ;;  %v3498_v5 = vld [vmem:[%s5346_s17 + $0x6b8] sm:$0xff] }
 0xfc0   :  { %3888 = vmatpush.msra.mxu3 %v3538_v7  ;;  %3654 = vmatmul.f32.gmra.mxu0 %v3271_v6  ;;  %v3018_v15 = vpop.f32.mrf.mxu2  ;;  %v3511_v6 = vld [vmem:[%s5346_s17 + $0x720] sm:$0xff] }
 0xfc1   :  { %3700 = vmatmul.f32.gmra.mxu1 %v3273_v8  ;;  %v3019_v9 = vadd.f32 %v3018_v15, %v2850_v61  ;;  %v3064_v18 = vpop.f32.mrf.mxu3  ;;  %3823 = vmatpush.msrb.mxu0 %v3486_v32  ;;  %v3530_v32 = vld [vmem:[%s5346_s17 + $0x7b8] sm:$0xff] }
 0xfc2   :  { %v3065_v3 = vadd.f32 %v3064_v18, %v2852_v31  ;;  %3843 = vmatpush.msra.mxu2 %v3505_v10  ;;  %3869 = vmatpush.msrb.mxu1 %v3518_v11  ;;  %v3084_v24 = vpop.f32.mrf.mxu0  ;;  %v3478_v11 = vld [vmem:[%s5346_s17 + $0x618] sm:$0xff] }
 0xfc3   :  { %v3272_v43 = vmax.f32 %v3019_v9, 0.0  ;;  %3889 = vmatpush.msra.mxu3 %v3537_v23  ;;  %v3085_v12 = vadd.f32 %v3084_v24, %v2853_v14  ;;  %v3130_v26 = vpop.f32.mrf.mxu1  ;;  %3824 = vmatpush.msrb.mxu0 %v3485_v42  ;;  %v3510_v42 = vld [vmem:[%s5346_s17 + $0x718] sm:$0xff]  ;;  %v2859_v9 = vperm.slane %v5631_v40, 6  ;;  %v3496_v24 = vld [vmem:[%s5346_s17 + $0x6a8] sm:$0xff] }
 0xfc4   :  { %v3274_v28 = vmax.f32 %v3065_v3, 0.0  ;;  %v3131_v29 = vadd.f32 %v3130_v26, %v2855_v17  ;;  %3844 = vmatpush.msra.mxu2 %v3504_v20  ;;  %3870 = vmatpush.msrb.mxu1 %v3517_v22  ;;  %v3529_v22 = vld [vmem:[%s5346_s17 + $0x7b0] sm:$0xff] }
 0xfc5   :  { %3890 = vmatpush.msra.mxu3 %v3536_v48  ;;  %3825 = vmatpush.msrb.mxu0 %v3484_v25  ;;  %v3259_v52 = vmax.f32 %v3085_v12, 0.0  ;;  %v3477_v3 = vld [vmem:[%s5346_s17 + $0x610] sm:$0xff]  ;;  %v3476_v12 = vld [vmem:[%s5346_s17 + $0x608] sm:$0xff] }
 0xfc6   :  { %3845 = vmatpush.msra.mxu2 %v3503_v27  ;;  %3871 = vmatpush.msrb.mxu1 %v3516_v0  ;;  %v3261_v57 = vmax.f32 %v3131_v29, 0.0  ;;  %v3509_v48 = vld [vmem:[%s5346_s17 + $0x710] sm:$0xff]  ;;  %v3495_v0 = vld [vmem:[%s5346_s17 + $0x6a0] sm:$0xff] }
 0xfc7   :  { %3891 = vmatpush.msra.mxu3 %v3535_v30  ;;  %3677 = vmatmul.f32.gmra.mxu2 %v3272_v43  ;;  %v3528_v43 = vld [vmem:[%s5346_s17 + $0x7a8] sm:$0xff]  ;;  %v3527_v30 = vld [vmem:[%s5346_s17 + $0x7a0] sm:$0xff] }
 0xfc8   :  { %3723 = vmatmul.f32.gmra.mxu3 %v3274_v28  ;;  %3826 = vmatpush.msrb.mxu0 %v3483_v33  ;;  %v3107_v39 = vpop.f32.mrf.mxu2  ;;  %v3508_v28 = vld [vmem:[%s5346_s17 + $0x708] sm:$0xff]  ;;  %v2858_v33 = vperm.slane %v5631_v40, 5 }
 0xfc9   :  { %3846 = vmatpush.msra.mxu2 %v3502_v35  ;;  %3872 = vmatpush.msrb.mxu1 %v3515_v36  ;;  %v3108_v21 = vadd.f32 %v3107_v39, %v2854_v34  ;;  %v3153_v61 = vpop.f32.mrf.mxu3  ;;  %v2860_v35 = vperm.slane %v5631_v40, 7 }
 0xfca   :  { %3892 = vmatpush.msra.mxu3 %v3534_v38  ;;  %3743 = vmatmul.f32.vlgmr.msra.gmra.mxu0 %v3259_v52  ;;  %v3154_v31 = vadd.f32 %v3153_v61, %v2856_v37  ;;  %v3087_v46 = vpop.f32.mrf.mxu0  ;;  %v3475_v52 = vld [vmem:[%s5346_s17 + $0x600] sm:$0xff] }
 0xfcb   :  { %3789 = vmatmul.f32.vlgmr.msra.gmra.mxu1 %v3261_v57  ;;  %3827 = vmatpush.msrb.mxu0 %v3482_v59  ;;  %v3133_v50 = vpop.f32.mrf.mxu1  ;;  %v3088_v54 = vadd.f32 %v3087_v46, %v2853_v14  ;;  %v3260_v49 = vmax.f32 %v3108_v21, 0.0  ;;  %v2857_v14 = vperm.slane %v5631_v40, 4  ;;  %v3494_v57 = vld [vmem:[%s5346_s17 + $0x698] sm:$0xff]  ;;  %v3507_v38 = vld [vmem:[%s5346_s17 + $0x700] sm:$0xff]  ;;  %v3492_v46 = vld [vmem:[%s5346_s17 + $0x688] sm:$0xff] }
 0xfcc   :  { %3847 = vmatpush.msra.mxu2 %v3501_v44  ;;  %3873 = vmatpush.msrb.mxu1 %v3514_v13  ;;  %v3134_v58 = vadd.f32 %v3133_v50, %v2855_v17  ;;  %v3262_v1 = vmax.f32 %v3154_v31, 0.0  ;;  %v3497_v17 = vld [vmem:[%s5346_s17 + $0x6b0] sm:$0xff]  ;;  %v3526_v59 = vld [vmem:[%s5346_s17 + $0x798] sm:$0xff]  ;;  %v3524_v50 = vld [vmem:[%s5346_s17 + $0x788] sm:$0xff] }
 0xfcd   :  { %3893 = vmatpush.msra.mxu3 %v3533_v45  ;;  %3828 = vmatpush.msrb.mxu0 %v3481_v47  ;;  %v3275_v4 = vmax.f32 %v3088_v54, 0.0  ;;  %v3493_v44 = vld [vmem:[%s5346_s17 + $0x690] sm:$0xff] }
 0xfce   :  { %3848 = vmatpush.msra.mxu2 %v3500_v51  ;;  %3874 = vmatpush.msrb.mxu1 %v3513_v53  ;;  %v3277_v8 = vmax.f32 %v3134_v58, 0.0  ;;  %v3525_v31 = vld [vmem:[%s5346_s17 + $0x790] sm:$0xff]  ;;  %v3491_v53 = vld [vmem:[%s5346_s17 + $0x680] sm:$0xff] }
 0xfcf   :  { %3894 = vmatpush.msra.mxu3 %v3532_v55  ;;  %3829 = vmatpush.msrb.mxu0 %v3480_v56  ;;  %v3523_v55 = vld [vmem:[%s5346_s17 + $0x780] sm:$0xff] }
 0xfd0   :  { %3849 = vmatpush.msra.mxu2 %v3499_v63  ;;  %3875 = vmatpush.msrb.mxu1 %v3512_v16  ;;  %v3110_v7 = vpop.f32.mrf.mxu2 }
 0xfd1   :  { %3895 = vmatpush.msra.mxu3 %v3531_v2  ;;  %3766 = vmatmul.f32.vlgmr.msrb.gmra.mxu2 %v3260_v49  ;;  %v3156_v10 = vpop.f32.mrf.mxu3  ;;  %v3111_v23 = vadd.f32 %v3110_v7, %v2854_v34 }
 0xfd2   :  { %3812 = vmatmul.f32.vlgmr.msrb.gmra.mxu3 %v3262_v1  ;;  %3830 = vmatpush.msrb.mxu0 %v3479_v19  ;;  %v3176_v15 = vpop.f32.mrf.mxu0  ;;  %v3157_v20 = vadd.f32 %v3156_v10, %v2856_v37 }
 0xfd3   :  { %3850 = vmatpush.msra.mxu2 %v3498_v5  ;;  %3876 = vmatpush.msrb.mxu1 %v3511_v6  ;;  %v3222_v18 = vpop.f32.mrf.mxu1  ;;  %v3177_v25 = vadd.f32 %v3176_v15, %v2857_v14  ;;  %v3276_v26 = vmax.f32 %v3111_v23, 0.0 }
 0xfd4   :  { %3896 = vmatpush.msra.mxu3 %v3530_v32  ;;  %3746 = vmatmul.f32.gmra.mxu0 %v3275_v4  ;;  %v3223_v27 = vadd.f32 %v3222_v18, %v2859_v9  ;;  %v3278_v29 = vmax.f32 %v3157_v20, 0.0 }
 0xfd5   :  { %3792 = vmatmul.f32.gmra.mxu1 %v3277_v8  ;;  %3831 = vmatpush.msrb.mxu0 %v3478_v11  ;;  %v3263_v37 = vmax.f32 %v3177_v25, 0.0 }
 0xfd6   :  { %3851 = vmatpush.msra.mxu2 %v3497_v17  ;;  %3877 = vmatpush.msrb.mxu1 %v3510_v42  ;;  %v3265_v39 = vmax.f32 %v3223_v27, 0.0 }
 0xfd7   :  { %3897 = vmatpush.msra.mxu3 %v3529_v22  ;;  %3832 = vmatpush.msrb.mxu0 %v3477_v3 }
 0xfd8   :  { %3852 = vmatpush.msra.mxu2 %v3496_v24  ;;  %3878 = vmatpush.msrb.mxu1 %v3509_v48  ;;  %v3199_v34 = vpop.f32.mrf.mxu2 }
 0xfd9   :  { %3898 = vmatpush.msra.mxu3 %v3528_v43  ;;  %3833 = vmatpush.msrb.mxu0 %v3476_v12  ;;  %v3245_v36 = vpop.f32.mrf.mxu3  ;;  %v3200_v61 = vadd.f32 %v3199_v34, %v2858_v33 }
 0xfda   :  { %3853 = vmatpush.msra.mxu2 %v3495_v0  ;;  %3879 = vmatpush.msrb.mxu1 %v3508_v28  ;;  %v3179_v21 = vpop.f32.mrf.mxu0  ;;  %v3246_v13 = vadd.f32 %v3245_v36, %v2860_v35 }
 0xfdb   :  { %3899 = vmatpush.msra.mxu3 %v3527_v30  ;;  %3769 = vmatmul.f32.gmra.mxu2 %v3276_v26  ;;  %v3225_v40 = vpop.f32.mrf.mxu1  ;;  %v3180_v45 = vadd.f32 %v3179_v21, %v2857_v14  ;;  %v3264_v51 = vmax.f32 %v3200_v61, 0.0  ;;  %v4232_v14 = vld [vmem:[%s5506_s26] ss:$0 sm:$0xff] }
 0xfdc   :  { %3815 = vmatmul.f32.gmra.mxu3 %v3278_v29  ;;  %3834 = vmatpush.msrb.mxu0 %v3475_v52  ;;  %v3226_v47 = vadd.f32 %v3225_v40, %v2859_v9  ;;  %v3266_v54 = vmax.f32 %v3246_v13, 0.0 }
 0xfdd   :  { %3854 = vmatpush.msra.mxu2 %v3494_v57  ;;  %3880 = vmatpush.msrb.mxu1 %v3507_v38  ;;  %v3279_v49 = vmax.f32 %v3180_v45, 0.0 }
 0xfde   :  { %3900 = vmatpush.msra.mxu3 %v3526_v59  ;;  %3835 = vmatmul.f32.vlgmr.msrb.gmra.mxu0 %v3263_v37  ;;  %v3281_v63 = vmax.f32 %v3226_v47, 0.0 }
 0xfdf   :  { %3881 = vmatmul.f32.vlgmr.msrb.gmra.mxu1 %v3265_v39  ;;  %3855 = vmatpush.msra.mxu2 %v3493_v44 }
 0xfe0   :  { %3901 = vmatpush.msra.mxu3 %v3525_v31  ;;  %v3202_v56 = vpop.f32.mrf.mxu2 }
 0xfe1   :  { %3856 = vmatpush.msra.mxu2 %v3492_v46  ;;  %v3248_v58 = vpop.f32.mrf.mxu3  ;;  %v3203_v16 = vadd.f32 %v3202_v56, %v2858_v33 }
 0xfe2   :  { %3902 = vmatpush.msra.mxu3 %v3524_v50  ;;  %v3249_v1 = vadd.f32 %v3248_v58, %v2860_v35 }
 0xfe3   :  { %3857 = vmatpush.msra.mxu2 %v3491_v53  ;;  %v3280_v2 = vmax.f32 %v3203_v16, 0.0 }
 0xfe4   :  { %3903 = vmatpush.msra.mxu3 %v3523_v55  ;;  %3858 = vmatmul.f32.vlgmr.msra.gmra.mxu2 %v3264_v51  ;;  %v3282_v19 = vmax.f32 %v3249_v1, 0.0 }
 0xfe5   :  { %3904 = vmatmul.f32.vlgmr.msra.gmra.mxu3 %v3266_v54 }
 0xfe6   :  { %3838 = vmatmul.f32.gmra.mxu0 %v3279_v49 }
 0xfe7   :  { %3884 = vmatmul.f32.gmra.mxu1 %v3281_v63 }
 0xfec   :  { %3861 = vmatmul.f32.gmra.mxu2 %v3280_v2 }
 0xfed   :  { %3907 = vmatmul.f32.gmra.mxu3 %v3282_v19 }
0x100b   :  { %v3560_v4 = vpop.f32.mrf.mxu0 }
0x100c   :  { %v3606_v5 = vpop.f32.mrf.mxu1  ;;  %v3561_v23 = vadd.f32 %v4232_v14, %v3560_v4 }
0x1017   :  { %v3583_v6 = vpop.f32.mrf.mxu2 }
0x1018   :  { %v3629_v7 = vpop.f32.mrf.mxu3  ;;  %v3584_v42 = vadd.f32 %v3583_v6, %v3561_v23 }
0x101a   :  { %v3607_v20 = vadd.f32 %v3606_v5, %v3584_v42 }
0x101c   :  { %v3630_v48 = vadd.f32 %v3629_v7, %v3607_v20 }
0x102c   :  { %v3563_v8 = vpop.f32.mrf.mxu0 }
0x102d   :  { %v3609_v32 = vpop.f32.mrf.mxu1  ;;  %v3564_v22 = vadd.f32 %v4232_v14, %v3563_v8 }
0x1034   :  { %v3652_v15 = vpop.f32.mrf.mxu0 }
0x1035   :  { %v3698_v17 = vpop.f32.mrf.mxu1  ;;  %v3653_v43 = vadd.f32 %v3652_v15, %v3630_v48  ;;  %v3969_v48 = vld [vmem:[%s4040_s11] sm:$0xff] }
0x1038   :  { %v3586_v10 = vpop.f32.mrf.mxu2 }
0x1039   :  { %v3632_v11 = vpop.f32.mrf.mxu3  ;;  %v3587_v24 = vadd.f32 %v3586_v10, %v3564_v22  ;;  %v3972_v22 = vld [vmem:[%s4040_s11 + $0x18] sm:$0xff] }
0x103a   :  { %3995 = vmatpush.msra.mxu0 %v3972_v22 }
0x103b   :  { %v3610_v12 = vadd.f32 %v3609_v32, %v3587_v24  ;;  %v3970_v24 = vld [vmem:[%s4040_s11 + $0x8] sm:$0xff] }
0x103d   :  { %v3655_v3 = vpop.f32.mrf.mxu0  ;;  %v3633_v28 = vadd.f32 %v3632_v11, %v3610_v12 }
0x103e   :  { %v3701_v25 = vpop.f32.mrf.mxu1 }
0x103f   :  { %v3656_v33 = vadd.f32 %v3655_v3, %v3633_v28  ;;  %v3971_v3 = vld [vmem:[%s4040_s11 + $0x10] sm:$0xff] }
0x1040   :  { %v3675_v9 = vpop.f32.mrf.mxu2  ;;  %3996 = vmatpush.msra.mxu0 %v3971_v3 }
0x1041   :  { %v3721_v18 = vpop.f32.mrf.mxu3  ;;  %v3676_v0 = vadd.f32 %v3675_v9, %v3653_v43 }
0x1042   :  { %3997 = vmatpush.msra.mxu0 %v3970_v24 }
0x1043   :  { %v3699_v30 = vadd.f32 %v3698_v17, %v3676_v0 }
0x1044   :  { %3998 = vmatpush.msra.mxu0 %v3969_v48 }
0x1045   :  { %v3722_v52 = vadd.f32 %v3721_v18, %v3699_v30 }
0x1047   :  { %v3744_v29 = vpop.f32.mrf.mxu0 }
0x1048   :  { %v3790_v34 = vpop.f32.mrf.mxu1  ;;  %v3745_v57 = vadd.f32 %v3744_v29, %v3722_v52 }
0x104a   :  { %v3678_v26 = vpop.f32.mrf.mxu2 }
0x104b   :  { %v3724_v27 = vpop.f32.mrf.mxu3  ;;  %v3679_v35 = vadd.f32 %v3678_v26, %v3656_v33 }
0x104d   :  { %v3702_v38 = vadd.f32 %v3701_v25, %v3679_v35 }
0x104f   :  { %v3725_v21 = vadd.f32 %v3724_v27, %v3702_v38 }
0x1051   :  { %v3747_v39 = vpop.f32.mrf.mxu0 }
0x1052   :  { %v3793_v61 = vpop.f32.mrf.mxu1  ;;  %v3748_v31 = vadd.f32 %v3747_v39, %v3725_v21  ;;  %v4234_v39 = vld [vmem:[%s5724_s4] ss:$0 sm:$0xff] }
0x1054   :  { %v3767_v36 = vpop.f32.mrf.mxu2 }
0x1055   :  { %v3813_v37 = vpop.f32.mrf.mxu3  ;;  %v3768_v59 = vadd.f32 %v3767_v36, %v3745_v57 }
0x1057   :  { %v3791_v44 = vadd.f32 %v3790_v34, %v3768_v59 }
0x1059   :  { %v3814_v45 = vadd.f32 %v3813_v37, %v3791_v44  ;;  %v4233_v37 = vld [vmem:[%s5718_s30] ss:$0 sm:$0xff] }
0x105b   :  { %v3836_v47 = vpop.f32.mrf.mxu0 }
0x105c   :  { %v3837_v50 = vadd.f32 %v3836_v47, %v3814_v45  ;;  %v3882_v53 = vpop.f32.mrf.mxu1  ;;  %v4235_v47 = vld [vmem:[%s5734_s8] ss:$0 sm:$0xff] }
0x105e   :  { %v3770_v40 = vpop.f32.mrf.mxu2 }
0x105f   :  { %v3816_v13 = vpop.f32.mrf.mxu3  ;;  %v3771_v46 = vadd.f32 %v3770_v40, %v3748_v31 }
0x1061   :  { %v3794_v51 = vadd.f32 %v3793_v61, %v3771_v46 }
0x1063   :  { %v3817_v49 = vadd.f32 %v3816_v13, %v3794_v51  ;;  %v3839_v16 = vpop.f32.mrf.mxu0 }
0x1064   :  { %v3885_v6 = vpop.f32.mrf.mxu1 }
0x1065   :  { %v3840_v1 = vadd.f32 %v3839_v16, %v3817_v49 }
0x1067   :  { %v3859_v54 = vpop.f32.mrf.mxu2 }
0x1068   :  { %v3860_v55 = vadd.f32 %v3859_v54, %v3837_v50  ;;  %v3905_v56 = vpop.f32.mrf.mxu3 }
0x106a   :  { %v3883_v58 = vadd.f32 %v3882_v53, %v3860_v55 }
0x106c   :  { %v3906_v63 = vadd.f32 %v3905_v56, %v3883_v58 }
0x106e   :  { %v3911_v2 = vadd.f32 %v3906_v63, %v5266_v62 }
0x106f   :  { %v3862_v19 = vpop.f32.mrf.mxu2 }
0x1070   :  { %v3863_v4 = vadd.f32 %v3862_v19, %v3840_v1  ;;  %v3915_v5 = vsel %vm181_vm1, %v3911_v2, 0.0  ;;  %v3908_v8 = vpop.f32.mrf.mxu3 }
0x1071   :  { %3916 = vadd.xlane.f32.xlu1 %v3915_v5 }
0x1072   :  { %v3886_v7 = vadd.f32 %v3885_v6, %v3863_v4 }
0x1074   :  { %v3909_v32 = vadd.f32 %v3908_v8, %v3886_v7 }
0x1076   :  { %v3912_v10 = vadd.f32 %v3909_v32, %v5312_v41 }
0x1078   :  { %v3918_v62 = vsel %vm181_vm1, %v3912_v10, 0.0 }
0x1079   :  { %3919 = vadd.xlane.f32.xlu0 %v3918_v62 }
0x10e4   :  { %v3917_v11 = vpop.xlane.xlu1 %3916 }
0x10e5   :  { %v3921_v14 = vmul.f32 %v3917_v11, %v4543_v60 }
0x10e7   :  { %v3923_v15 = vsub.f32 %v3911_v2, %v3921_v14 }
0x10e9   :  { %v3925_v23 = vmul.f32 %v3923_v15, %v3923_v15 }
0x10eb   :  { %v3927_v17 = vsel %vm181_vm1, %v3925_v23, 0.0 }
0x10ec   :  { %v3920_v42 = vpop.xlane.xlu0 %3919  ;;  %3928 = vadd.xlane.f32.xlu1 %v3927_v17 }
0x10ed   :  { %v3922_v41 = vmul.f32 %v3920_v42, %v4543_v60 }
0x10ef   :  { %v3924_v9 = vsub.f32 %v3912_v10, %v3922_v41 }
0x10f1   :  { %v3926_v18 = vmul.f32 %v3924_v9, %v3924_v9 }
0x10f3   :  { %v3930_v20 = vsel %vm181_vm1, %v3926_v18, 0.0 }
0x10f4   :  { %3931 = vadd.xlane.f32.xlu0 %v3930_v20 }
0x115f   :  { %v3929_v25 = vpop.xlane.xlu1 %3928 }
0x1160   :  { %v3933_v43 = vmul.f32 %v3929_v25, %v4543_v60 }
0x1162   :  { %v3935_v12 = vadd.f32 1e-05, %v3933_v43 }
0x1164   :  { %4314 = vrsqrt.f32 %v3935_v12  ;;  %vm3943_vm12 = vweird.f32 %v3935_v12 }
0x1167   :  { %v3932_v26 = vpop.xlane.xlu0 %3931 }
0x1168   :  { %v3934_v27 = vmul.f32 %v3932_v26, %v4543_v60 }
0x116a   :  { %v4315_v0 = vpop.eup %4314  ;;  %v3936_v28 = vadd.f32 1e-05, %v3934_v27 }
0x116b   :  { %v3938_v29 = vmul.f32 %v4315_v0, %v3935_v12  ;;  %vm3944_vm11 = vweird.f32 %v4315_v0 }
0x116c   :  { %4316 = vrsqrt.f32 %v3936_v28  ;;  %vm3945_vm13 = vmor %vm3943_vm12, %vm3944_vm11  ;;  %vm3953_vm15 = vweird.f32 %v3936_v28 }
0x116d   :  { %v3939_v30 = vmul.f32 %v4315_v0, %v3938_v29 }
0x116f   :  { %v3940_v33 = vmul.f32 0.5, %v3939_v30 }
0x1171   :  { %v3941_v34 = vsub.f32 1.5, %v3940_v33 }
0x1172   :  { %v4317_v52 = vpop.eup %4316 }
0x1173   :  { %v3942_v35 = vmul.f32 %v4315_v0, %v3941_v34  ;;  %v3948_v36 = vmul.f32 %v4317_v52, %v3936_v28  ;;  %vm3954_vm14 = vweird.f32 %v4317_v52 }
0x1174   :  { %vm3955_vm0 = vmor %vm3953_vm15, %vm3954_vm14 }
0x1175   :  { %v3946_v57 = vsel %vm3945_vm13, %v4315_v0, %v3942_v35  ;;  %v3949_v38 = vmul.f32 %v4317_v52, %v3948_v36 }
0x1176   :  { %v3957_v59 = vmul.f32 %v3946_v57, %v3923_v15 }
0x1177   :  { %v3950_v60 = vmul.f32 0.5, %v3949_v38 }
0x1178   :  { %v3962_v21 = vmul.f32 %v4233_v37, %v3957_v59 }
0x1179   :  { %v3951_v61 = vsub.f32 1.5, %v3950_v60 }
0x117a   :  { %v3967_v44 = vadd.f32 %v4234_v39, %v3962_v21 }
0x117b   :  { %v3952_v40 = vmul.f32 %v4317_v52, %v3951_v61 }
0x117c   :  { %4165 = vmatmul.msk.f32.vlgmr.msra.gmra.mxu0 %vm181_vm1, %v3967_v44 }
0x117d   :  { %v3956_v13 = vsel %vm3955_vm0, %v4317_v52, %v3952_v40 }
0x117e   :  { %v3958_v31 = vmul.f32 %v3956_v13, %v3924_v9 }
0x1180   :  { %v3963_v45 = vmul.f32 %v4233_v37, %v3958_v31 }
0x1182   :  { %v3968_v46 = vadd.f32 %v4234_v39, %v3963_v45 }
0x1184   :  { %4166 = vmatmul.msk.f32.gmra.mxu0 %vm181_vm1, %v3968_v46 }
0x11f9   :  { %v4000_v50 = vpop.f32.mrf.mxu0 }
0x11fa   :  { %v4001_v51 = vadd.f32 %v4235_v47, %v4000_v50 }
0x11fc   :  { %4007 = vst.msk [vmem:[%s4042_s15] sm:$0xff] %vm4006_vm7, %v4001_v51 }
0x1201   :  { %v4003_v53 = vpop.f32.mrf.mxu0 }
0x1202   :  { %v4004_v54 = vadd.f32 %v4235_v47, %v4003_v53 }
0x1204   :  { %4008 = vst.msk [vmem:[%s4042_s15 + $0x8] sm:$0xff] %vm4006_vm7, %v4004_v54 }

</bundles_post_ra>
